<compile_context>
chip_gen: v7x
topology: tpu7x:2x2x1
jax: 0.10.0
libtpu: 0.0.40
codegen_flags: <defaults>
</compile_context>

<pallas_src>
import jax
import jax.numpy as jnp
from jax.experimental import pallas as pl
from jax.experimental.pallas import tpu as pltpu

# ----------------------------- configuration ---------------------------------
B = 2
H = W = 7               # minigrid observation spatial size (endpool => stays 7x7)
IMG_CH = 3              # (object, color, state) integer channels
MAX_VALUE = 9           # ImageBOWEmbedding.get_max_value default
EMB_DIM = 128
IMAGE_DIM = 128
MEMORY_DIM = 128
N_ACTIONS = 7
BN_EPS = 1e-5
CONV_CH = 128

PH, PW = H + 2, W + 2   # zero-padded spatial grid (9x9) for pad=1 convs
IMG_STRIDE = 88         # padded-flat rows per image (81 padded to 88 => sublane aligned)
ROWS = B * IMG_STRIDE   # 176 flat rows; row r: image b = r//88, local = r%88, y=local//9, x=local%9
OFF = 16                # offset of real data inside the shifted-view scratch (guard band)
XBIG_ROWS = 208         # >= OFF + ROWS + 10 (max tap shift), multiple of 8
VOCAB_PAD = 32          # 3*MAX_VALUE = 27 padded to 32 for an aligned contraction
OOB_IDX = 100           # sentinel index on padded border / alignment rows (never in [0,27))
K_CONV = 9 * CONV_CH    # 1152 im2col contraction depth

# row offsets inside the packed bf16 weight slab (all multiples of 16 => bf16-sublane aligned)
OFF_C1W = 0
OFF_C2W = OFF_C1W + K_CONV          # 1152
OFF_HW1 = OFF_C2W + K_CONV          # 2304
OFF_HW2 = OFF_HW1 + MEMORY_DIM      # 2432
OFF_BOW = OFF_HW2 + MEMORY_DIM      # 2560
WBIG_ROWS = OFF_BOW + VOCAB_PAD     # 2592

# row indices inside the (8,128) f32 bias slab
B_CONV1, B_CONV2, B_LSTM_I, B_LSTM_F, B_LSTM_G, B_LSTM_O, B_HEAD1, B_HEAD2 = range(8)
BIAS_ROWS = 8


# ------------------------------- fused kernel ---------------------------------
def fused_kernel(idx_ref, mem0_ref, wbig_ref, wlstm_ref, bias_ref,   # inputs
                 head_ref, memout_ref,                               # outputs (per step)
                 xbig_ref, col_ref, state_ref):                      # VMEM scratch
    t = pl.program_id(0)

    # One-time init: zero the padded slab (so guard bands are 0 forever — they are never
    # written afterwards) and load the initial (h,c) state into the persistent scratch.
    @pl.when(t == 0)
    def _init():
        xbig_ref[...] = jnp.zeros_like(xbig_ref)
        state_ref[...] = mem0_ref[...]

    # ---- ImageBOWEmbedding: multi-hot (padded to 32) @ table; border rows stay exactly 0 ----
    idx = idx_ref[0, :, :]                                   # (ROWS,3) int32, pad rows = OOB_IDX
    iota = jax.lax.broadcasted_iota(jnp.int32, (ROWS, VOCAB_PAD), 1)
    hit = ((iota == idx[:, 0:1])
           | (iota == idx[:, 1:2] + MAX_VALUE)
           | (iota == idx[:, 2:3] + 2 * MAX_VALUE))
    mh = hit.astype(jnp.bfloat16)                            # exact 0/1 in bf16
    emb = jnp.dot(mh, wbig_ref[OFF_BOW:OFF_BOW + VOCAB_PAD, :],
                  preferred_element_type=jnp.float32)        # (ROWS,128) f32
    # interior-cell mask derived directly from the padded indices (no extra input / DMA)
    mask = (idx[:, 0:1] != OOB_IDX).astype(jnp.float32)      # (ROWS,1)
    maskb = jnp.broadcast_to(mask, (ROWS, CONV_CH))          # hoisted once, reused by both convs

    xbig_ref[OFF:OFF + ROWS, :] = emb                        # borders already 0 => invariant holds

    # ---- 3x3 conv (pad=1): 9 shifted taps gathered into an im2col slab, ONE bf16 matmul ----
    def conv3x3(w_off, b_row):
        for tap in range(9):                                 # tap = kh*3 + kw
            s = (tap // 3 - 1) * PW + (tap % 3 - 1)          # uniform row shift in flat layout
            col_ref[:, tap * CONV_CH:(tap + 1) * CONV_CH] = (
                xbig_ref[OFF + s:OFF + s + ROWS, :].astype(jnp.bfloat16))
        acc = jnp.dot(col_ref[...], wbig_ref[w_off:w_off + K_CONV, :],
                      preferred_element_type=jnp.float32)    # (ROWS,128) f32
        # BN folded into weights/bias; ReLU; re-zero border rows (padding + endpool invariant)
        return jnp.maximum(acc + bias_ref[b_row:b_row + 1, :], 0.0) * maskb

    x1 = conv3x3(OFF_C1W, B_CONV1)
    xbig_ref[OFF:OFF + ROWS, :] = x1
    x2 = conv3x3(OFF_C2W, B_CONV2)                           # (ROWS,128), border rows = 0

    # ---- endpool: MaxPool2d((7,7)) == per-image max (borders 0, interior >= 0 post-ReLU) ----
    pooled = jnp.concatenate(
        [jnp.max(x2[b * IMG_STRIDE:(b + 1) * IMG_STRIDE, :], axis=0, keepdims=True)
         for b in range(B)], axis=0)                         # (B,128), 88-aligned slices
    x = jnp.maximum(pooled, 0.0)                             # F.relu(film_pool(x))

    # ---- LSTMCell: one fused [x|h_prev] @ [w_ih;w_hh] matmul (gate order i,f,g,o) ----
    h_prev = state_ref[:, :MEMORY_DIM]
    c_prev = state_ref[:, MEMORY_DIM:]
    xh = jnp.concatenate([x, h_prev], axis=1).astype(jnp.bfloat16)           # (B,256)
    gates = jnp.dot(xh, wlstm_ref[...], preferred_element_type=jnp.float32)  # (B,512)
    i_g = jax.nn.sigmoid(gates[:, 0 * MEMORY_DIM:1 * MEMORY_DIM] + bias_ref[B_LSTM_I:B_LSTM_I + 1, :])
    f_g = jax.nn.sigmoid(gates[:, 1 * MEMORY_DIM:2 * MEMORY_DIM] + bias_ref[B_LSTM_F:B_LSTM_F + 1, :])
    g_g = jnp.tanh(gates[:, 2 * MEMORY_DIM:3 * MEMORY_DIM] + bias_ref[B_LSTM_G:B_LSTM_G + 1, :])
    o_g = jax.nn.sigmoid(gates[:, 3 * MEMORY_DIM:4 * MEMORY_DIM] + bias_ref[B_LSTM_O:B_LSTM_O + 1, :])
    c_new = f_g * c_prev + i_g * g_g
    h_new = o_g * jnp.tanh(c_new)
    new_state = jnp.concatenate([h_new, c_new], axis=1)                      # (B,256)
    state_ref[...] = new_state                               # carried to the next step
    memout_ref[0, :, :] = new_state                          # per-step memory output

    # ---- actor/critic heads fused: one (B,128)@(128,128) per layer, one lane-dense store ----
    h1 = jnp.tanh(jnp.dot(h_new.astype(jnp.bfloat16), wbig_ref[OFF_HW1:OFF_HW1 + MEMORY_DIM, :],
                          preferred_element_type=jnp.float32)
                  + bias_ref[B_HEAD1:B_HEAD1 + 1, :])        # lanes 0..63 = actor h1, 64..127 = critic h1
    h2 = (jnp.dot(h1.astype(jnp.bfloat16), wbig_ref[OFF_HW2:OFF_HW2 + MEMORY_DIM, :],
                  preferred_element_type=jnp.float32)
          + bias_ref[B_HEAD2:B_HEAD2 + 1, :])                # lanes 0..6 = logits, lane 7 = value, rest 0
    lane = jax.lax.broadcasted_iota(jnp.int32, (B, 128), 1)
    is_logit = lane < N_ACTIONS
    m = jnp.max(jnp.where(is_logit, h2, jnp.float32(-1e30)), axis=1, keepdims=True)
    se = jnp.sum(jnp.where(is_logit, jnp.exp(h2 - m), 0.0), axis=1, keepdims=True)
    lse = jnp.log(se) + m
    head_ref[0, :, :] = jnp.where(is_logit, h2 - lse, h2)    # log-probs | value, single store


# ------------------------------- wrapper ---------------------------------------
@jax.jit
def trajectory_lstm_forward(image_seq, memory0, kp):
    """T-step rollout of TrajectoryLSTM.forward (bow_endpool_res, use_memory=True,
    use_instr=False).  Each grid step reproduces one call of the PyTorch forward:
    (obs_t, memory_t) -> (log_probs_t, value_t, memory_{t+1})."""
    T = image_seq.shape[0]
    # Only XLA glue: pad the tiny int images to the (9,9) grid, then pad the 81 flat rows per
    # image to 88 (sublane alignment) with the OOB sentinel, giving (T, 176, 3) indices.
    img = image_seq.astype(jnp.int32)
    padded = jnp.pad(img, ((0, 0), (0, 0), (1, 1), (1, 1), (0, 0)), constant_values=OOB_IDX)
    padded = padded.reshape(T, B, PH * PW, IMG_CH)
    padded = jnp.pad(padded, ((0, 0), (0, 0), (0, IMG_STRIDE - PH * PW), (0, 0)),
                     constant_values=OOB_IDX)
    idx_seq = padded.reshape(T, ROWS, IMG_CH)

    head_seq, mem_seq = pl.pallas_call(
        fused_kernel,
        out_shape=(jax.ShapeDtypeStruct((T, B, 128), jnp.float32),
                   jax.ShapeDtypeStruct((T, B, 2 * MEMORY_DIM), jnp.float32)),
        grid_spec=pltpu.PrefetchScalarGridSpec(
            num_scalar_prefetch=0,
            grid=(T,),
            in_specs=[
                pl.BlockSpec((1, ROWS, IMG_CH), lambda t: (t, 0, 0)),              # per-step obs
                pl.BlockSpec((B, 2 * MEMORY_DIM), lambda t: (0, 0)),               # initial memory
                pl.BlockSpec((WBIG_ROWS, CONV_CH), lambda t: (0, 0)),              # bf16 weights (resident)
                pl.BlockSpec((2 * MEMORY_DIM, 4 * MEMORY_DIM), lambda t: (0, 0)),  # bf16 LSTM weights
                pl.BlockSpec((BIAS_ROWS, CONV_CH), lambda t: (0, 0)),              # f32 bias slab
            ],
            out_specs=(
                pl.BlockSpec((1, B, 128), lambda t: (t, 0, 0)),                    # log-probs | value
                pl.BlockSpec((1, B, 2 * MEMORY_DIM), lambda t: (t, 0, 0)),         # per-step memory
            ),
            scratch_shapes=[
                pltpu.VMEM((XBIG_ROWS, CONV_CH), jnp.float32),       # zero-padded flat slab
                pltpu.VMEM((ROWS, K_CONV), jnp.bfloat16),            # im2col slab
                pltpu.VMEM((B, 2 * MEMORY_DIM), jnp.float32),        # carried (h,c) state
            ],
        ),
        # Time axis is a true recurrence => "arbitrary".
        # TODO(synk): on v7x, add a leading "parallel" env-group axis once B is large enough
        # to shard across both TensorCores.
        compiler_params=pltpu.CompilerParams(dimension_semantics=("arbitrary",)),
    )(idx_seq, memory0, kp["wbig"], kp["w_lstm"], kp["bias_slab"])

    # TODO(synk): torch.distributions.Categorical is returned as normalized log-probs only;
    # extra_predictions is empty because aux_info=None.
    return {"log_probs": head_seq[:, :, :N_ACTIONS],
            "value": head_seq[:, :, N_ACTIONS],
            "memory_seq": mem_seq,
            "memory": mem_seq[-1]}


# ---------------------- one-time parameter preparation --------------------------
def prepare_params(p):
    """Repack PyTorch-layout parameters into kernel-ready slabs (run ONCE, not per step):
    BN folded into conv weights/bias, transposes hoisted, BOW vocab padded 27->32, actor and
    critic fused into block weight matrices, matmul weights cast to bf16."""

    def fold_conv(w_pt, b_pt, gamma, beta, mean, var):
        scale = gamma / jnp.sqrt(var + BN_EPS)              # per output channel
        shift = beta - mean * scale
        w = jnp.transpose(w_pt, (2, 3, 1, 0)) * scale       # (kh,kw,cin,cout) * scale[cout]
        b = b_pt * scale + shift
        return w.reshape(9 * w.shape[2], w.shape[3]), b.reshape(1, -1)

    c1w, c1b = fold_conv(p["conv1_w"], p["conv1_b"], p["bn1_gamma"],
                         p["bn1_beta"], p["bn1_mean"], p["bn1_var"])
    c2w, c2b = fold_conv(p["conv2_w"], p["conv2_b"], p["bn2_gamma"],
                         p["bn2_beta"], p["bn2_mean"], p["bn2_var"])

    # fused head weights: W1 = [actor_w1.T | critic_w1.T]; W2 block-diagonal into lanes 0..6 / 7
    head_w1 = jnp.concatenate([p["actor_w1"].T, p["critic_w1"].T], axis=1)          # (128,128)
    head_w2 = jnp.zeros((MEMORY_DIM, 128), jnp.float32)
    head_w2 = head_w2.at[0:64, 0:N_ACTIONS].set(p["actor_w2"].T)
    head_w2 = head_w2.at[64:128, N_ACTIONS:N_ACTIONS + 1].set(p["critic_w2"].T)

    bow = jnp.zeros((VOCAB_PAD, EMB_DIM), jnp.float32).at[:3 * MAX_VALUE].set(p["bow_table"])

    wbig = jnp.concatenate([c1w, c2w, head_w1, head_w2, bow], axis=0).astype(jnp.bfloat16)
    assert wbig.shape == (WBIG_ROWS, CONV_CH)

    # fused LSTM weights: [x | h] @ [w_ih.T ; w_hh.T]
    w_lstm = jnp.concatenate([p["w_ih"].T, p["w_hh"].T], axis=0).astype(jnp.bfloat16)  # (256,512)

    # f32 bias slab: conv1_b, conv2_b, lstm(i,f,g,o), head_b1(actor|critic), head_b2(logits|value)
    b_lstm = (p["b_ih"] + p["b_hh"]).reshape(4, MEMORY_DIM)
    head_b1 = jnp.concatenate([p["actor_b1"], p["critic_b1"]]).reshape(1, 128)
    head_b2 = jnp.zeros((1, 128), jnp.float32)
    head_b2 = head_b2.at[0, :N_ACTIONS].set(p["actor_b2"])
    head_b2 = head_b2.at[0, N_ACTIONS].set(p["critic_b2"][0])
    bias_slab = jnp.concatenate([c1b, c2b, b_lstm, head_b1, head_b2], axis=0)
    assert bias_slab.shape == (BIAS_ROWS, CONV_CH)

    return {"wbig": wbig, "w_lstm": w_lstm, "bias_slab": bias_slab}


# --------------------------- deterministic init ---------------------------------
def init_params(key):
    ks = jax.random.split(key, 13)
    p = {}
    # Embedding(3*max_value, 128): default normal(0,1)
    p["bow_table"] = jax.random.normal(ks[0], (3 * MAX_VALUE, EMB_DIM), jnp.float32)
    # Conv2d weights (Cout, Cin, 3, 3) + bias — deterministic scaled normal (synthetic)
    conv_scale = 1.0 / jnp.sqrt(jnp.float32(128 * 9))
    p["conv1_w"] = jax.random.normal(ks[1], (128, EMB_DIM, 3, 3), jnp.float32) * conv_scale
    p["conv1_b"] = jax.random.normal(ks[2], (128,), jnp.float32) * 0.01
    p["conv2_w"] = jax.random.normal(ks[3], (IMAGE_DIM, 128, 3, 3), jnp.float32) * conv_scale
    p["conv2_b"] = jax.random.normal(ks[4], (IMAGE_DIM,), jnp.float32) * 0.01
    # BatchNorm2d (eval mode uses running stats; fresh-init statistics here)
    for i, c in ((1, 128), (2, IMAGE_DIM)):
        p[f"bn{i}_gamma"] = jnp.ones((c,), jnp.float32)
        p[f"bn{i}_beta"] = jnp.zeros((c,), jnp.float32)
        p[f"bn{i}_mean"] = jnp.zeros((c,), jnp.float32)
        p[f"bn{i}_var"] = jnp.ones((c,), jnp.float32)
    # LSTMCell(image_dim, memory_dim): PyTorch default U(-1/sqrt(H), 1/sqrt(H)); gate order i,f,g,o
    k = 1.0 / jnp.sqrt(jnp.float32(MEMORY_DIM))
    p["w_ih"] = jax.random.uniform(ks[5], (4 * MEMORY_DIM, IMAGE_DIM), jnp.float32, -k, k)
    p["w_hh"] = jax.random.uniform(ks[6], (4 * MEMORY_DIM, MEMORY_DIM), jnp.float32, -k, k)
    p["b_ih"] = jax.random.uniform(ks[7], (4 * MEMORY_DIM,), jnp.float32, -k, k)
    p["b_hh"] = jax.random.uniform(ks[8], (4 * MEMORY_DIM,), jnp.float32, -k, k)

    # Linear layers: initialize_parameters => normal(0,1) row-normalized, bias=0
    def lin(kk, out_f, in_f):
        w = jax.random.normal(kk, (out_f, in_f), jnp.float32)
        return w / jnp.sqrt(jnp.sum(w * w, axis=1, keepdims=True))

    p["actor_w1"], p["actor_b1"] = lin(ks[9], 64, MEMORY_DIM), jnp.zeros((64,), jnp.float32)
    p["actor_w2"], p["actor_b2"] = lin(ks[10], N_ACTIONS, 64), jnp.zeros((N_ACTIONS,), jnp.float32)
    p["critic_w1"], p["critic_b1"] = lin(ks[11], 64, MEMORY_DIM), jnp.zeros((64,), jnp.float32)
    p["critic_w2"], p["critic_b2"] = lin(ks[12], 1, 64), jnp.zeros((1,), jnp.float32)
    return p


if __name__ == "__main__":
    key = jax.random.PRNGKey(0)
    pkey, ikey, mkey = jax.random.split(key, 3)
    params = prepare_params(init_params(pkey))      # one-time weight repack (hoisted out of the rollout)

    T = 8                                           # trajectory length per pallas_call
    image_seq = jax.random.randint(ikey, (T, B, H, W, IMG_CH), 0, MAX_VALUE, dtype=jnp.int32)
    memory0 = jax.random.normal(mkey, (B, 2 * MEMORY_DIM), jnp.float32)

    out = trajectory_lstm_forward(image_seq, memory0, params)
    jax.block_until_ready(out)

    assert out["log_probs"].shape == (T, B, N_ACTIONS)
    assert out["value"].shape == (T, B)
    assert out["memory"].shape == (B, 2 * MEMORY_DIM)
    assert out["memory_seq"].shape == (T, B, 2 * MEMORY_DIM)
    assert bool(jnp.all(jnp.isfinite(out["log_probs"])))
    assert bool(jnp.all(jnp.isfinite(out["value"])))
    assert bool(jnp.all(jnp.isfinite(out["memory_seq"])))
    assert bool(jnp.all(jnp.abs(jnp.sum(jnp.exp(out["log_probs"]), axis=-1) - 1.0) < 1e-3))
    print("KERNEL_OK")
</pallas_src>

<mosaic_0001>
module attributes {stable_mosaic.version = 11 : i64} {
  func.func @fused_kernel(%arg0: i32, %arg1: memref<1x176x3xi32, #tpu.memory_space<vmem>>, %arg2: memref<2x256xf32, #tpu.memory_space<vmem>>, %arg3: memref<2592x128xbf16, #tpu.memory_space<vmem>>, %arg4: memref<256x512xbf16, #tpu.memory_space<vmem>>, %arg5: memref<8x128xf32, #tpu.memory_space<vmem>>, %arg6: memref<1x2x128xf32, #tpu.memory_space<vmem>>, %arg7: memref<1x2x256xf32, #tpu.memory_space<vmem>>, %arg8: memref<208x128xf32, #tpu.memory_space<vmem>>, %arg9: memref<176x1152xbf16, #tpu.memory_space<vmem>>, %arg10: memref<2x256xf32, #tpu.memory_space<vmem>>) attributes {dimension_semantics = [#tpu.dimension_semantics<arbitrary>], iteration_bounds = array<i64: 8>, scalar_prefetch = 0 : i64, scratch_operands = 3 : i64, tpu.core_type = #tpu.core_type<tc>, window_params = [{transform_indices = @transform_0, window_bounds = array<i64: 1, 176, 3>}, {pipeline_mode = #tpu.pipeline_mode<synchronous>, transform_indices = @transform_1, window_bounds = array<i64: 2, 256>}, {pipeline_mode = #tpu.pipeline_mode<synchronous>, transform_indices = @transform_2, window_bounds = array<i64: 2592, 128>}, {pipeline_mode = #tpu.pipeline_mode<synchronous>, transform_indices = @transform_3, window_bounds = array<i64: 256, 512>}, {pipeline_mode = #tpu.pipeline_mode<synchronous>, transform_indices = @transform_4, window_bounds = array<i64: 8, 128>}, {transform_indices = @transform_5, window_bounds = array<i64: 1, 2, 128>}, {transform_indices = @transform_6, window_bounds = array<i64: 1, 2, 256>}]} {
    %c0_i32 = arith.constant 0 : i32
    %0 = arith.cmpi eq, %arg0, %c0_i32 : i32
    %1 = arith.extui %0 : i1 to i32
    %c0_i32_0 = arith.constant 0 : i32
    %2 = arith.cmpi ne, %1, %c0_i32_0 : i32
    scf.if %2 {
      %cst_114 = arith.constant 0.000000e+00 : f32
      %199 = vector.broadcast %cst_114 : f32 to vector<208x128xf32>
      %c0_115 = arith.constant 0 : index
      %c0_116 = arith.constant 0 : index
      %200 = vector.load %arg8[%c0_115, %c0_116] : memref<208x128xf32, #tpu.memory_space<vmem>>, vector<208x128xf32>
      tpu.vector_store %arg8[%c0_115, %c0_116], %199 {strides = array<i32>} : memref<208x128xf32, #tpu.memory_space<vmem>>, vector<208x128xf32>,
      %c0_117 = arith.constant 0 : index
      %c0_118 = arith.constant 0 : index
      %201 = vector.load %arg2[%c0_117, %c0_118] : memref<2x256xf32, #tpu.memory_space<vmem>>, vector<2x256xf32>
      %c0_119 = arith.constant 0 : index
      %c0_120 = arith.constant 0 : index
      %202 = vector.load %arg10[%c0_119, %c0_120] : memref<2x256xf32, #tpu.memory_space<vmem>>, vector<2x256xf32>
      tpu.vector_store %arg10[%c0_119, %c0_120], %201 {strides = array<i32>} : memref<2x256xf32, #tpu.memory_space<vmem>>, vector<2x256xf32>,
    } else {
    }
    %c0 = arith.constant 0 : index
    %c0_1 = arith.constant 0 : index
    %c0_2 = arith.constant 0 : index
    %3 = vector.load %arg1[%c0, %c0_1, %c0_2] : memref<1x176x3xi32, #tpu.memory_space<vmem>>, vector<1x176x3xi32>
    %4 = vector.shape_cast %3 : vector<1x176x3xi32> to vector<176x3xi32>
    %5 = tpu.iota {dimensions = array<i32: 1>} : vector<176x32xi32>
    %6 = vector.extract_strided_slice %4 {offsets = [0, 0], sizes = [176, 1], strides = [1, 1]} : vector<176x3xi32> to vector<176x1xi32>
    %7 = vector.broadcast %6 : vector<176x1xi32> to vector<176x32xi32>
    %8 = arith.cmpi eq, %5, %7 : vector<176x32xi32>
    %9 = vector.extract_strided_slice %4 {offsets = [0, 1], sizes = [176, 1], strides = [1, 1]} : vector<176x3xi32> to vector<176x1xi32>
    %c9_i32 = arith.constant 9 : i32
    %10 = vector.broadcast %c9_i32 : i32 to vector<176x1xi32>
    %11 = arith.addi %9, %10 : vector<176x1xi32>
    %12 = vector.broadcast %11 : vector<176x1xi32> to vector<176x32xi32>
    %13 = arith.cmpi eq, %5, %12 : vector<176x32xi32>
    %14 = arith.ori %8, %13 : vector<176x32xi1>
    %15 = vector.extract_strided_slice %4 {offsets = [0, 2], sizes = [176, 1], strides = [1, 1]} : vector<176x3xi32> to vector<176x1xi32>
    %c18_i32 = arith.constant 18 : i32
    %16 = vector.broadcast %c18_i32 : i32 to vector<176x1xi32>
    %17 = arith.addi %15, %16 : vector<176x1xi32>
    %18 = vector.broadcast %17 : vector<176x1xi32> to vector<176x32xi32>
    %19 = arith.cmpi eq, %5, %18 : vector<176x32xi32>
    %20 = arith.ori %14, %19 : vector<176x32xi1>
    %21 = arith.extui %20 : vector<176x32xi1> to vector<176x32xi32>
    %22 = arith.sitofp %21 : vector<176x32xi32> to vector<176x32xf32>
    %23 = arith.truncf %22 : vector<176x32xf32> to vector<176x32xbf16>
    %c2560 = arith.constant 2560 : index
    %c0_3 = arith.constant 0 : index
    %24 = vector.load %arg3[%c2560, %c0_3] : memref<2592x128xbf16, #tpu.memory_space<vmem>>, vector<32x128xbf16>
    %cst = arith.constant dense<0.000000e+00> : vector<176x128xf32>
    %25 = tpu.matmul %23, %24, %cst {dimension_numbers = #tpu.dot_dimension_numbers<[1], [0], [0], [1], [0, 0, 1, 1], [], []>} : vector<176x32xbf16>, vector<32x128xbf16>, vector<176x128xf32> -> vector<176x128xf32>
    %26 = vector.extract_strided_slice %4 {offsets = [0, 0], sizes = [176, 1], strides = [1, 1]} : vector<176x3xi32> to vector<176x1xi32>
    %c100_i32 = arith.constant 100 : i32
    %27 = vector.broadcast %c100_i32 : i32 to vector<176x1xi32>
    %28 = arith.cmpi ne, %26, %27 : vector<176x1xi32>
    %29 = arith.extui %28 : vector<176x1xi1> to vector<176x1xi32>
    %30 = arith.sitofp %29 : vector<176x1xi32> to vector<176x1xf32>
    %31 = vector.shape_cast %30 : vector<176x1xf32> to vector<176x1xf32>
    %32 = vector.broadcast %31 : vector<176x1xf32> to vector<176x128xf32>
    %c16 = arith.constant 16 : index
    %c0_4 = arith.constant 0 : index
    %33 = vector.load %arg8[%c16, %c0_4] : memref<208x128xf32, #tpu.memory_space<vmem>>, vector<176x128xf32>
    tpu.vector_store %arg8[%c16, %c0_4], %25 {strides = array<i32>} : memref<208x128xf32, #tpu.memory_space<vmem>>, vector<176x128xf32>,
    %c6 = arith.constant 6 : index
    %c0_5 = arith.constant 0 : index
    %34 = vector.load %arg8[%c6, %c0_5] : memref<208x128xf32, #tpu.memory_space<vmem>>, vector<176x128xf32>
    %35 = arith.truncf %34 : vector<176x128xf32> to vector<176x128xbf16>
    %c0_6 = arith.constant 0 : index
    %c0_7 = arith.constant 0 : index
    %36 = vector.load %arg9[%c0_6, %c0_7] : memref<176x1152xbf16, #tpu.memory_space<vmem>>, vector<176x128xbf16>
    tpu.vector_store %arg9[%c0_6, %c0_7], %35 {strides = array<i32>} : memref<176x1152xbf16, #tpu.memory_space<vmem>>, vector<176x128xbf16>,
    %c7 = arith.constant 7 : index
    %c0_8 = arith.constant 0 : index
    %37 = vector.load %arg8[%c7, %c0_8] : memref<208x128xf32, #tpu.memory_space<vmem>>, vector<176x128xf32>
    %38 = arith.truncf %37 : vector<176x128xf32> to vector<176x128xbf16>
    %c0_9 = arith.constant 0 : index
    %c128 = arith.constant 128 : index
    %39 = vector.load %arg9[%c0_9, %c128] : memref<176x1152xbf16, #tpu.memory_space<vmem>>, vector<176x128xbf16>
    tpu.vector_store %arg9[%c0_9, %c128], %38 {strides = array<i32>} : memref<176x1152xbf16, #tpu.memory_space<vmem>>, vector<176x128xbf16>,
    %c8 = arith.constant 8 : index
    %c0_10 = arith.constant 0 : index
    %40 = vector.load %arg8[%c8, %c0_10] : memref<208x128xf32, #tpu.memory_space<vmem>>, vector<176x128xf32>
    %41 = arith.truncf %40 : vector<176x128xf32> to vector<176x128xbf16>
    %c0_11 = arith.constant 0 : index
    %c256 = arith.constant 256 : index
    %42 = vector.load %arg9[%c0_11, %c256] : memref<176x1152xbf16, #tpu.memory_space<vmem>>, vector<176x128xbf16>
    tpu.vector_store %arg9[%c0_11, %c256], %41 {strides = array<i32>} : memref<176x1152xbf16, #tpu.memory_space<vmem>>, vector<176x128xbf16>,
    %c15 = arith.constant 15 : index
    %c0_12 = arith.constant 0 : index
    %43 = vector.load %arg8[%c15, %c0_12] : memref<208x128xf32, #tpu.memory_space<vmem>>, vector<176x128xf32>
    %44 = arith.truncf %43 : vector<176x128xf32> to vector<176x128xbf16>
    %c0_13 = arith.constant 0 : index
    %c384 = arith.constant 384 : index
    %45 = vector.load %arg9[%c0_13, %c384] : memref<176x1152xbf16, #tpu.memory_space<vmem>>, vector<176x128xbf16>
    tpu.vector_store %arg9[%c0_13, %c384], %44 {strides = array<i32>} : memref<176x1152xbf16, #tpu.memory_space<vmem>>, vector<176x128xbf16>,
    %c16_14 = arith.constant 16 : index
    %c0_15 = arith.constant 0 : index
    %46 = vector.load %arg8[%c16_14, %c0_15] : memref<208x128xf32, #tpu.memory_space<vmem>>, vector<176x128xf32>
    %47 = arith.truncf %46 : vector<176x128xf32> to vector<176x128xbf16>
    %c0_16 = arith.constant 0 : index
    %c512 = arith.constant 512 : index
    %48 = vector.load %arg9[%c0_16, %c512] : memref<176x1152xbf16, #tpu.memory_space<vmem>>, vector<176x128xbf16>
    tpu.vector_store %arg9[%c0_16, %c512], %47 {strides = array<i32>} : memref<176x1152xbf16, #tpu.memory_space<vmem>>, vector<176x128xbf16>,
    %c17 = arith.constant 17 : index
    %c0_17 = arith.constant 0 : index
    %49 = vector.load %arg8[%c17, %c0_17] : memref<208x128xf32, #tpu.memory_space<vmem>>, vector<176x128xf32>
    %50 = arith.truncf %49 : vector<176x128xf32> to vector<176x128xbf16>
    %c0_18 = arith.constant 0 : index
    %c640 = arith.constant 640 : index
    %51 = vector.load %arg9[%c0_18, %c640] : memref<176x1152xbf16, #tpu.memory_space<vmem>>, vector<176x128xbf16>
    tpu.vector_store %arg9[%c0_18, %c640], %50 {strides = array<i32>} : memref<176x1152xbf16, #tpu.memory_space<vmem>>, vector<176x128xbf16>,
    %c24 = arith.constant 24 : index
    %c0_19 = arith.constant 0 : index
    %52 = vector.load %arg8[%c24, %c0_19] : memref<208x128xf32, #tpu.memory_space<vmem>>, vector<176x128xf32>
    %53 = arith.truncf %52 : vector<176x128xf32> to vector<176x128xbf16>
    %c0_20 = arith.constant 0 : index
    %c768 = arith.constant 768 : index
    %54 = vector.load %arg9[%c0_20, %c768] : memref<176x1152xbf16, #tpu.memory_space<vmem>>, vector<176x128xbf16>
    tpu.vector_store %arg9[%c0_20, %c768], %53 {strides = array<i32>} : memref<176x1152xbf16, #tpu.memory_space<vmem>>, vector<176x128xbf16>,
    %c25 = arith.constant 25 : index
    %c0_21 = arith.constant 0 : index
    %55 = vector.load %arg8[%c25, %c0_21] : memref<208x128xf32, #tpu.memory_space<vmem>>, vector<176x128xf32>
    %56 = arith.truncf %55 : vector<176x128xf32> to vector<176x128xbf16>
    %c0_22 = arith.constant 0 : index
    %c896 = arith.constant 896 : index
    %57 = vector.load %arg9[%c0_22, %c896] : memref<176x1152xbf16, #tpu.memory_space<vmem>>, vector<176x128xbf16>
    tpu.vector_store %arg9[%c0_22, %c896], %56 {strides = array<i32>} : memref<176x1152xbf16, #tpu.memory_space<vmem>>, vector<176x128xbf16>,
    %c26 = arith.constant 26 : index
    %c0_23 = arith.constant 0 : index
    %58 = vector.load %arg8[%c26, %c0_23] : memref<208x128xf32, #tpu.memory_space<vmem>>, vector<176x128xf32>
    %59 = arith.truncf %58 : vector<176x128xf32> to vector<176x128xbf16>
    %c0_24 = arith.constant 0 : index
    %c1024 = arith.constant 1024 : index
    %60 = vector.load %arg9[%c0_24, %c1024] : memref<176x1152xbf16, #tpu.memory_space<vmem>>, vector<176x128xbf16>
    tpu.vector_store %arg9[%c0_24, %c1024], %59 {strides = array<i32>} : memref<176x1152xbf16, #tpu.memory_space<vmem>>, vector<176x128xbf16>,
    %c0_25 = arith.constant 0 : index
    %c0_26 = arith.constant 0 : index
    %61 = vector.load %arg9[%c0_25, %c0_26] : memref<176x1152xbf16, #tpu.memory_space<vmem>>, vector<176x1152xbf16>
    %c0_27 = arith.constant 0 : index
    %c0_28 = arith.constant 0 : index
    %62 = vector.load %arg3[%c0_27, %c0_28] : memref<2592x128xbf16, #tpu.memory_space<vmem>>, vector<1152x128xbf16>
    %cst_29 = arith.constant dense<0.000000e+00> : vector<176x128xf32>
    %63 = tpu.matmul %61, %62, %cst_29 {dimension_numbers = #tpu.dot_dimension_numbers<[1], [0], [0], [1], [0, 0, 1, 1], [], []>} : vector<176x1152xbf16>, vector<1152x128xbf16>, vector<176x128xf32> -> vector<176x128xf32>
    %c0_30 = arith.constant 0 : index
    %c0_31 = arith.constant 0 : index
    %64 = vector.load %arg5[%c0_30, %c0_31] : memref<8x128xf32, #tpu.memory_space<vmem>>, vector<1x128xf32>
    %65 = vector.broadcast %64 : vector<1x128xf32> to vector<176x128xf32>
    %66 = arith.addf %63, %65 : vector<176x128xf32>
    %cst_32 = arith.constant 0.000000e+00 : f32
    %67 = vector.broadcast %cst_32 : f32 to vector<176x128xf32>
    %68 = arith.maximumf %66, %67 : vector<176x128xf32>
    %69 = arith.mulf %68, %32 : vector<176x128xf32>
    %c16_33 = arith.constant 16 : index
    %c0_34 = arith.constant 0 : index
    %70 = vector.load %arg8[%c16_33, %c0_34] : memref<208x128xf32, #tpu.memory_space<vmem>>, vector<176x128xf32>
    tpu.vector_store %arg8[%c16_33, %c0_34], %69 {strides = array<i32>} : memref<208x128xf32, #tpu.memory_space<vmem>>, vector<176x128xf32>,
    %c6_35 = arith.constant 6 : index
    %c0_36 = arith.constant 0 : index
    %71 = vector.load %arg8[%c6_35, %c0_36] : memref<208x128xf32, #tpu.memory_space<vmem>>, vector<176x128xf32>
    %72 = arith.truncf %71 : vector<176x128xf32> to vector<176x128xbf16>
    %c0_37 = arith.constant 0 : index
    %c0_38 = arith.constant 0 : index
    %73 = vector.load %arg9[%c0_37, %c0_38] : memref<176x1152xbf16, #tpu.memory_space<vmem>>, vector<176x128xbf16>
    tpu.vector_store %arg9[%c0_37, %c0_38], %72 {strides = array<i32>} : memref<176x1152xbf16, #tpu.memory_space<vmem>>, vector<176x128xbf16>,
    %c7_39 = arith.constant 7 : index
    %c0_40 = arith.constant 0 : index
    %74 = vector.load %arg8[%c7_39, %c0_40] : memref<208x128xf32, #tpu.memory_space<vmem>>, vector<176x128xf32>
    %75 = arith.truncf %74 : vector<176x128xf32> to vector<176x128xbf16>
    %c0_41 = arith.constant 0 : index
    %c128_42 = arith.constant 128 : index
    %76 = vector.load %arg9[%c0_41, %c128_42] : memref<176x1152xbf16, #tpu.memory_space<vmem>>, vector<176x128xbf16>
    tpu.vector_store %arg9[%c0_41, %c128_42], %75 {strides = array<i32>} : memref<176x1152xbf16, #tpu.memory_space<vmem>>, vector<176x128xbf16>,
    %c8_43 = arith.constant 8 : index
    %c0_44 = arith.constant 0 : index
    %77 = vector.load %arg8[%c8_43, %c0_44] : memref<208x128xf32, #tpu.memory_space<vmem>>, vector<176x128xf32>
    %78 = arith.truncf %77 : vector<176x128xf32> to vector<176x128xbf16>
    %c0_45 = arith.constant 0 : index
    %c256_46 = arith.constant 256 : index
    %79 = vector.load %arg9[%c0_45, %c256_46] : memref<176x1152xbf16, #tpu.memory_space<vmem>>, vector<176x128xbf16>
    tpu.vector_store %arg9[%c0_45, %c256_46], %78 {strides = array<i32>} : memref<176x1152xbf16, #tpu.memory_space<vmem>>, vector<176x128xbf16>,
    %c15_47 = arith.constant 15 : index
    %c0_48 = arith.constant 0 : index
    %80 = vector.load %arg8[%c15_47, %c0_48] : memref<208x128xf32, #tpu.memory_space<vmem>>, vector<176x128xf32>
    %81 = arith.truncf %80 : vector<176x128xf32> to vector<176x128xbf16>
    %c0_49 = arith.constant 0 : index
    %c384_50 = arith.constant 384 : index
    %82 = vector.load %arg9[%c0_49, %c384_50] : memref<176x1152xbf16, #tpu.memory_space<vmem>>, vector<176x128xbf16>
    tpu.vector_store %arg9[%c0_49, %c384_50], %81 {strides = array<i32>} : memref<176x1152xbf16, #tpu.memory_space<vmem>>, vector<176x128xbf16>,
    %c16_51 = arith.constant 16 : index
    %c0_52 = arith.constant 0 : index
    %83 = vector.load %arg8[%c16_51, %c0_52] : memref<208x128xf32, #tpu.memory_space<vmem>>, vector<176x128xf32>
    %84 = arith.truncf %83 : vector<176x128xf32> to vector<176x128xbf16>
    %c0_53 = arith.constant 0 : index
    %c512_54 = arith.constant 512 : index
    %85 = vector.load %arg9[%c0_53, %c512_54] : memref<176x1152xbf16, #tpu.memory_space<vmem>>, vector<176x128xbf16>
    tpu.vector_store %arg9[%c0_53, %c512_54], %84 {strides = array<i32>} : memref<176x1152xbf16, #tpu.memory_space<vmem>>, vector<176x128xbf16>,
    %c17_55 = arith.constant 17 : index
    %c0_56 = arith.constant 0 : index
    %86 = vector.load %arg8[%c17_55, %c0_56] : memref<208x128xf32, #tpu.memory_space<vmem>>, vector<176x128xf32>
    %87 = arith.truncf %86 : vector<176x128xf32> to vector<176x128xbf16>
    %c0_57 = arith.constant 0 : index
    %c640_58 = arith.constant 640 : index
    %88 = vector.load %arg9[%c0_57, %c640_58] : memref<176x1152xbf16, #tpu.memory_space<vmem>>, vector<176x128xbf16>
    tpu.vector_store %arg9[%c0_57, %c640_58], %87 {strides = array<i32>} : memref<176x1152xbf16, #tpu.memory_space<vmem>>, vector<176x128xbf16>,
    %c24_59 = arith.constant 24 : index
    %c0_60 = arith.constant 0 : index
    %89 = vector.load %arg8[%c24_59, %c0_60] : memref<208x128xf32, #tpu.memory_space<vmem>>, vector<176x128xf32>
    %90 = arith.truncf %89 : vector<176x128xf32> to vector<176x128xbf16>
    %c0_61 = arith.constant 0 : index
    %c768_62 = arith.constant 768 : index
    %91 = vector.load %arg9[%c0_61, %c768_62] : memref<176x1152xbf16, #tpu.memory_space<vmem>>, vector<176x128xbf16>
    tpu.vector_store %arg9[%c0_61, %c768_62], %90 {strides = array<i32>} : memref<176x1152xbf16, #tpu.memory_space<vmem>>, vector<176x128xbf16>,
    %c25_63 = arith.constant 25 : index
    %c0_64 = arith.constant 0 : index
    %92 = vector.load %arg8[%c25_63, %c0_64] : memref<208x128xf32, #tpu.memory_space<vmem>>, vector<176x128xf32>
    %93 = arith.truncf %92 : vector<176x128xf32> to vector<176x128xbf16>
    %c0_65 = arith.constant 0 : index
    %c896_66 = arith.constant 896 : index
    %94 = vector.load %arg9[%c0_65, %c896_66] : memref<176x1152xbf16, #tpu.memory_space<vmem>>, vector<176x128xbf16>
    tpu.vector_store %arg9[%c0_65, %c896_66], %93 {strides = array<i32>} : memref<176x1152xbf16, #tpu.memory_space<vmem>>, vector<176x128xbf16>,
    %c26_67 = arith.constant 26 : index
    %c0_68 = arith.constant 0 : index
    %95 = vector.load %arg8[%c26_67, %c0_68] : memref<208x128xf32, #tpu.memory_space<vmem>>, vector<176x128xf32>
    %96 = arith.truncf %95 : vector<176x128xf32> to vector<176x128xbf16>
    %c0_69 = arith.constant 0 : index
    %c1024_70 = arith.constant 1024 : index
    %97 = vector.load %arg9[%c0_69, %c1024_70] : memref<176x1152xbf16, #tpu.memory_space<vmem>>, vector<176x128xbf16>
    tpu.vector_store %arg9[%c0_69, %c1024_70], %96 {strides = array<i32>} : memref<176x1152xbf16, #tpu.memory_space<vmem>>, vector<176x128xbf16>,
    %c0_71 = arith.constant 0 : index
    %c0_72 = arith.constant 0 : index
    %98 = vector.load %arg9[%c0_71, %c0_72] : memref<176x1152xbf16, #tpu.memory_space<vmem>>, vector<176x1152xbf16>
    %c1152 = arith.constant 1152 : index
    %c0_73 = arith.constant 0 : index
    %99 = vector.load %arg3[%c1152, %c0_73] : memref<2592x128xbf16, #tpu.memory_space<vmem>>, vector<1152x128xbf16>
    %cst_74 = arith.constant dense<0.000000e+00> : vector<176x128xf32>
    %100 = tpu.matmul %98, %99, %cst_74 {dimension_numbers = #tpu.dot_dimension_numbers<[1], [0], [0], [1], [0, 0, 1, 1], [], []>} : vector<176x1152xbf16>, vector<1152x128xbf16>, vector<176x128xf32> -> vector<176x128xf32>
    %c1 = arith.constant 1 : index
    %c0_75 = arith.constant 0 : index
    %101 = vector.load %arg5[%c1, %c0_75] : memref<8x128xf32, #tpu.memory_space<vmem>>, vector<1x128xf32>
    %102 = vector.broadcast %101 : vector<1x128xf32> to vector<176x128xf32>
    %103 = arith.addf %100, %102 : vector<176x128xf32>
    %cst_76 = arith.constant 0.000000e+00 : f32
    %104 = vector.broadcast %cst_76 : f32 to vector<176x128xf32>
    %105 = arith.maximumf %103, %104 : vector<176x128xf32>
    %106 = arith.mulf %105, %32 : vector<176x128xf32>
    %107 = vector.extract_strided_slice %106 {offsets = [0, 0], sizes = [88, 128], strides = [1, 1]} : vector<176x128xf32> to vector<88x128xf32>
    %cst_77 = arith.constant dense<0xFF800000> : vector<128xf32>
    %108 = vector.multi_reduction <maximumf>, %107, %cst_77 [0] : vector<88x128xf32> to vector<128xf32>
    %109 = vector.shape_cast %108 : vector<128xf32> to vector<1x128xf32>
    %110 = vector.extract_strided_slice %106 {offsets = [88, 0], sizes = [88, 128], strides = [1, 1]} : vector<176x128xf32> to vector<88x128xf32>
    %cst_78 = arith.constant dense<0xFF800000> : vector<128xf32>
    %111 = vector.multi_reduction <maximumf>, %110, %cst_78 [0] : vector<88x128xf32> to vector<128xf32>
    %112 = vector.shape_cast %111 : vector<128xf32> to vector<1x128xf32>
    %113 = tpu.concatenate %109, %112 in 0 : vector<1x128xf32>, vector<1x128xf32> -> vector<2x128xf32>
    %cst_79 = arith.constant 0.000000e+00 : f32
    %114 = vector.broadcast %cst_79 : f32 to vector<2x128xf32>
    %115 = arith.maximumf %113, %114 : vector<2x128xf32>
    %c0_80 = arith.constant 0 : index
    %c0_81 = arith.constant 0 : index
    %116 = vector.load %arg10[%c0_80, %c0_81] : memref<2x256xf32, #tpu.memory_space<vmem>>, vector<2x128xf32>
    %c0_82 = arith.constant 0 : index
    %c128_83 = arith.constant 128 : index
    %117 = vector.load %arg10[%c0_82, %c128_83] : memref<2x256xf32, #tpu.memory_space<vmem>>, vector<2x128xf32>
    %118 = tpu.concatenate %115, %116 in 1 : vector<2x128xf32>, vector<2x128xf32> -> vector<2x256xf32>
    %119 = arith.truncf %118 : vector<2x256xf32> to vector<2x256xbf16>
    %c0_84 = arith.constant 0 : index
    %c0_85 = arith.constant 0 : index
    %120 = vector.load %arg4[%c0_84, %c0_85] : memref<256x512xbf16, #tpu.memory_space<vmem>>, vector<256x512xbf16>
    %cst_86 = arith.constant dense<0.000000e+00> : vector<2x512xf32>
    %121 = tpu.matmul %119, %120, %cst_86 {dimension_numbers = #tpu.dot_dimension_numbers<[1], [0], [0], [1], [0, 0, 1, 1], [], []>} : vector<2x256xbf16>, vector<256x512xbf16>, vector<2x512xf32> -> vector<2x512xf32>
    %122 = vector.extract_strided_slice %121 {offsets = [0, 0], sizes = [2, 128], strides = [1, 1]} : vector<2x512xf32> to vector<2x128xf32>
    %c2 = arith.constant 2 : index
    %c0_87 = arith.constant 0 : index
    %123 = vector.load %arg5[%c2, %c0_87] : memref<8x128xf32, #tpu.memory_space<vmem>>, vector<1x128xf32>
    %124 = vector.broadcast %123 : vector<1x128xf32> to vector<2x128xf32>
    %125 = arith.addf %122, %124 : vector<2x128xf32>
    %126 = arith.negf %125 : vector<2x128xf32>
    %127 = math.exp %126 : vector<2x128xf32>
    %cst_88 = arith.constant 1.000000e+00 : f32
    %128 = vector.broadcast %cst_88 : f32 to vector<2x128xf32>
    %129 = arith.addf %128, %127 : vector<2x128xf32>
    %130 = arith.divf %128, %129 : vector<2x128xf32>
    %131 = vector.extract_strided_slice %121 {offsets = [0, 128], sizes = [2, 128], strides = [1, 1]} : vector<2x512xf32> to vector<2x128xf32>
    %c3 = arith.constant 3 : index
    %c0_89 = arith.constant 0 : index
    %132 = vector.load %arg5[%c3, %c0_89] : memref<8x128xf32, #tpu.memory_space<vmem>>, vector<1x128xf32>
    %133 = vector.broadcast %132 : vector<1x128xf32> to vector<2x128xf32>
    %134 = arith.addf %131, %133 : vector<2x128xf32>
    %135 = arith.negf %134 : vector<2x128xf32>
    %136 = math.exp %135 : vector<2x128xf32>
    %cst_90 = arith.constant 1.000000e+00 : f32
    %137 = vector.broadcast %cst_90 : f32 to vector<2x128xf32>
    %138 = arith.addf %137, %136 : vector<2x128xf32>
    %139 = arith.divf %137, %138 : vector<2x128xf32>
    %140 = vector.extract_strided_slice %121 {offsets = [0, 256], sizes = [2, 128], strides = [1, 1]} : vector<2x512xf32> to vector<2x128xf32>
    %c4 = arith.constant 4 : index
    %c0_91 = arith.constant 0 : index
    %141 = vector.load %arg5[%c4, %c0_91] : memref<8x128xf32, #tpu.memory_space<vmem>>, vector<1x128xf32>
    %142 = vector.broadcast %141 : vector<1x128xf32> to vector<2x128xf32>
    %143 = arith.addf %140, %142 : vector<2x128xf32>
    %144 = math.tanh %143 : vector<2x128xf32>
    %145 = vector.extract_strided_slice %121 {offsets = [0, 384], sizes = [2, 128], strides = [1, 1]} : vector<2x512xf32> to vector<2x128xf32>
    %c5 = arith.constant 5 : index
    %c0_92 = arith.constant 0 : index
    %146 = vector.load %arg5[%c5, %c0_92] : memref<8x128xf32, #tpu.memory_space<vmem>>, vector<1x128xf32>
    %147 = vector.broadcast %146 : vector<1x128xf32> to vector<2x128xf32>
    %148 = arith.addf %145, %147 : vector<2x128xf32>
    %149 = arith.negf %148 : vector<2x128xf32>
    %150 = math.exp %149 : vector<2x128xf32>
    %cst_93 = arith.constant 1.000000e+00 : f32
    %151 = vector.broadcast %cst_93 : f32 to vector<2x128xf32>
    %152 = arith.addf %151, %150 : vector<2x128xf32>
    %153 = arith.divf %151, %152 : vector<2x128xf32>
    %154 = arith.mulf %139, %117 : vector<2x128xf32>
    %155 = arith.mulf %130, %144 : vector<2x128xf32>
    %156 = arith.addf %154, %155 : vector<2x128xf32>
    %157 = math.tanh %156 : vector<2x128xf32>
    %158 = arith.mulf %153, %157 : vector<2x128xf32>
    %159 = tpu.concatenate %158, %156 in 1 : vector<2x128xf32>, vector<2x128xf32> -> vector<2x256xf32>
    %c0_94 = arith.constant 0 : index
    %c0_95 = arith.constant 0 : index
    %160 = vector.load %arg10[%c0_94, %c0_95] : memref<2x256xf32, #tpu.memory_space<vmem>>, vector<2x256xf32>
    tpu.vector_store %arg10[%c0_94, %c0_95], %159 {strides = array<i32>} : memref<2x256xf32, #tpu.memory_space<vmem>>, vector<2x256xf32>,
    %c0_96 = arith.constant 0 : index
    %c0_97 = arith.constant 0 : index
    %c0_98 = arith.constant 0 : index
    %161 = vector.load %arg7[%c0_96, %c0_97, %c0_98] : memref<1x2x256xf32, #tpu.memory_space<vmem>>, vector<1x2x256xf32>
    %162 = vector.shape_cast %161 : vector<1x2x256xf32> to vector<2x256xf32>
    %163 = vector.shape_cast %159 : vector<2x256xf32> to vector<1x2x256xf32>
    tpu.vector_store %arg7[%c0_96, %c0_97, %c0_98], %163 {strides = array<i32>} : memref<1x2x256xf32, #tpu.memory_space<vmem>>, vector<1x2x256xf32>,
    %164 = arith.truncf %158 : vector<2x128xf32> to vector<2x128xbf16>
    %c2304 = arith.constant 2304 : index
    %c0_99 = arith.constant 0 : index
    %165 = vector.load %arg3[%c2304, %c0_99] : memref<2592x128xbf16, #tpu.memory_space<vmem>>, vector<128x128xbf16>
    %cst_100 = arith.constant dense<0.000000e+00> : vector<2x128xf32>
    %166 = tpu.matmul %164, %165, %cst_100 {dimension_numbers = #tpu.dot_dimension_numbers<[1], [0], [0], [1], [0, 0, 1, 1], [], []>} : vector<2x128xbf16>, vector<128x128xbf16>, vector<2x128xf32> -> vector<2x128xf32>
    %c6_101 = arith.constant 6 : index
    %c0_102 = arith.constant 0 : index
    %167 = vector.load %arg5[%c6_101, %c0_102] : memref<8x128xf32, #tpu.memory_space<vmem>>, vector<1x128xf32>
    %168 = vector.broadcast %167 : vector<1x128xf32> to vector<2x128xf32>
    %169 = arith.addf %166, %168 : vector<2x128xf32>
    %170 = math.tanh %169 : vector<2x128xf32>
    %171 = arith.truncf %170 : vector<2x128xf32> to vector<2x128xbf16>
    %c2432 = arith.constant 2432 : index
    %c0_103 = arith.constant 0 : index
    %172 = vector.load %arg3[%c2432, %c0_103] : memref<2592x128xbf16, #tpu.memory_space<vmem>>, vector<128x128xbf16>
    %cst_104 = arith.constant dense<0.000000e+00> : vector<2x128xf32>
    %173 = tpu.matmul %171, %172, %cst_104 {dimension_numbers = #tpu.dot_dimension_numbers<[1], [0], [0], [1], [0, 0, 1, 1], [], []>} : vector<2x128xbf16>, vector<128x128xbf16>, vector<2x128xf32> -> vector<2x128xf32>
    %c7_105 = arith.constant 7 : index
    %c0_106 = arith.constant 0 : index
    %174 = vector.load %arg5[%c7_105, %c0_106] : memref<8x128xf32, #tpu.memory_space<vmem>>, vector<1x128xf32>
    %175 = vector.broadcast %174 : vector<1x128xf32> to vector<2x128xf32>
    %176 = arith.addf %173, %175 : vector<2x128xf32>
    %177 = tpu.iota {dimensions = array<i32: 1>} : vector<2x128xi32>
    %c7_i32 = arith.constant 7 : i32
    %178 = vector.broadcast %c7_i32 : i32 to vector<2x128xi32>
    %179 = arith.cmpi slt, %177, %178 : vector<2x128xi32>
    %cst_107 = arith.constant -1.000000e+30 : f32
    %180 = vector.broadcast %cst_107 : f32 to vector<2x128xf32>
    %181 = arith.select %179, %176, %180 : vector<2x128xi1>, vector<2x128xf32>
    %cst_108 = arith.constant dense<0xFF800000> : vector<2xf32>
    %182 = vector.multi_reduction <maximumf>, %181, %cst_108 [1] : vector<2x128xf32> to vector<2xf32>
    %183 = vector.shape_cast %182 : vector<2xf32> to vector<2x1xf32>
    %184 = vector.broadcast %183 : vector<2x1xf32> to vector<2x128xf32>
    %185 = arith.subf %176, %184 : vector<2x128xf32>
    %186 = math.exp %185 : vector<2x128xf32>
    %cst_109 = arith.constant 0.000000e+00 : f32
    %187 = vector.broadcast %cst_109 : f32 to vector<2x128xf32>
    %188 = arith.select %179, %186, %187 : vector<2x128xi1>, vector<2x128xf32>
    %cst_110 = arith.constant dense<0.000000e+00> : vector<2xf32>
    %189 = vector.multi_reduction <add>, %188, %cst_110 [1] : vector<2x128xf32> to vector<2xf32>
    %190 = vector.shape_cast %189 : vector<2xf32> to vector<2x1xf32>
    %191 = math.log %190 : vector<2x1xf32>
    %192 = arith.addf %191, %183 : vector<2x1xf32>
    %193 = vector.broadcast %192 : vector<2x1xf32> to vector<2x128xf32>
    %194 = arith.subf %176, %193 : vector<2x128xf32>
    %195 = arith.select %179, %194, %176 : vector<2x128xi1>, vector<2x128xf32>
    %c0_111 = arith.constant 0 : index
    %c0_112 = arith.constant 0 : index
    %c0_113 = arith.constant 0 : index
    %196 = vector.load %arg6[%c0_111, %c0_112, %c0_113] : memref<1x2x128xf32, #tpu.memory_space<vmem>>, vector<1x2x128xf32>
    %197 = vector.shape_cast %196 : vector<1x2x128xf32> to vector<2x128xf32>
    %198 = vector.shape_cast %195 : vector<2x128xf32> to vector<1x2x128xf32>
    tpu.vector_store %arg6[%c0_111, %c0_112, %c0_113], %198 {strides = array<i32>} : memref<1x2x128xf32, #tpu.memory_space<vmem>>, vector<1x2x128xf32>,
    return
  }
  func.func @transform_0(%arg0: i32) -> (i32, i32, i32) {
    %c0_i32 = arith.constant 0 : i32
    %c0_i32_0 = arith.constant 0 : i32
    %c0_i32_1 = arith.constant 0 : i32
    return %arg0, %c0_i32, %c0_i32_0 : i32, i32, i32
  }
  func.func @transform_1(%arg0: i32) -> (i32, i32) {
    %c0_i32 = arith.constant 0 : i32
    %c0_i32_0 = arith.constant 0 : i32
    %c0_i32_1 = arith.constant 0 : i32
    return %c0_i32, %c0_i32_0 : i32, i32
  }
  func.func @transform_2(%arg0: i32) -> (i32, i32) {
    %c0_i32 = arith.constant 0 : i32
    %c0_i32_0 = arith.constant 0 : i32
    %c0_i32_1 = arith.constant 0 : i32
    return %c0_i32, %c0_i32_0 : i32, i32
  }
  func.func @transform_3(%arg0: i32) -> (i32, i32) {
    %c0_i32 = arith.constant 0 : i32
    %c0_i32_0 = arith.constant 0 : i32
    %c0_i32_1 = arith.constant 0 : i32
    return %c0_i32, %c0_i32_0 : i32, i32
  }
  func.func @transform_4(%arg0: i32) -> (i32, i32) {
    %c0_i32 = arith.constant 0 : i32
    %c0_i32_0 = arith.constant 0 : i32
    %c0_i32_1 = arith.constant 0 : i32
    return %c0_i32, %c0_i32_0 : i32, i32
  }
  func.func @transform_5(%arg0: i32) -> (i32, i32, i32) {
    %c0_i32 = arith.constant 0 : i32
    %c0_i32_0 = arith.constant 0 : i32
    %c0_i32_1 = arith.constant 0 : i32
    return %arg0, %c0_i32, %c0_i32_0 : i32, i32, i32
  }
  func.func @transform_6(%arg0: i32) -> (i32, i32, i32) {
    %c0_i32 = arith.constant 0 : i32
    %c0_i32_0 = arith.constant 0 : i32
    %c0_i32_1 = arith.constant 0 : i32
    return %arg0, %c0_i32, %c0_i32_0 : i32, i32, i32
  }
}

</mosaic_0001>

<bundles_post_ra>
// kernel: trajectory_lstm_forward.1
= control target key start
LH: loop header
LB: loop body
LE: loop exit
PB: predicated region body
PF: predicated region fallthrough
CT: control target
= control target key end

     0   :  { %s7156_s21 = smov 0   ;;  %s9062_s0 = inlined_call_operand.vmem [shape: s32[8,176,3], index: 0, kind: input, shape index: {}]   ;;  %s9063_s1 = inlined_call_operand.vmem [shape: f32[2,256], index: 1, kind: input, shape index: {}]   ;;  %s9064_s2 = inlined_call_operand.vmem [shape: bf16[2592,128], index: 2, kind: input, shape index: {}]   ;;  %s9065_s3 = inlined_call_operand.vmem [shape: bf16[256,512], index: 3, kind: input, shape index: {}]   ;;  %s9066_s4 = inlined_call_operand.vmem [shape: f32[8,128], index: 4, kind: input, shape index: {}]   ;;  %s9067_s5 = inlined_call_operand.vmem [shape: f32[8,2,128], index: 5, kind: output, shape index: {0}]   ;;  %s9068_s6 = inlined_call_operand.vmem [shape: f32[8,2,256], index: 6, kind: output, shape index: {1}]  }
   0x1 LB: > { %s5460_s22 = sadd.s32 4294967295, %s7113_s21   ;;  %p5464_p0 = scmp.ge.s32.totalorder %s7113_s21, 1  ;;  %s7113_s21 = sphi %s7156_s21, %s17_s21  }
   0x2   : > { %p215_p1 = scmp.lt.s32.totalorder %s7113_s21, 9 }
   0x4   : > { %p216_p2 = pnand %p5464_p0, %p215_p1 }
   0x5   : > { %p249_p3 = scmp.lt.s32.totalorder (!%p216_p2), %s5460_s22, 7  ;;  %p5469_p4 = scmp.ne.s32.totalorder (!%p216_p2), %s5460_s22, 0 }
   0x6   : > { %219 = sbr.rel (%p216_p2) target bundleno = 2434 (0x982), region = 40 }
   0xd   : > { %s250_s23 = scalar_select %p249_p3, %s5460_s22, 7 }
   0xe   : > { %267 = sbr.rel (%p5469_p4) target bundleno = 29 (0x1d), region = 44  ;;  %v294_v0 = vld [vmem:[%s9063_s1] sm:$0xf] (!%p5469_p4)  ;;  %v7115_v1 = vmov (!%p5469_p4), 0.0  }
   0xf   : > { %s6700_s24 = smul.u32 176, %s250_s23  ;;  %s5466_s25 = sshll.u32 %s250_s23, 1  ;;  %268 = vst [vmem:[#allocation2] sm:$0xff] (!%p5469_p4), %v7115_v1  ;;  %269 = vst [vmem:[#allocation2 + $0x8] sm:$0xff] (!%p5469_p4), %v7115_v1 }
  0x10   : > { %s7167_s28 = scalar_lea.vmem %s9067_s5, %s5466_s25  ;;  %s5766_s29 = sshll.u32 %s250_s23, 2  ;;  %270 = vst [vmem:[#allocation2 + $0x10] sm:$0xff] (!%p5469_p4), %v7115_v1  ;;  %271 = vst [vmem:[#allocation2 + $0x18] sm:$0xff] (!%p5469_p4), %v7115_v1 }
  0x11   : > { %s7172_s8 = scalar_lea.vmem %s9062_s0, %s6700_s24  ;;  %s7177_s11 = scalar_lea.vmem %s9068_s6, %s5766_s29  ;;  %272 = vst [vmem:[#allocation2 + $0x20] sm:$0xff] (!%p5469_p4), %v7115_v1  ;;  %273 = vst [vmem:[#allocation2 + $0x28] sm:$0xff] (!%p5469_p4), %v7115_v1 }
  0x12   : > { %274 = vst [vmem:[#allocation2 + $0x30] sm:$0xff] (!%p5469_p4), %v7115_v1  ;;  %275 = vst [vmem:[#allocation2 + $0x38] sm:$0xff] (!%p5469_p4), %v7115_v1 }
  0x13   : > { %276 = vst [vmem:[#allocation2 + $0x40] sm:$0xff] (!%p5469_p4), %v7115_v1  ;;  %277 = vst [vmem:[#allocation2 + $0x48] sm:$0xff] (!%p5469_p4), %v7115_v1 }
  0x14   : > { %278 = vst [vmem:[#allocation2 + $0x50] sm:$0xff] (!%p5469_p4), %v7115_v1  ;;  %279 = vst [vmem:[#allocation2 + $0x58] sm:$0xff] (!%p5469_p4), %v7115_v1 }
  0x15   : > { %280 = vst [vmem:[#allocation2 + $0x60] sm:$0xff] %v7115_v1  ;;  %281 = vst [vmem:[#allocation2 + $0x68] sm:$0xff] %v7115_v1 }
  0x16   : > { %282 = vst [vmem:[#allocation2 + $0x70] sm:$0xff] %v7115_v1  ;;  %283 = vst [vmem:[#allocation2 + $0x78] sm:$0xff] %v7115_v1 }
  0x17   : > { %284 = vst [vmem:[#allocation2 + $0x80] sm:$0xff] %v7115_v1  ;;  %285 = vst [vmem:[#allocation2 + $0x88] sm:$0xff] %v7115_v1 }
  0x18   : > { %286 = vst [vmem:[#allocation2 + $0x90] sm:$0xff] %v7115_v1  ;;  %287 = vst [vmem:[#allocation2 + $0x98] sm:$0xff] %v7115_v1 }
  0x19   : > { %288 = vst [vmem:[#allocation2 + $0xa0] sm:$0xff] %v7115_v1  ;;  %289 = vst [vmem:[#allocation2 + $0xa8] sm:$0xff] %v7115_v1 }
  0x1a   : > { %290 = vst [vmem:[#allocation2 + $0xb0] sm:$0xff] %v7115_v1  ;;  %291 = vst [vmem:[#allocation2 + $0xb8] sm:$0xff] %v7115_v1 }
  0x1b   : > { %292 = vst [vmem:[#allocation2 + $0xc0] sm:$0xff] %v7115_v1  ;;  %293 = vst [vmem:[#allocation2 + $0xc8] sm:$0xff] %v7115_v1 }
  0x1c   : > { %295 = vst [vmem:[#allocation4] sm:$0xf] %v294_v0 }
  0x1d PF: > { %v296_v2 = vld [vmem:[%s7172_s8] sm:$0xff]  ;;  %v297_v3 = vld [vmem:[%s7172_s8 + $0x8] sm:$0xff]  ;;  %v7116_v4 = vmov 0   ;;  %v7117_v5 = vmov 1   ;;  %v299_v8 = vld [vmem:[%s7172_s8 + $0x18] sm:$0xff]  ;;  %v7118_v17 = vmov 2   ;;  %v318_v0 = vlaneseq }
  0x1e   : > { %6715 = vset.pattern.permute.xlu0 %v7116_v4  ;;  %6716 = vset.pattern.permute.xlu1 %v7117_v5  ;;  %v408_v6 = vadd.s32 9, %v296_v2  ;;  %v409_v7 = vadd.s32 9, %v297_v3  ;;  %v541_v9 = vadd.s32 18, %v297_v3  ;;  %v298_v10 = vld [vmem:[%s7172_s8 + $0x10] sm:$0xff]  ;;  %v540_v11 = vadd.s32 18, %v296_v2  ;;  %v301_v15 = vld [vmem:[%s7172_s8 + $0x28] sm:$0xff] }
  0x1f   : > { %321 = vperm.xlu0 %6715, %v296_v2   ;;  %v410_v12 = vadd.s32 9, %v298_v10  ;;  %v542_v13 = vadd.s32 18, %v298_v10  ;;  %v411_v14 = vadd.s32 9, %v299_v8  ;;  %v543_v16 = vadd.s32 18, %v299_v8  ;;  %v300_v19 = vld [vmem:[%s7172_s8 + $0x20] sm:$0xff]  ;;  %v6806_v23 = vld [vmem:[%s9064_s2 + $0x508] sm:$0xff]  }
  0x20   : > { %431 = vperm.xlu1 %6716, %v408_v6   ;;  %v7119_v18 = vmov 0.0   ;;  %v412_v20 = vadd.s32 9, %v300_v19  ;;  %v6805_v21 = vld [vmem:[%s9064_s2 + $0x500] sm:$0xff]   ;;  %v544_v22 = vadd.s32 18, %v300_v19  ;;  %v302_v24 = vld [vmem:[%s7172_s8 + $0x30] sm:$0xff]  ;;  %v413_v25 = vadd.s32 9, %v301_v15 }
  0x21   : > { %6492 = vmatprep.subr.bf16.mxu0 %v7119_v18  ;;  %v7204_v26 = vld [vmem:[%s7172_s8 + $0x40] sm:$0xff]  ;;  %v545_v27 = vadd.s32 18, %v301_v15  ;;  %vm7120_vm0 = vmmov 0   ;;  %v7209_v28 = vld [vmem:[%s7172_s8 + $0x50] sm:$0xff]  ;;  %v546_v29 = vadd.s32 18, %v302_v24  ;;  %v414_v32 = vadd.s32 9, %v302_v24 }
  0x22   : > { %6493 = vmatpush3.bf16.msra.mxu0 %v6805_v21  ;;  %6496 = vmatprep.mubr.msk.bf16.mxu0 %vm7120_vm0, %v7119_v18  ;;  %v548_v30 = vadd.s32 18, %v7204_v26  ;;  %v550_v31 = vadd.s32 18, %v7209_v28  ;;  %v303_v33 = vld [vmem:[%s7172_s8 + $0x38] sm:$0xff]  ;;  %v305_v36 = vld [vmem:[%s7172_s8 + $0x48] sm:$0xff]  ;;  %v416_v37 = vadd.s32 9, %v7204_v26  ;;  %v418_v41 = vadd.s32 9, %v7209_v28 }
  0x23   : > { %324 = vperm.xlu0 %6715, %v297_v3   ;;  %6494 = vmatprep.subr.bf16.mxu0 %v7119_v18  ;;  %v415_v34 = vadd.s32 9, %v303_v33  ;;  %v547_v35 = vadd.s32 18, %v303_v33  ;;  %v417_v38 = vadd.s32 9, %v305_v36  ;;  %v549_v39 = vadd.s32 18, %v305_v36  ;;  %v307_v40 = vld [vmem:[%s7172_s8 + $0x58] sm:$0xff]  ;;  %v309_v42 = vld [vmem:[%s7172_s8 + $0x68] sm:$0xff] }
  0x24   : > { %434 = vperm.xlu1 %6716, %v409_v7   ;;  %v419_v43 = vadd.s32 9, %v307_v40  ;;  %v7226_v44 = vld [vmem:[%s7172_s8 + $0x78] sm:$0xff]  ;;  %v308_v45 = vld [vmem:[%s7172_s8 + $0x60] sm:$0xff]  ;;  %v551_v46 = vadd.s32 18, %v307_v40  ;;  %v7231_v47 = vld [vmem:[%s7172_s8 + $0x88] sm:$0xff]  ;;  %v421_v60 = vadd.s32 9, %v309_v42 }
  0x25   : > { %v552_v48 = vadd.s32 18, %v308_v45  ;;  %v310_v49 = vld [vmem:[%s7172_s8 + $0x70] sm:$0xff]  ;;  %v7236_v50 = vld [vmem:[%s7172_s8 + $0x80] sm:$0xff]  ;;  %v7254_v57 = vld [vmem:[%s7172_s8 + $0x98] sm:$0xff]  ;;  %v420_v59 = vadd.s32 9, %v308_v45  ;;  %v553_v61 = vadd.s32 18, %v309_v42 }
  0x26   : > { %6495 = vmatpush3.bf16.msra.mxu0 %v6806_v23  ;;  %v7239_v51 = vld [vmem:[%s7172_s8 + $0x90] sm:$0xff]  ;;  %v554_v52 = vadd.s32 18, %v310_v49  ;;  %v556_v53 = vadd.s32 18, %v7236_v50  ;;  %v7247_v55 = vld [vmem:[%s7172_s8 + $0xa0] sm:$0xff]  ;;  %v7258_v58 = vld [vmem:[%s7172_s8 + $0xa8] sm:$0xff]  ;;  %v422_v1 = vadd.s32 9, %v310_v49 }
  0x27   : > { %330 = vperm.xlu0 %6715, %v299_v8   ;;  %v558_v54 = vadd.s32 18, %v7239_v51  ;;  %v560_v56 = vadd.s32 18, %v7247_v55  ;;  %v7274_v6 = vand.u32 127, %v318_v0  ;;  %v423_v7 = vadd.s32 9, %v7226_v44  ;;  %v6817_v0 = vld [vmem:[%s9064_s2 + $0xd0] sm:$0xff]  }
  0x28   : > { %6717 = vset.pattern.permute.xlu1 %v7118_v17  ;;  %vm743_vm11 = vcmask 261120   ;;  %v425_v23 = vadd.s32 9, %v7231_v47 }
  0x29   : > { %566 = vperm.xlu1 %6717, %v541_v9  }
  0x2b   : > { %336 = vperm.xlu0 %6715, %v301_v15  }
  0x2d   : > { %6718 = vset.pattern.permute.xlu1 %v7116_v4 }
  0x2e   : > { %327 = vperm.xlu1 %6718, %v298_v10  }
  0x2f   : > { %6722 = vset.pattern.permute.xlu0 %v7118_v17 }
  0x30   : > { %563 = vperm.xlu0 %6722, %v540_v11   ;;  %v555_v11 = vadd.s32 18, %v7226_v44 }
  0x32   : > { %6719 = vset.pattern.permute.xlu1 %v7117_v5 }
  0x33   : > { %437 = vperm.xlu1 %6719, %v410_v12  }
  0x34   : > { %569 = vperm.xlu0 %6722, %v542_v13  }
  0x37   : > { %440 = vperm.xlu1 %6719, %v411_v14  }
  0x38   : > { %575 = vperm.xlu0 %6722, %v544_v22  }
  0x3b   : > { %6720 = vset.pattern.permute.xlu1 %v7118_v17 }
  0x3c   : > { %572 = vperm.xlu1 %6720, %v543_v16   ;;  %581 = vperm.xlu0 %6722, %v546_v29  }
  0x40   : > { %6721 = vset.pattern.permute.xlu1 %v7116_v4  ;;  %587 = vperm.xlu0 %6722, %v548_v30  }
  0x41   : > { %333 = vperm.xlu1 %6721, %v300_v19  }
  0x44   : > { %593 = vperm.xlu0 %6722, %v550_v31  }
  0x45   : > { %6723 = vset.pattern.permute.xlu1 %v7117_v5 }
  0x46   : > { %443 = vperm.xlu1 %6723, %v412_v20   ;;  %v424_v20 = vadd.s32 9, %v7236_v50 }
  0x48   : > { %6733 = vset.pattern.permute.xlu0 %v7116_v4 }
  0x49   : > { %342 = vperm.xlu0 %6733, %v303_v33  }
  0x4a   : > { %446 = vperm.xlu1 %6723, %v413_v25   ;;  %v557_v25 = vadd.s32 18, %v7231_v47 }
  0x4d   : > { %348 = vperm.xlu0 %6733, %v305_v36  }
  0x4e   : > { %6724 = vset.pattern.permute.xlu1 %v7118_v17 }
  0x4f   : > { %578 = vperm.xlu1 %6724, %v545_v27  }
  0x51   : > { %354 = vperm.xlu0 %6733, %v307_v40  }
  0x53   : > { %6725 = vset.pattern.permute.xlu1 %v7116_v4 }
  0x54   : > { %339 = vperm.xlu1 %6725, %v302_v24  }
  0x55   : > { %360 = vperm.xlu0 %6733, %v309_v42  }
  0x58   : > { %6726 = vset.pattern.permute.xlu1 %v7117_v5 }
  0x59   : > { %449 = vperm.xlu1 %6726, %v414_v32   ;;  %366 = vperm.xlu0 %6733, %v7226_v44   ;;  %v426_v32 = vadd.s32 9, %v7239_v51 }
  0x5d   : > { %452 = vperm.xlu1 %6726, %v415_v34   ;;  %372 = vperm.xlu0 %6733, %v7231_v47  }
  0x61   : > { %6727 = vset.pattern.permute.xlu1 %v7118_v17  ;;  %6742 = vset.pattern.permute.xlu0 %v7118_v17 }
  0x62   : > { %584 = vperm.xlu1 %6727, %v547_v35   ;;  %599 = vperm.xlu0 %6742, %v552_v48   ;;  %v427_v35 = vadd.s32 9, %v7254_v57  ;;  %v429_v48 = vadd.s32 9, %v7258_v58 }
  0x66   : > { %6728 = vset.pattern.permute.xlu1 %v7116_v4  ;;  %605 = vperm.xlu0 %6742, %v554_v52  }
  0x67   : > { %345 = vperm.xlu1 %6728, %v7204_v26  }
  0x6a   : > { %611 = vperm.xlu0 %6742, %v556_v53  }
  0x6b   : > { %6729 = vset.pattern.permute.xlu1 %v7117_v5 }
  0x6c   : > { %455 = vperm.xlu1 %6729, %v416_v37  }
  0x6e   : > { %617 = vperm.xlu0 %6742, %v558_v54  }
  0x70   : > { %458 = vperm.xlu1 %6729, %v417_v38   ;;  %v559_v38 = vadd.s32 18, %v7254_v57 }
  0x72   : > { %6747 = vset.pattern.permute.xlu0 %v7116_v4 }
  0x73   : > { %378 = vperm.xlu0 %6747, %v7254_v57   ;;  %v6810_v57 = vld [vmem:[%s9064_s2 + $0x80] sm:$0xff]  }
  0x74   : > { %6730 = vset.pattern.permute.xlu1 %v7118_v17 }
  0x75   : > { %590 = vperm.xlu1 %6730, %v549_v39  }
  0x77   : > { %384 = vperm.xlu0 %6747, %v7258_v58  }
  0x79   : > { %6731 = vset.pattern.permute.xlu1 %v7116_v4 }
  0x7a   : > { %351 = vperm.xlu1 %6731, %v7209_v28  }
  0x7b   : > { %6751 = vset.pattern.permute.xlu0 %v7118_v17 }
  0x7c   : > { %623 = vperm.xlu0 %6751, %v560_v56   ;;  %v6808_v56 = vld [vmem:[%s9064_s2] sm:$0xff]  }
  0x7e   : > { %6732 = vset.pattern.permute.xlu1 %v7117_v5 }
  0x7f   : > { %461 = vperm.xlu1 %6732, %v418_v41  }
  0x80   : > { %6754 = vset.pattern.permute.xlu0 %v7116_v4 }
  0x83   : > { %464 = vperm.xlu1 %6732, %v419_v43  }
  0x87   : > { %6734 = vset.pattern.permute.xlu1 %v7118_v17 }
  0x88   : > { %596 = vperm.xlu1 %6734, %v551_v46  }
  0x8c   : > { %6735 = vset.pattern.permute.xlu1 %v7116_v4 }
  0x8d   : > { %357 = vperm.xlu1 %6735, %v308_v45   ;;  %v428_v45 = vadd.s32 9, %v7247_v55 }
  0x91   : > { %6736 = vset.pattern.permute.xlu1 %v7117_v5 }
  0x92   : > { %467 = vperm.xlu1 %6736, %v420_v59  }
  0x96   : > { %470 = vperm.xlu1 %6736, %v421_v60  }
  0x9a   : > { %6737 = vset.pattern.permute.xlu1 %v7118_v17 }
  0x9b   : > { %602 = vperm.xlu1 %6737, %v553_v61   ;;  %v6812_v61 = vld [vmem:[%s9064_s2 + $0x8] sm:$0xff]  }
  0x9e   : > { %v322_v62 = vpop.permute.xlu0 %321 }
  0x9f   : > { %6738 = vset.pattern.permute.xlu1 %v7116_v4  ;;  %v432_v63 = vpop.permute.xlu1 %431  ;;  %vm386_vm4 = vcmp.eq.s32.totalorder %v7274_v6, %v322_v62  ;;  %v6814_v62 = vld [vmem:[%s9064_s2 + $0x88] sm:$0xff]  }
  0xa0   : > { %363 = vperm.xlu1 %6738, %v310_v49   ;;  %vm496_vm5 = vcmp.eq.s32.totalorder %v7274_v6, %v432_v63  ;;  %v6815_v63 = vld [vmem:[%s9064_s2 + $0x50] sm:$0xff]  }
  0xa1   : > { %vm518_vm8 = vmor %vm386_vm4, %vm496_vm5 }
  0xa2   : > { %v325_v2 = vpop.permute.xlu0 %324 }
  0xa3   : > { %v435_v3 = vpop.permute.xlu1 %434  ;;  %vm387_vm1 = vcmp.eq.s32.totalorder %v7274_v6, %v325_v2  ;;  %v6818_v2 = vld [vmem:[%s9064_s2 + $0x90] sm:$0xff]  }
  0xa4   : > { %6739 = vset.pattern.permute.xlu1 %v7117_v5  ;;  %vm497_vm2 = vcmp.eq.s32.totalorder %v7274_v6, %v435_v3 }
  0xa5   : > { %473 = vperm.xlu1 %6739, %v422_v1   ;;  %vm519_vm6 = vmor %vm387_vm1, %vm497_vm2  ;;  %v6816_v1 = vld [vmem:[%s9064_s2 + $0x10] sm:$0xff]  }
  0xa6   : > { %v331_v8 = vpop.permute.xlu0 %330 }
  0xa7   : > { %vm389_vm1 = vcmp.eq.s32.totalorder %v7274_v6, %v331_v8  ;;  %v6821_v8 = vld [vmem:[%s9064_s2 + $0xd8] sm:$0xff]  }
  0xa8   : > { %v567_v9 = vpop.permute.xlu1 %566 }
  0xa9   : > { %476 = vperm.xlu1 %6739, %v423_v7   ;;  %vm629_vm3 = vcmp.eq.s32.totalorder %v7274_v6, %v567_v9  ;;  %v6819_v7 = vld [vmem:[%s9064_s2 + $0x58] sm:$0xff]  }
  0xaa   : > { %v7277_v10 = vpop.permute.xlu0 %336  ;;  %vm651_vm7 = vmor %vm519_vm6, %vm629_vm3 }
  0xab   : > { %v5471_v14 = vsel %vm651_vm7, 1.0, %v7119_v18 }
  0xad   : > { %6740 = vset.pattern.permute.xlu1 %v7118_v17  ;;  %v328_v12 = vpop.permute.xlu1 %327 }
  0xae   : > { %608 = vperm.xlu1 %6740, %v555_v11   ;;  %vm388_vm13 = vcmp.eq.s32.totalorder %v7274_v6, %v328_v12  ;;  %v6820_v11 = vld [vmem:[%s9064_s2 + $0x18] sm:$0xff]  }
  0xaf   : > { %v564_v13 = vpop.permute.xlu0 %563 }
  0xb0   : > { %vm628_vm9 = vcmp.eq.s32.totalorder %v7274_v6, %v564_v13  ;;  %v6822_v13 = vld [vmem:[%s9064_s2 + $0x98] sm:$0xff]  }
  0xb1   : > { %vm650_vm10 = vmor %vm518_vm8, %vm628_vm9 }
  0xb2   : > { %v5470_v15 = vsel %vm650_vm10, 1.0, %v7119_v18  ;;  %6741 = vset.pattern.permute.xlu1 %v7116_v4  ;;  %v438_v16 = vpop.permute.xlu1 %437 }
  0xb3   : > { %v716_v19 = vpack.c.bf16 %v5471_v14, %v5470_v15  ;;  %369 = vperm.xlu1 %6741, %v7236_v50   ;;  %vm498_vm12 = vcmp.eq.s32.totalorder %v7274_v6, %v438_v16  ;;  %v570_v21 = vpop.permute.xlu0 %569  ;;  %v561_v50 = vadd.s32 18, %v7258_v58  ;;  %v6813_v58 = vld [vmem:[%s9064_s2 + $0xc8] sm:$0xff]   ;;  %v6823_v14 = vld [vmem:[%s9064_s2 + $0x60] sm:$0xff]  }
  0xb4   : > { %vm520_vm14 = vmor %vm388_vm13, %vm498_vm12  ;;  %vm630_vm15 = vcmp.eq.s32.totalorder %v7274_v6, %v570_v21  ;;  %vm391_vm12 = vcmp.eq.s32.totalorder %v7274_v6, %v7277_v10  ;;  %v6825_v16 = vld [vmem:[%s9064_s2 + $0xe0] sm:$0xff]  }
  0xb5   : > { %6497 = vmatmul.mubr.msk.bf16.vlgmr.msra.gmra.mrb[0].mxu0 %vm743_vm11, %v716_v19  ;;  %vm652_vm3 = vmor %vm520_vm14, %vm630_vm15  ;;  %v6824_v19 = vld [vmem:[%s9064_s2 + $0x20] sm:$0xff]  }
  0xb6   : > { %v441_v22 = vpop.permute.xlu1 %440  ;;  %6500 = vmatprep.mubr.msk.bf16.mxu0 %vm7120_vm0, %v7119_v18  ;;  %v5472_v26 = vsel %vm652_vm3, 1.0, %v7119_v18  ;;  %v6826_v21 = vld [vmem:[%s9064_s2 + $0xa0] sm:$0xff]  }
  0xb7   : > { %6743 = vset.pattern.permute.xlu1 %v7117_v5  ;;  %vm499_vm2 = vcmp.eq.s32.totalorder %v7274_v6, %v441_v22  ;;  %v576_v31 = vpop.permute.xlu0 %575 }
  0xb8   : > { %479 = vperm.xlu1 %6743, %v424_v20   ;;  %vm521_vm4 = vmor %vm389_vm1, %vm499_vm2  ;;  %vm632_vm10 = vcmp.eq.s32.totalorder %v7274_v6, %v576_v31 }
  0xbb   : > { %v573_v24 = vpop.permute.xlu1 %572  ;;  %v582_v34 = vpop.permute.xlu0 %581 }
  0xbc   : > { %vm631_vm5 = vcmp.eq.s32.totalorder %v7274_v6, %v573_v24  ;;  %482 = vperm.xlu1 %6743, %v425_v23  }
  0xbd   : > { %vm653_vm6 = vmor %vm521_vm4, %vm631_vm5  ;;  %vm634_vm5 = vcmp.eq.s32.totalorder %v7274_v6, %v582_v34 }
  0xbe   : > { %v5473_v27 = vsel %vm653_vm6, 1.0, %v7119_v18 }
  0xbf   : > { %v717_v28 = vpack.c.bf16 %v5473_v27, %v5472_v26  ;;  %v7322_v37 = vpop.permute.xlu0 %587  ;;  %v6828_v27 = vld [vmem:[%s9064_s2 + $0x28] sm:$0xff]  }
  0xc0   : > { %6744 = vset.pattern.permute.xlu1 %v7118_v17  ;;  %v334_v29 = vpop.permute.xlu1 %333 }
  0xc1   : > { %614 = vperm.xlu1 %6744, %v557_v25   ;;  %6501 = vmatmul.mubr.msk.bf16.gmra.mrb[4].mxu0 %vm743_vm11, %v717_v28  ;;  %vm390_vm8 = vcmp.eq.s32.totalorder %v7274_v6, %v334_v29  ;;  %v6827_v25 = vld [vmem:[%s9064_s2 + $0x68] sm:$0xff]  }
  0xc2   : > { %6504 = vmatprep.mubr.msk.bf16.mxu0 %vm7120_vm0, %v7119_v18  ;;  %v6829_v29 = vld [vmem:[%s9064_s2 + $0xe8] sm:$0xff]  }
  0xc3   : > { %v7331_v43 = vpop.permute.xlu0 %593 }
  0xc5   : > { %6745 = vset.pattern.permute.xlu1 %v7116_v4  ;;  %v444_v30 = vpop.permute.xlu1 %443 }
  0xc6   : > { %375 = vperm.xlu1 %6745, %v7239_v51   ;;  %vm500_vm7 = vcmp.eq.s32.totalorder %v7274_v6, %v444_v30  ;;  %v6830_v30 = vld [vmem:[%s9064_s2 + $0xa8] sm:$0xff]  }
  0xc7   : > { %vm522_vm9 = vmor %vm390_vm8, %vm500_vm7 }
  0xc8   : > { %vm654_vm14 = vmor %vm522_vm9, %vm632_vm10  ;;  %v343_v46 = vpop.permute.xlu0 %342 }
  0xc9   : > { %v447_v33 = vpop.permute.xlu1 %446  ;;  %v5474_v39 = vsel %vm654_vm14, 1.0, %v7119_v18  ;;  %vm393_vm7 = vcmp.eq.s32.totalorder %v7274_v6, %v343_v46 }
  0xca   : > { %6746 = vset.pattern.permute.xlu1 %v7117_v5  ;;  %vm501_vm13 = vcmp.eq.s32.totalorder %v7274_v6, %v447_v33  ;;  %v6831_v33 = vld [vmem:[%s9064_s2 + $0x70] sm:$0xff]  }
  0xcb   : > { %485 = vperm.xlu1 %6746, %v426_v32   ;;  %vm523_vm15 = vmor %vm391_vm12, %vm501_vm13 }
  0xcc   : > { %v349_v59 = vpop.permute.xlu0 %348 }
  0xce   : > { %v579_v36 = vpop.permute.xlu1 %578 }
  0xcf   : > { %vm633_vm1 = vcmp.eq.s32.totalorder %v7274_v6, %v579_v36  ;;  %488 = vperm.xlu1 %6746, %v427_v35   ;;  %v6832_v35 = vld [vmem:[%s9064_s2 + $0x30] sm:$0xff]  }
  0xd0   : > { %vm655_vm2 = vmor %vm523_vm15, %vm633_vm1  ;;  %vm636_vm1 = vcmp.eq.s32.totalorder %v7274_v6, %v7322_v37  ;;  %v355_v20 = vpop.permute.xlu0 %354  ;;  %v6833_v36 = vld [vmem:[%s9064_s2 + $0xf0] sm:$0xff]  }
  0xd1   : > { %v5475_v40 = vsel %vm655_vm2, 1.0, %v7119_v18  ;;  %v6834_v37 = vld [vmem:[%s9064_s2 + $0xb0] sm:$0xff]  }
  0xd2   : > { %v718_v41 = vpack.c.bf16 %v5475_v40, %v5474_v39  ;;  %v6835_v39 = vld [vmem:[%s9064_s2 + $0x78] sm:$0xff]  }
  0xd3   : > { %6748 = vset.pattern.permute.xlu1 %v7118_v17  ;;  %v340_v42 = vpop.permute.xlu1 %339  ;;  %v6837_v40 = vld [vmem:[%s9064_s2 + $0xf8] sm:$0xff]  }
  0xd4   : > { %620 = vperm.xlu1 %6748, %v559_v38   ;;  %6505 = vmatmul.mubr.msk.bf16.gmra.mrb[8].mxu0 %vm743_vm11, %v718_v41  ;;  %vm392_vm4 = vcmp.eq.s32.totalorder %v7274_v6, %v340_v42  ;;  %v361_v24 = vpop.permute.xlu0 %360  ;;  %v6836_v41 = vld [vmem:[%s9064_s2 + $0x38] sm:$0xff]  }
  0xd5   : > { %6508 = vmatprep.mubr.msk.bf16.mxu0 %vm7120_vm0, %v7119_v18 }
  0xd8   : > { %6749 = vset.pattern.permute.xlu1 %v7116_v4  ;;  %v450_v44 = vpop.permute.xlu1 %449  ;;  %v367_v28 = vpop.permute.xlu0 %366 }
  0xd9   : > { %381 = vperm.xlu1 %6749, %v7247_v55   ;;  %vm502_vm3 = vcmp.eq.s32.totalorder %v7274_v6, %v450_v44  ;;  %v6807_v55 = vld [vmem:[%s9064_s2 + $0x40] sm:$0xff]   ;;  %v6838_v44 = vld [vmem:[%s9064_s2 + $0xb8] sm:$0xff]  }
  0xda   : > { %vm524_vm6 = vmor %vm392_vm4, %vm502_vm3  ;;  %5780 = vmatprep.subr.bf16.mxu1 %v6807_v55  ;;  %vm395_vm3 = vcmp.eq.s32.totalorder %v7274_v6, %v349_v59 }
  0xdb   : > { %vm656_vm9 = vmor %vm524_vm6, %vm634_vm5  ;;  %5781 = vmatpush3.bf16.msra.mxu1 %v6808_v56 }
  0xdc   : > { %v453_v47 = vpop.permute.xlu1 %452  ;;  %v373_v42 = vpop.permute.xlu0 %372 }
  0xdd   : > { %6750 = vset.pattern.permute.xlu1 %v7117_v5  ;;  %vm503_vm8 = vcmp.eq.s32.totalorder %v7274_v6, %v453_v47  ;;  %v5476_v5 = vsel %vm656_vm9, 1.0, %v7119_v18 }
  0xde   : > { %491 = vperm.xlu1 %6750, %v428_v45   ;;  %vm525_vm10 = vmor %vm393_vm7, %vm503_vm8 }
  0xe1   : > { %v585_v49 = vpop.permute.xlu1 %584  ;;  %v600_v45 = vpop.permute.xlu0 %599 }
  0xe2   : > { %vm635_vm12 = vcmp.eq.s32.totalorder %v7274_v6, %v585_v49  ;;  %494 = vperm.xlu1 %6750, %v429_v48  }
  0xe3   : > { %vm657_vm13 = vmor %vm525_vm10, %vm635_vm12  ;;  %vm638_vm12 = vcmp.eq.s32.totalorder %v7274_v6, %v7331_v43 }
  0xe4   : > { %v5477_v51 = vsel %vm657_vm13, 1.0, %v7119_v18 }
  0xe5   : > { %v719_v52 = vpack.c.bf16 %v5477_v51, %v5476_v5 }
  0xe6   : > { %6752 = vset.pattern.permute.xlu1 %v7118_v17  ;;  %v346_v53 = vpop.permute.xlu1 %345  ;;  %v6809_v17 = vld [vmem:[%s9064_s2 + $0xc0] sm:$0xff]  }
  0xe7   : > { %626 = vperm.xlu1 %6752, %v561_v50   ;;  %6509 = vmatmul.mubr.msk.bf16.gmra.mrb[12].mxu0 %vm743_vm11, %v719_v52  ;;  %vm394_vm15 = vcmp.eq.s32.totalorder %v7274_v6, %v346_v53  ;;  %v606_v52 = vpop.permute.xlu0 %605 }
  0xe8   : > { %6512 = vmatprep.mubr.msk.bf16.mxu0 %vm7120_vm0, %v7119_v18  ;;  %5862 = vmatprep.subr.bf16.mxu0 %v6809_v17 }
  0xe9   : > { %5863 = vmatpush3.bf16.msra.mxu0 %v6810_v57 }
  0xea   : > { %5864 = vmatprep.subr.bf16.mxu0 %v6813_v58 }
  0xeb   : > { %v456_v54 = vpop.permute.xlu1 %455  ;;  %6753 = vset.pattern.permute.xlu1 %v7116_v4  ;;  %v6811_v4 = vld [vmem:[%s9064_s2 + $0x48] sm:$0xff]   ;;  %v612_v58 = vpop.permute.xlu0 %611 }
  0xec   : > { %vm504_vm14 = vcmp.eq.s32.totalorder %v7274_v6, %v456_v54  ;;  %5782 = vmatprep.subr.bf16.mxu1 %v6811_v4 }
  0xed   : > { %vm526_vm2 = vmor %vm394_vm15, %vm504_vm14  ;;  %5783 = vmatpush3.bf16.msra.mxu1 %v6812_v61  ;;  %5865 = vmatpush3.bf16.msra.mxu0 %v6814_v62  ;;  %vm397_vm14 = vcmp.eq.s32.totalorder %v7274_v6, %v355_v20 }
  0xee   : > { %vm658_vm5 = vmor %vm526_vm2, %vm636_vm1  ;;  %5784 = vmatprep.subr.bf16.mxu1 %v6815_v63  ;;  %5866 = vmatprep.subr.bf16.mxu0 %v6817_v0 }
  0xef   : > { %v459_v60 = vpop.permute.xlu1 %458  ;;  %v5478_v9 = vsel %vm658_vm5, 1.0, %v7119_v18 }
  0xf0   : > { %vm505_vm4 = vcmp.eq.s32.totalorder %v7274_v6, %v459_v60 }
  0xf1   : > { %vm527_vm6 = vmor %vm395_vm3, %vm505_vm4  ;;  %5785 = vmatpush3.bf16.msra.mxu1 %v6816_v1  ;;  %5867 = vmatpush3.bf16.msra.mxu0 %v6818_v2  ;;  %v618_v1 = vpop.permute.xlu0 %617 }
  0xf2   : > { %5786 = vmatprep.subr.bf16.mxu1 %v6819_v7  ;;  %5868 = vmatprep.subr.bf16.mxu0 %v6821_v8 }
  0xf4   : > { %v591_v3 = vpop.permute.xlu1 %590 }
  0xf5   : > { %vm637_vm7 = vcmp.eq.s32.totalorder %v7274_v6, %v591_v3  ;;  %5787 = vmatpush3.bf16.msra.mxu1 %v6820_v11  ;;  %5869 = vmatpush3.bf16.msra.mxu0 %v6822_v13  ;;  %v379_v3 = vpop.permute.xlu0 %378 }
  0xf6   : > { %vm659_vm8 = vmor %vm527_vm6, %vm637_vm7  ;;  %5788 = vmatprep.subr.bf16.mxu1 %v6823_v14  ;;  %5870 = vmatprep.subr.bf16.mxu0 %v6825_v16 }
  0xf7   : > { %v5479_v10 = vsel %vm659_vm8, 1.0, %v7119_v18  ;;  %vm640_vm8 = vcmp.eq.s32.totalorder %v7274_v6, %v600_v45 }
  0xf8   : > { %v720_v12 = vpack.c.bf16 %v5479_v10, %v5478_v9 }
  0xf9   : > { %v352_v15 = vpop.permute.xlu1 %351  ;;  %5789 = vmatpush3.bf16.msra.mxu1 %v6824_v19  ;;  %5871 = vmatpush3.bf16.msra.mxu0 %v6826_v21  ;;  %v385_v13 = vpop.permute.xlu0 %384 }
  0xfa   : > { %6513 = vmatmul.mubr.msk.bf16.gmra.mrb[16].mxu0 %vm743_vm11, %v720_v12  ;;  %vm396_vm10 = vcmp.eq.s32.totalorder %v7274_v6, %v352_v15  ;;  %5790 = vmatprep.subr.bf16.mxu1 %v6827_v25 }
  0xfb   : > { %6516 = vmatprep.mubr.msk.bf16.mxu0 %vm7120_vm0, %v7119_v18  ;;  %5872 = vmatprep.subr.bf16.mxu0 %v6829_v29  ;;  %v1140_v29 = vld [vmem:[#allocation2 + $0x7] sm:$0xff] }
  0xfd   : > { %5791 = vmatpush3.bf16.msra.mxu1 %v6828_v27  ;;  %5873 = vmatpush3.bf16.msra.mxu0 %v6830_v30  ;;  %v624_v15 = vpop.permute.xlu0 %623  ;;  %v1096_v30 = vld [vmem:[#allocation2 + $0x6] sm:$0xff] }
  0xfe   : > { %v462_v22 = vpop.permute.xlu1 %461  ;;  %5792 = vmatprep.subr.bf16.mxu1 %v6831_v33  ;;  %5874 = vmatprep.subr.bf16.mxu0 %v6833_v36  ;;  %v6840_v36 = vld [vmem:[%s9064_s2 + $0x100] sm:$0xff]  }
  0xff   : > { %vm506_vm9 = vcmp.eq.s32.totalorder %v7274_v6, %v462_v22 }
 0x100   : > { %vm528_vm13 = vmor %vm396_vm10, %vm506_vm9  ;;  %vm399_vm9 = vcmp.eq.s32.totalorder %v7274_v6, %v361_v24 }
 0x101   : > { %vm660_vm1 = vmor %vm528_vm13, %vm638_vm12  ;;  %5793 = vmatpush3.bf16.msra.mxu1 %v6832_v35  ;;  %5875 = vmatpush3.bf16.msra.mxu0 %v6834_v37  ;;  %v1184_v35 = vld [vmem:[#allocation2 + $0x8] sm:$0xff] }
 0x102   : > { %v465_v23 = vpop.permute.xlu1 %464  ;;  %v5480_v31 = vsel %vm660_vm1, 1.0, %v7119_v18  ;;  %5794 = vmatprep.subr.bf16.mxu1 %v6835_v39  ;;  %5876 = vmatprep.subr.bf16.mxu0 %v6837_v40 }
 0x103   : > { %vm507_vm15 = vcmp.eq.s32.totalorder %v7274_v6, %v465_v23  ;;  %v6839_v23 = vld [vmem:[%s9064_s2 + $0x140] sm:$0xff]  }
 0x104   : > { %vm529_vm2 = vmor %vm397_vm14, %vm507_vm15 }
 0x105   : > { %5795 = vmatpush3.bf16.msra.mxu1 %v6836_v41  ;;  %5877 = vmatpush3.bf16.msra.mxu0 %v6838_v44  ;;  %v6842_v44 = vld [vmem:[%s9064_s2 + $0x108] sm:$0xff]  }
 0x106   : > { %5944 = vmatprep.subr.bf16.mxu1 %v6839_v23 }
 0x107   : > { %v597_v26 = vpop.permute.xlu1 %596 }
 0x108   : > { %vm639_vm3 = vcmp.eq.s32.totalorder %v7274_v6, %v597_v26 }
 0x109   : > { %vm661_vm4 = vmor %vm529_vm2, %vm639_vm3 }
 0x10a   : > { %v5481_v32 = vsel %vm661_vm4, 1.0, %v7119_v18  ;;  %vm642_vm4 = vcmp.eq.s32.totalorder %v7274_v6, %v606_v52  ;;  %v6845_v52 = vld [vmem:[%s9064_s2 + $0x158] sm:$0xff]  }
 0x10b   : > { %v721_v34 = vpack.c.bf16 %v5481_v32, %v5480_v31 }
 0x10c   : > { %v358_v38 = vpop.permute.xlu1 %357 }
 0x10d   : > { %6517 = vmatmul.mubr.msk.bf16.gmra.mrb[20].mxu0 %vm743_vm11, %v721_v34  ;;  %vm398_vm6 = vcmp.eq.s32.totalorder %v7274_v6, %v358_v38  ;;  %v6841_v38 = vld [vmem:[%s9064_s2 + $0x148] sm:$0xff]  }
 0x10e   : > { %6520 = vmatprep.mubr.msk.bf16.mxu0 %vm7120_vm0, %v7119_v18 }
 0x111   : > { %v468_v43 = vpop.permute.xlu1 %467 }
 0x112   : > { %vm508_vm5 = vcmp.eq.s32.totalorder %v7274_v6, %v468_v43 }
 0x113   : > { %vm530_vm7 = vmor %vm398_vm6, %vm508_vm5  ;;  %vm401_vm5 = vcmp.eq.s32.totalorder %v7274_v6, %v367_v28 }
 0x114   : > { %vm662_vm12 = vmor %vm530_vm7, %vm640_vm8 }
 0x115   : > { %v471_v46 = vpop.permute.xlu1 %470  ;;  %v5482_v48 = vsel %vm662_vm12, 1.0, %v7119_v18 }
 0x116   : > { %vm509_vm10 = vcmp.eq.s32.totalorder %v7274_v6, %v471_v46  ;;  %v6843_v46 = vld [vmem:[%s9064_s2 + $0x150] sm:$0xff]  }
 0x117   : > { %vm531_vm13 = vmor %vm399_vm9, %vm509_vm10 }
 0x11a   : > { %v603_v47 = vpop.permute.xlu1 %602 }
 0x11b   : > { %vm641_vm14 = vcmp.eq.s32.totalorder %v7274_v6, %v603_v47 }
 0x11c   : > { %vm663_vm15 = vmor %vm531_vm13, %vm641_vm14 }
 0x11d   : > { %v5483_v49 = vsel %vm663_vm15, 1.0, %v7119_v18  ;;  %vm644_vm15 = vcmp.eq.s32.totalorder %v7274_v6, %v612_v58  ;;  %v6848_v58 = vld [vmem:[%s9064_s2 + $0x120] sm:$0xff]  }
 0x11e   : > { %v722_v50 = vpack.c.bf16 %v5483_v49, %v5482_v48  ;;  %v6844_v49 = vld [vmem:[%s9064_s2 + $0x110] sm:$0xff]  }
 0x11f   : > { %v364_v5 = vpop.permute.xlu1 %363 }
 0x120   : > { %6521 = vmatmul.mubr.msk.bf16.gmra.mrb[24].mxu0 %vm743_vm11, %v722_v50  ;;  %vm400_vm2 = vcmp.eq.s32.totalorder %v7274_v6, %v364_v5 }
 0x121   : > { %6524 = vmatprep.mubr.msk.bf16.mxu0 %vm7120_vm0, %v7119_v18 }
 0x124   : > { %v474_v51 = vpop.permute.xlu1 %473 }
 0x125   : > { %vm510_vm1 = vcmp.eq.s32.totalorder %v7274_v6, %v474_v51 }
 0x126   : > { %vm532_vm3 = vmor %vm400_vm2, %vm510_vm1  ;;  %vm403_vm2 = vcmp.eq.s32.totalorder %v7274_v6, %v373_v42 }
 0x127   : > { %vm664_vm7 = vmor %vm532_vm3, %vm642_vm4 }
 0x128   : > { %v477_v53 = vpop.permute.xlu1 %476  ;;  %v5484_v55 = vsel %vm664_vm7, 1.0, %v7119_v18 }
 0x129   : > { %vm511_vm6 = vcmp.eq.s32.totalorder %v7274_v6, %v477_v53 }
 0x12a   : > { %vm533_vm8 = vmor %vm401_vm5, %vm511_vm6 }
 0x12d   : > { %v609_v54 = vpop.permute.xlu1 %608 }
 0x12e   : > { %vm643_vm9 = vcmp.eq.s32.totalorder %v7274_v6, %v609_v54 }
 0x12f   : > { %vm665_vm10 = vmor %vm533_vm8, %vm643_vm9 }
 0x130   : > { %v5485_v56 = vsel %vm665_vm10, 1.0, %v7119_v18  ;;  %vm405_vm10 = vcmp.eq.s32.totalorder %v7274_v6, %v379_v3  ;;  %v6849_v3 = vld [vmem:[%s9064_s2 + $0x168] sm:$0xff]  }
 0x131   : > { %v723_v17 = vpack.c.bf16 %v5485_v56, %v5484_v55  ;;  %v6846_v55 = vld [vmem:[%s9064_s2 + $0x118] sm:$0xff]  }
 0x132   : > { %v370_v57 = vpop.permute.xlu1 %369 }
 0x133   : > { %6525 = vmatmul.mubr.msk.bf16.gmra.mrb[28].mxu0 %vm743_vm11, %v723_v17  ;;  %vm402_vm13 = vcmp.eq.s32.totalorder %v7274_v6, %v370_v57  ;;  %v6847_v57 = vld [vmem:[%s9064_s2 + $0x160] sm:$0xff]  }
 0x134   : > { %6528 = vmatprep.mubr.msk.bf16.mxu0 %vm7120_vm0, %v7119_v18 }
 0x137   : > { %v480_v4 = vpop.permute.xlu1 %479 }
 0x138   : > { %vm512_vm12 = vcmp.eq.s32.totalorder %v7274_v6, %v480_v4 }
 0x139   : > { %vm534_vm14 = vmor %vm402_vm13, %vm512_vm12  ;;  %vm646_vm13 = vcmp.eq.s32.totalorder %v7274_v6, %v618_v1 }
 0x13a   : > { %vm666_vm3 = vmor %vm534_vm14, %vm644_vm15 }
 0x13b   : > { %v483_v59 = vpop.permute.xlu1 %482  ;;  %v5486_v61 = vsel %vm666_vm3, 1.0, %v7119_v18 }
 0x13c   : > { %vm513_vm1 = vcmp.eq.s32.totalorder %v7274_v6, %v483_v59 }
 0x13d   : > { %vm535_vm4 = vmor %vm403_vm2, %vm513_vm1 }
 0x140   : > { %v615_v60 = vpop.permute.xlu1 %614 }
 0x141   : > { %vm645_vm5 = vcmp.eq.s32.totalorder %v7274_v6, %v615_v60 }
 0x142   : > { %vm667_vm6 = vmor %vm535_vm4, %vm645_vm5 }
 0x143   : > { %v5487_v62 = vsel %vm667_vm6, 1.0, %v7119_v18  ;;  %vm648_vm6 = vcmp.eq.s32.totalorder %v7274_v6, %v624_v15  ;;  %v6854_v15 = vld [vmem:[%s9064_s2 + $0x188] sm:$0xff]  }
 0x144   : > { %v724_v63 = vpack.c.bf16 %v5487_v62, %v5486_v61 }
 0x145   : > { %v376_v0 = vpop.permute.xlu1 %375 }
 0x146   : > { %6529 = vmatmul.mubr.msk.bf16.gmra.mrb[32].mxu0 %vm743_vm11, %v724_v63  ;;  %vm404_vm8 = vcmp.eq.s32.totalorder %v7274_v6, %v376_v0 }
 0x147   : > { %6532 = vmatprep.mubr.msk.bf16.mxu0 %vm7120_vm0, %v7119_v18 }
 0x14a   : > { %v486_v2 = vpop.permute.xlu1 %485 }
 0x14b   : > { %vm514_vm7 = vcmp.eq.s32.totalorder %v7274_v6, %v486_v2 }
 0x14c   : > { %vm536_vm9 = vmor %vm404_vm8, %vm514_vm7  ;;  %vm407_vm8 = vcmp.eq.s32.totalorder %v7274_v6, %v385_v13 }
 0x14d   : > { %vm668_vm14 = vmor %vm536_vm9, %vm646_vm13 }
 0x14e   : > { %v489_v7 = vpop.permute.xlu1 %488  ;;  %v5488_v9 = vsel %vm668_vm14, 1.0, %v7119_v18 }
 0x14f   : > { %vm515_vm12 = vcmp.eq.s32.totalorder %v7274_v6, %v489_v7 }
 0x150   : > { %vm537_vm15 = vmor %vm405_vm10, %vm515_vm12 }
 0x153   : > { %v621_v8 = vpop.permute.xlu1 %620 }
 0x154   : > { %vm647_vm1 = vcmp.eq.s32.totalorder %v7274_v6, %v621_v8 }
 0x155   : > { %vm669_vm2 = vmor %vm537_vm15, %vm647_vm1 }
 0x156   : > { %v5489_v10 = vsel %vm669_vm2, 1.0, %v7119_v18 }
 0x157   : > { %v725_v11 = vpack.c.bf16 %v5489_v10, %v5488_v9  ;;  %v6850_v9 = vld [vmem:[%s9064_s2 + $0x128] sm:$0xff]   ;;  %v6851_v10 = vld [vmem:[%s9064_s2 + $0x1c0] sm:$0xff]  }
 0x158   : > { %v382_v12 = vpop.permute.xlu1 %381  ;;  %6026 = vmatprep.subr.bf16.mxu0 %v6851_v10 }
 0x159   : > { %6533 = vmatmul.mubr.msk.bf16.gmra.mrb[36].mxu0 %vm743_vm11, %v725_v11  ;;  %vm406_vm4 = vcmp.eq.s32.totalorder %v7274_v6, %v382_v12  ;;  %v6852_v11 = vld [vmem:[%s9064_s2 + $0x180] sm:$0xff]  }
 0x15a   : > { %6536 = vmatprep.mubr.msk.bf16.mxu0 %vm7120_vm0, %v7119_v18 }
 0x15d   : > { %v492_v14 = vpop.permute.xlu1 %491 }
 0x15e   : > { %vm516_vm3 = vcmp.eq.s32.totalorder %v7274_v6, %v492_v14  ;;  %v6853_v14 = vld [vmem:[%s9064_s2 + $0x1c8] sm:$0xff]  }
 0x15f   : > { %vm538_vm5 = vmor %vm406_vm4, %vm516_vm3 }
 0x160   : > { %vm670_vm9 = vmor %vm538_vm5, %vm648_vm6 }
 0x161   : > { %v495_v16 = vpop.permute.xlu1 %494  ;;  %v5490_v20 = vsel %vm670_vm9, 1.0, %v7119_v18 }
 0x162   : > { %vm517_vm7 = vcmp.eq.s32.totalorder %v7274_v6, %v495_v16 }
 0x163   : > { %vm539_vm10 = vmor %vm407_vm8, %vm517_vm7 }
 0x166   : > { %v627_v19 = vpop.permute.xlu1 %626 }
 0x167   : > { %vm649_vm12 = vcmp.eq.s32.totalorder %v7274_v6, %v627_v19  ;;  %v6855_v19 = vld [vmem:[%s9064_s2 + $0x170] sm:$0xff]  }
 0x168   : > { %vm671_vm13 = vmor %vm539_vm10, %vm649_vm12 }
 0x169   : > { %v5491_v21 = vsel %vm671_vm13, 1.0, %v7119_v18 }
 0x16a   : > { %v726_v22 = vpack.c.bf16 %v5491_v21, %v5490_v20  ;;  %v6856_v20 = vld [vmem:[%s9064_s2 + $0x130] sm:$0xff]  }
 0x16b   : > { %v6857_v21 = vld [vmem:[%s9064_s2 + $0x1d0] sm:$0xff]  }
 0x16c   : > { %6537 = vmatmul.mubr.msk.bf16.gmra.mrb[40].mxu0 %vm743_vm11, %v726_v22 }
 0x188   : > { %v7530_v24 = vpop.f32.mrb[0].mxu0 }
 0x189   : > { %1074 = vst [vmem:[#allocation2 + $0x10] sm:$0xff] %v7530_v24  ;;  %v6498_v25 = vpop.f32.mrb[1].mxu0  ;;  %v1206_v41 = vpack.c.bf16 %v7530_v24, %v1184_v35 }
 0x18a   : > { %v7533_v26 = vpop.f32.mrb[2].mxu0  ;;  %v6858_v25 = vld [vmem:[%s9064_s2 + $0x190] sm:$0xff]  }
 0x18b   : > { %1075 = vst [vmem:[#allocation2 + $0x18] sm:$0xff] %v7533_v26  ;;  %v6499_v27 = vpop.f32.mrb[3].mxu0  ;;  %v1294_v28 = vpack.c.bf16 %v7533_v26, %v7530_v24 }
 0x190   : > { %v1141_v31 = vld [vmem:[#allocation2 + $0xf] sm:$0xff] }
 0x191   : > { %v1097_v32 = vld [vmem:[#allocation2 + $0xe] sm:$0xff]  ;;  %v1162_v33 = vpack.c.bf16 %v1141_v31, %v1140_v29 }
 0x192   : > { %v1118_v34 = vpack.c.bf16 %v1097_v32, %v1096_v30  ;;  %v1229_v37 = vld [vmem:[#allocation2 + $0x17] sm:$0xff] }
 0x193   : > { %2204 = vmatprep.mubr.bf16.mxu1 %v1162_v33  ;;  %v1250_v39 = vpack.c.bf16 %v1229_v37, %v1141_v31  ;;  %v1098_v50 = vld [vmem:[#allocation2 + $0x16] sm:$0xff] }
 0x194   : > { %v7544_v40 = vpop.f32.mrb[4].mxu0  ;;  %2205 = vmatmul.mubr.bf16.vlgmr.msra.gmra.mrb[0].mxu1 %v1118_v34  ;;  %v6859_v31 = vld [vmem:[%s9064_s2 + $0x1d8] sm:$0xff]  }
 0x195   : > { %1076 = vst [vmem:[#allocation2 + $0x20] sm:$0xff] %v7544_v40  ;;  %v6502_v42 = vpop.f32.mrb[5].mxu0  ;;  %2325 = vmatprep.mubr.bf16.mxu0 %v1250_v39  ;;  %v7550_v43 = vpack.c.bf16 %v7544_v40, %v7533_v26  ;;  %5945 = vmatpush3.bf16.msra.mxu1 %v6840_v36  ;;  %v6860_v32 = vld [vmem:[%s9064_s2 + $0x198] sm:$0xff]   ;;  %v6861_v36 = vld [vmem:[%s9064_s2 + $0x1e0] sm:$0xff]  }
 0x196   : > { %v7555_v45 = vpop.f32.mrb[6].mxu0  ;;  %2326 = vmatmul.mubr.bf16.vlgmr.msra.gmra.mrb[44].mxu0 %v1206_v41  ;;  %5946 = vmatprep.subr.bf16.mxu1 %v6841_v38  ;;  %v6862_v39 = vld [vmem:[%s9064_s2 + $0x1a0] sm:$0xff]   ;;  %v6863_v41 = vld [vmem:[%s9064_s2 + $0x178] sm:$0xff]  }
 0x197   : > { %1077 = vst [vmem:[#allocation2 + $0x28] sm:$0xff] %v7555_v45  ;;  %v6503_v47 = vpop.f32.mrb[7].mxu0  ;;  %v1295_v48 = vpack.c.bf16 %v7555_v45, %v7544_v40  ;;  %6027 = vmatpush3.bf16.msra.mxu0 %v6852_v11  ;;  %v6864_v42 = vld [vmem:[%s9064_s2 + $0x138] sm:$0xff]  }
 0x198   : > { %6028 = vmatprep.subr.bf16.mxu0 %v6853_v14 }
 0x199   : > { %5947 = vmatpush3.bf16.msra.mxu1 %v6842_v44 }
 0x19a   : > { %5948 = vmatprep.subr.bf16.mxu1 %v6843_v46  ;;  %v6865_v46 = vld [vmem:[%s9064_s2 + $0x1e8] sm:$0xff]  }
 0x19b   : > { %6029 = vmatpush3.bf16.msra.mxu0 %v6854_v15 }
 0x19c   : > { %v1143_v5 = vld [vmem:[#allocation2 + $0x1f] sm:$0xff]  ;;  %6030 = vmatprep.subr.bf16.mxu0 %v6857_v21 }
 0x19d   : > { %v1099_v51 = vld [vmem:[#allocation2 + $0x1e] sm:$0xff]  ;;  %v1163_v53 = vpack.c.bf16 %v1143_v5, %v1229_v37  ;;  %5949 = vmatpush3.bf16.msra.mxu1 %v6844_v49  ;;  %v6866_v49 = vld [vmem:[%s9064_s2 + $0x1a8] sm:$0xff]  }
 0x19e   : > { %v1119_v54 = vpack.c.bf16 %v1099_v51, %v1098_v50  ;;  %v1231_v56 = vld [vmem:[#allocation2 + $0x27] sm:$0xff]  ;;  %5950 = vmatprep.subr.bf16.mxu1 %v6845_v52  ;;  %v6867_v50 = vld [vmem:[%s9064_s2 + $0x1f0] sm:$0xff]  }
 0x19f   : > { %2212 = vmatprep.mubr.bf16.mxu1 %v1163_v53  ;;  %v1251_v17 = vpack.c.bf16 %v1231_v56, %v1143_v5  ;;  %v1100_v0 = vld [vmem:[#allocation2 + $0x26] sm:$0xff]  ;;  %6031 = vmatpush3.bf16.msra.mxu0 %v6858_v25  ;;  %v6868_v51 = vld [vmem:[%s9064_s2 + $0x1b0] sm:$0xff]  }
 0x1a0   : > { %2213 = vmatmul.mubr.bf16.gmra.mrb[4].mxu1 %v1119_v54  ;;  %6032 = vmatprep.subr.bf16.mxu0 %v6859_v31  ;;  %v6869_v54 = vld [vmem:[%s9064_s2 + $0x1f8] sm:$0xff]  }
 0x1a1   : > { %2333 = vmatprep.mubr.bf16.mxu0 %v1251_v17  ;;  %5951 = vmatpush3.bf16.msra.mxu1 %v6846_v55 }
 0x1a2   : > { %2334 = vmatmul.mubr.bf16.gmra.mrb[48].mxu0 %v7550_v43  ;;  %5952 = vmatprep.subr.bf16.mxu1 %v6847_v57 }
 0x1a3   : > { %6033 = vmatpush3.bf16.msra.mxu0 %v6860_v32 }
 0x1a4   : > { %6034 = vmatprep.subr.bf16.mxu0 %v6861_v36 }
 0x1a5   : > { %5953 = vmatpush3.bf16.msra.mxu1 %v6848_v58 }
 0x1a6   : > { %5954 = vmatprep.subr.bf16.mxu1 %v6849_v3 }
 0x1a7   : > { %v7576_v4 = vpop.f32.mrb[8].mxu0  ;;  %6035 = vmatpush3.bf16.msra.mxu0 %v6862_v39 }
 0x1a8   : > { %1078 = vst [vmem:[#allocation2 + $0x30] sm:$0xff] %v7576_v4  ;;  %v6506_v59 = vpop.f32.mrb[9].mxu0  ;;  %v7584_v60 = vpack.c.bf16 %v7576_v4, %v7555_v45  ;;  %6036 = vmatprep.subr.bf16.mxu0 %v6865_v46 }
 0x1a9   : > { %v7586_v61 = vpop.f32.mrb[10].mxu0  ;;  %5955 = vmatpush3.bf16.msra.mxu1 %v6850_v9 }
 0x1aa   : > { %1079 = vst [vmem:[#allocation2 + $0x38] sm:$0xff] %v7586_v61  ;;  %v6507_v62 = vpop.f32.mrb[11].mxu0  ;;  %v1296_v63 = vpack.c.bf16 %v7586_v61, %v7576_v4  ;;  %5956 = vmatprep.subr.bf16.mxu1 %v6855_v19 }
 0x1ab   : > { %6037 = vmatpush3.bf16.msra.mxu0 %v6866_v49 }
 0x1ac   : > { %6038 = vmatprep.subr.bf16.mxu0 %v6867_v50 }
 0x1ad   : > { %5957 = vmatpush3.bf16.msra.mxu1 %v6856_v20 }
 0x1ae   : > { %5958 = vmatprep.subr.bf16.mxu1 %v6863_v41 }
 0x1af   : > { %v1145_v1 = vld [vmem:[#allocation2 + $0x2f] sm:$0xff]  ;;  %6039 = vmatpush3.bf16.msra.mxu0 %v6868_v51 }
 0x1b0   : > { %v1101_v2 = vld [vmem:[#allocation2 + $0x2e] sm:$0xff]  ;;  %v1164_v7 = vpack.c.bf16 %v1145_v1, %v1231_v56  ;;  %v6870_v56 = vld [vmem:[%s9064_s2 + $0x1b8] sm:$0xff]   ;;  %6040 = vmatprep.subr.bf16.mxu0 %v6869_v54 }
 0x1b1   : > { %v1120_v8 = vpack.c.bf16 %v1101_v2, %v1100_v0  ;;  %v1233_v12 = vld [vmem:[#allocation2 + $0x37] sm:$0xff]  ;;  %5959 = vmatpush3.bf16.msra.mxu1 %v6864_v42 }
 0x1b2   : > { %2220 = vmatprep.mubr.bf16.mxu1 %v1164_v7  ;;  %v1252_v13 = vpack.c.bf16 %v1233_v12, %v1145_v1  ;;  %v1102_v33 = vld [vmem:[#allocation2 + $0x36] sm:$0xff]  ;;  %6540 = vmatprep.subr.bf16.mxu1 %v7119_v18 }
 0x1b3   : > { %2221 = vmatmul.mubr.bf16.gmra.mrb[8].mxu1 %v1120_v8  ;;  %6041 = vmatpush3.bf16.msra.mxu0 %v6870_v56 }
 0x1b4   : > { %2341 = vmatprep.mubr.bf16.mxu0 %v1252_v13 }
 0x1b5   : > { %2342 = vmatmul.mubr.bf16.gmra.mrb[52].mxu0 %v7584_v60 }
 0x1ba   : > { %v7610_v16 = vpop.f32.mrb[12].mxu0 }
 0x1bb   : > { %1080 = vst [vmem:[#allocation2 + $0x40] sm:$0xff] %v7610_v16  ;;  %v6510_v22 = vpop.f32.mrb[13].mxu0  ;;  %v7624_v23 = vpack.c.bf16 %v7610_v16, %v7586_v61  ;;  %v6877_v61 = vld [vmem:[%s9064_s2 + $0x230] sm:$0xff]  }
 0x1bc   : > { %v7629_v27 = vpop.f32.mrb[14].mxu0 }
 0x1bd   : > { %1081 = vst [vmem:[#allocation2 + $0x48] sm:$0xff] %v7629_v27  ;;  %v6511_v29 = vpop.f32.mrb[15].mxu0  ;;  %v1297_v30 = vpack.c.bf16 %v7629_v27, %v7610_v16  ;;  %v7085_v16 = vld [vmem:[%s7172_s8] sm:$0xff] }
 0x1be   : > { %vm898_vm11 = vcmp.ne.s32.totalorder %v7085_v16, 100  ;;  %v7093_v16 = vld [vmem:[%s7172_s8 + $0x10] sm:$0xff] }
 0x1bf   : > { %vm900_vm6 = vcmp.ne.s32.totalorder %v7093_v16, 100  ;;  %v7106_v16 = vld [vmem:[%s7172_s8 + $0xa0] sm:$0xff] }
 0x1c2   : > { %v1147_v34 = vld [vmem:[#allocation2 + $0x3f] sm:$0xff] }
 0x1c3   : > { %v1103_v35 = vld [vmem:[#allocation2 + $0x3e] sm:$0xff]  ;;  %v1165_v37 = vpack.c.bf16 %v1147_v34, %v1233_v12 }
 0x1c4   : > { %v1121_v38 = vpack.c.bf16 %v1103_v35, %v1102_v33  ;;  %v1235_v44 = vld [vmem:[#allocation2 + $0x47] sm:$0xff] }
 0x1c5   : > { %2228 = vmatprep.mubr.bf16.mxu1 %v1165_v37  ;;  %v1253_v47 = vpack.c.bf16 %v1235_v44, %v1147_v34  ;;  %v1104_v59 = vld [vmem:[#allocation2 + $0x46] sm:$0xff] }
 0x1c6   : > { %2229 = vmatmul.mubr.bf16.gmra.mrb[12].mxu1 %v1121_v38  ;;  %v1409_v24 = vld [vmem:[#allocation2 + $0x41] sm:$0xff] }
 0x1c7   : > { %2349 = vmatprep.mubr.bf16.mxu0 %v1253_v47 }
 0x1c8   : > { %2350 = vmatmul.mubr.bf16.gmra.mrb[56].mxu0 %v7624_v23 }
 0x1cd   : > { %v7663_v5 = vpop.f32.mrb[16].mxu0 }
 0x1ce   : > { %1082 = vst [vmem:[#allocation2 + $0x50] sm:$0xff] %v7663_v5  ;;  %v6514_v52 = vpop.f32.mrb[17].mxu0  ;;  %v7671_v53 = vpack.c.bf16 %v7663_v5, %v7629_v27  ;;  %v5505_v27 = vsel %vm898_vm11, 1.0, %v7119_v18 }
 0x1cf   : > { %v7676_v55 = vpop.f32.mrb[18].mxu0  ;;  %966 = vperm.xlu1 %6753, %v5505_v27  }
 0x1d0   : > { %1083 = vst [vmem:[#allocation2 + $0x58] sm:$0xff] %v7676_v55  ;;  %v6515_v17 = vpop.f32.mrb[19].mxu0  ;;  %v1298_v57 = vpack.c.bf16 %v7676_v55, %v7663_v5 }
 0x1d5   : > { %v1149_v58 = vld [vmem:[#allocation2 + $0x4f] sm:$0xff] }
 0x1d6   : > { %v1105_v62 = vld [vmem:[#allocation2 + $0x4e] sm:$0xff]  ;;  %v1166_v0 = vpack.c.bf16 %v1149_v58, %v1235_v44 }
 0x1d7   : > { %v1122_v1 = vpack.c.bf16 %v1105_v62, %v1104_v59  ;;  %v1237_v2 = vld [vmem:[#allocation2 + $0x57] sm:$0xff] }
 0x1d8   : > { %2236 = vmatprep.mubr.bf16.mxu1 %v1166_v0  ;;  %v1254_v3 = vpack.c.bf16 %v1237_v2, %v1149_v58  ;;  %v1106_v14 = vld [vmem:[#allocation2 + $0x56] sm:$0xff] }
 0x1d9   : > { %2237 = vmatmul.mubr.bf16.gmra.mrb[16].mxu1 %v1122_v1  ;;  %v1411_v40 = vld [vmem:[#allocation2 + $0x51] sm:$0xff] }
 0x1da   : > { %2357 = vmatprep.mubr.bf16.mxu0 %v1254_v3 }
 0x1db   : > { %2358 = vmatmul.mubr.bf16.gmra.mrb[60].mxu0 %v7671_v53 }
 0x1e0   : > { %v7685_v7 = vpop.f32.mrb[20].mxu0 }
 0x1e1   : > { %1084 = vst [vmem:[#allocation2 + $0x60] sm:$0xff] %v7685_v7  ;;  %v6518_v8 = vpop.f32.mrb[21].mxu0  ;;  %v7690_v9 = vpack.c.bf16 %v7685_v7, %v7676_v55 }
 0x1e2   : > { %v7692_v10 = vpop.f32.mrb[22].mxu0 }
 0x1e3   : > { %1085 = vst [vmem:[#allocation2 + $0x68] sm:$0xff] %v7692_v10  ;;  %v6519_v11 = vpop.f32.mrb[23].mxu0  ;;  %v1299_v12 = vpack.c.bf16 %v7692_v10, %v7685_v7 }
 0x1e8   : > { %v1151_v13 = vld [vmem:[#allocation2 + $0x5f] sm:$0xff] }
 0x1e9   : > { %v1107_v15 = vld [vmem:[#allocation2 + $0x5e] sm:$0xff]  ;;  %v1167_v19 = vpack.c.bf16 %v1151_v13, %v1237_v2 }
 0x1ea   : > { %v1123_v20 = vpack.c.bf16 %v1107_v15, %v1106_v14  ;;  %v1239_v21 = vld [vmem:[#allocation2 + $0x67] sm:$0xff] }
 0x1eb   : > { %2244 = vmatprep.mubr.bf16.mxu1 %v1167_v19  ;;  %v1255_v22 = vpack.c.bf16 %v1239_v21, %v1151_v13  ;;  %v1108_v36 = vld [vmem:[#allocation2 + $0x66] sm:$0xff] }
 0x1ec   : > { %2245 = vmatmul.mubr.bf16.gmra.mrb[20].mxu1 %v1123_v20 }
 0x1ed   : > { %2365 = vmatprep.mubr.bf16.mxu0 %v1255_v22 }
 0x1ee   : > { %2366 = vmatmul.mubr.bf16.gmra.mrb[64].mxu0 %v7690_v9 }
 0x1f3   : > { %v7698_v25 = vpop.f32.mrb[24].mxu0 }
 0x1f4   : > { %1086 = vst [vmem:[#allocation2 + $0x70] sm:$0xff] %v7698_v25  ;;  %v6522_v29 = vpop.f32.mrb[25].mxu0  ;;  %v7703_v31 = vpack.c.bf16 %v7698_v25, %v7692_v10  ;;  %v7096_v10 = vld [vmem:[%s7172_s8 + $0x38] sm:$0xff] }
 0x1f5   : > { %v7705_v32 = vpop.f32.mrb[26].mxu0  ;;  %vm905_vm9 = vcmp.ne.s32.totalorder %v7096_v10, 100 }
 0x1f6   : > { %1087 = vst [vmem:[#allocation2 + $0x78] sm:$0xff] %v7705_v32  ;;  %v6523_v33 = vpop.f32.mrb[27].mxu0  ;;  %v1300_v34 = vpack.c.bf16 %v7705_v32, %v7698_v25 }
 0x1fb   : > { %v1153_v35 = vld [vmem:[#allocation2 + $0x6f] sm:$0xff] }
 0x1fc   : > { %v1109_v37 = vld [vmem:[#allocation2 + $0x6e] sm:$0xff]  ;;  %v1168_v38 = vpack.c.bf16 %v1153_v35, %v1239_v21 }
 0x1fd   : > { %v1124_v39 = vpack.c.bf16 %v1109_v37, %v1108_v36  ;;  %v1241_v41 = vld [vmem:[#allocation2 + $0x77] sm:$0xff] }
 0x1fe   : > { %2252 = vmatprep.mubr.bf16.mxu1 %v1168_v38  ;;  %v1256_v42 = vpack.c.bf16 %v1241_v41, %v1153_v35  ;;  %v1110_v54 = vld [vmem:[#allocation2 + $0x76] sm:$0xff] }
 0x1ff   : > { %2253 = vmatmul.mubr.bf16.gmra.mrb[24].mxu1 %v1124_v39 }
 0x200   : > { %2373 = vmatprep.mubr.bf16.mxu0 %v1256_v42 }
 0x201   : > { %2374 = vmatmul.mubr.bf16.gmra.mrb[68].mxu0 %v7703_v31 }
 0x206   : > { %v7711_v44 = vpop.f32.mrb[28].mxu0 }
 0x207   : > { %1088 = vst [vmem:[#allocation2 + $0x80] sm:$0xff] %v7711_v44  ;;  %v6526_v46 = vpop.f32.mrb[29].mxu0  ;;  %v7716_v47 = vpack.c.bf16 %v7711_v44, %v7705_v32 }
 0x208   : > { %v7718_v49 = vpop.f32.mrb[30].mxu0 }
 0x209   : > { %1089 = vst [vmem:[#allocation2 + $0x88] sm:$0xff] %v7718_v49  ;;  %v6527_v50 = vpop.f32.mrb[31].mxu0  ;;  %v1301_v51 = vpack.c.bf16 %v7718_v49, %v7711_v44 }
 0x20e   : > { %v1155_v52 = vld [vmem:[#allocation2 + $0x7f] sm:$0xff] }
 0x20f   : > { %v1111_v56 = vld [vmem:[#allocation2 + $0x7e] sm:$0xff]  ;;  %v1169_v17 = vpack.c.bf16 %v1155_v52, %v1241_v41 }
 0x210   : > { %v1125_v58 = vpack.c.bf16 %v1111_v56, %v1110_v54  ;;  %v1243_v59 = vld [vmem:[#allocation2 + $0x87] sm:$0xff] }
 0x211   : > { %2260 = vmatprep.mubr.bf16.mxu1 %v1169_v17  ;;  %v1257_v62 = vpack.c.bf16 %v1243_v59, %v1155_v52  ;;  %v1112_v14 = vld [vmem:[#allocation2 + $0x86] sm:$0xff] }
 0x212   : > { %2261 = vmatmul.mubr.bf16.gmra.mrb[28].mxu1 %v1125_v58 }
 0x213   : > { %2381 = vmatprep.mubr.bf16.mxu0 %v1257_v62 }
 0x214   : > { %2382 = vmatmul.mubr.bf16.gmra.mrb[72].mxu0 %v7716_v47 }
 0x219   : > { %v7724_v0 = vpop.f32.mrb[32].mxu0 }
 0x21a   : > { %1090 = vst [vmem:[#allocation2 + $0x90] sm:$0xff] %v7724_v0  ;;  %v6530_v1 = vpop.f32.mrb[33].mxu0  ;;  %v7729_v2 = vpack.c.bf16 %v7724_v0, %v7718_v49 }
 0x21b   : > { %v7731_v3 = vpop.f32.mrb[34].mxu0 }
 0x21c   : > { %1091 = vst [vmem:[#allocation2 + $0x98] sm:$0xff] %v7731_v3  ;;  %v6531_v8 = vpop.f32.mrb[35].mxu0  ;;  %v1302_v11 = vpack.c.bf16 %v7731_v3, %v7724_v0 }
 0x21d   : > { %v1317_v8 = vld [vmem:[#allocation2 + $0x19] sm:$0xff] }
 0x221   : > { %v1157_v13 = vld [vmem:[#allocation2 + $0x8f] sm:$0xff] }
 0x222   : > { %v1113_v15 = vld [vmem:[#allocation2 + $0x8e] sm:$0xff]  ;;  %v1170_v19 = vpack.c.bf16 %v1157_v13, %v1243_v59 }
 0x223   : > { %v1126_v20 = vpack.c.bf16 %v1113_v15, %v1112_v14  ;;  %v1245_v21 = vld [vmem:[#allocation2 + $0x97] sm:$0xff] }
 0x224   : > { %2268 = vmatprep.mubr.bf16.mxu1 %v1170_v19  ;;  %v1258_v22 = vpack.c.bf16 %v1245_v21, %v1157_v13  ;;  %v1114_v41 = vld [vmem:[#allocation2 + $0x96] sm:$0xff] }
 0x225   : > { %2269 = vmatmul.mubr.bf16.gmra.mrb[32].mxu1 %v1126_v20 }
 0x226   : > { %2389 = vmatprep.mubr.bf16.mxu0 %v1258_v22  ;;  %v1316_v22 = vld [vmem:[#allocation2 + $0x11] sm:$0xff] }
 0x227   : > { %2390 = vmatmul.mubr.bf16.gmra.mrb[76].mxu0 %v7729_v2 }
 0x22c   : > { %v7737_v29 = vpop.f32.mrb[36].mxu0 }
 0x22d   : > { %1092 = vst [vmem:[#allocation2 + $0xa0] sm:$0xff] %v7737_v29  ;;  %v6534_v33 = vpop.f32.mrb[37].mxu0  ;;  %v7742_v35 = vpack.c.bf16 %v7737_v29, %v7731_v3 }
 0x22e   : > { %v7744_v36 = vpop.f32.mrb[38].mxu0  ;;  %v1405_v33 = vld [vmem:[#allocation2 + $0x21] sm:$0xff] }
 0x22f   : > { %1093 = vst [vmem:[#allocation2 + $0xa8] sm:$0xff] %v7744_v36  ;;  %v6535_v37 = vpop.f32.mrb[39].mxu0  ;;  %v1303_v38 = vpack.c.bf16 %v7744_v36, %v7737_v29  ;;  %v1381_v29 = vld [vmem:[#allocation2 + $0xc0] sm:$0xff] }
 0x234   : > { %v1159_v39 = vld [vmem:[#allocation2 + $0x9f] sm:$0xff] }
 0x235   : > { %v1115_v42 = vld [vmem:[#allocation2 + $0x9e] sm:$0xff]  ;;  %v1171_v46 = vpack.c.bf16 %v1159_v39, %v1245_v21 }
 0x236   : > { %v1127_v50 = vpack.c.bf16 %v1115_v42, %v1114_v41  ;;  %v1247_v52 = vld [vmem:[#allocation2 + $0xa7] sm:$0xff]  ;;  %v1426_v41 = vpack.c.bf16 %v1405_v33, %v1317_v8 }
 0x237   : > { %2276 = vmatprep.mubr.bf16.mxu1 %v1171_v46  ;;  %v1259_v54 = vpack.c.bf16 %v1247_v52, %v1159_v39  ;;  %v1116_v14 = vld [vmem:[#allocation2 + $0xa6] sm:$0xff]  ;;  %v1338_v39 = vpack.c.bf16 %v1317_v8, %v1316_v22  ;;  %v6873_v8 = vld [vmem:[%s9064_s2 + $0x210] sm:$0xff]  }
 0x238   : > { %2277 = vmatmul.mubr.bf16.gmra.mrb[36].mxu1 %v1127_v50  ;;  %v1319_v42 = vld [vmem:[#allocation2 + $0x29] sm:$0xff]  ;;  %v6871_v46 = vld [vmem:[%s9064_s2 + $0x200] sm:$0xff]   ;;  %v1407_v50 = vld [vmem:[#allocation2 + $0x31] sm:$0xff] }
 0x239   : > { %2397 = vmatprep.mubr.bf16.mxu0 %v1259_v54  ;;  %v1427_v54 = vpack.c.bf16 %v1407_v50, %v1319_v42 }
 0x23a   : > { %2398 = vmatmul.mubr.bf16.gmra.mrb[80].mxu0 %v7742_v35 }
 0x23f   : > { %v7750_v56 = vpop.f32.mrb[40].mxu0 }
 0x240   : > { %1094 = vst [vmem:[#allocation2 + $0xb0] sm:$0xff] %v7750_v56  ;;  %v6538_v17 = vpop.f32.mrb[41].mxu0  ;;  %v7755_v58 = vpack.c.bf16 %v7750_v56, %v7744_v36 }
 0x241   : > { %v7757_v59 = vpop.f32.mrb[42].mxu0  ;;  %v6872_v17 = vld [vmem:[%s9064_s2 + $0x208] sm:$0xff]  }
 0x242   : > { %1095 = vst [vmem:[#allocation2 + $0xb8] sm:$0xff] %v7757_v59  ;;  %v6539_v62 = vpop.f32.mrb[43].mxu0  ;;  %v1304_v1 = vpack.c.bf16 %v7757_v59, %v7750_v56  ;;  %v1451_v56 = vld [vmem:[#allocation2 + $0x32] sm:$0xff] }
 0x243   : > { %v1321_v62 = vld [vmem:[#allocation2 + $0x39] sm:$0xff] }
 0x244   : > { %v1340_v26 = vpack.c.bf16 %v1321_v62, %v1407_v50 }
 0x247   : > { %v1161_v13 = vld [vmem:[#allocation2 + $0xaf] sm:$0xff] }
 0x248   : > { %v1117_v15 = vld [vmem:[#allocation2 + $0xae] sm:$0xff]  ;;  %v1172_v19 = vpack.c.bf16 %v1161_v13, %v1247_v52  ;;  %v1339_v52 = vpack.c.bf16 %v1319_v42, %v1405_v33 }
 0x249   : > { %v1128_v20 = vpack.c.bf16 %v1117_v15, %v1116_v14  ;;  %v1249_v21 = vld [vmem:[#allocation2 + $0xb7] sm:$0xff]  ;;  %v6875_v14 = vld [vmem:[%s9064_s2 + $0x220] sm:$0xff]  }
 0x24a   : > { %2284 = vmatprep.mubr.bf16.mxu1 %v1172_v19  ;;  %v1260_v37 = vpack.c.bf16 %v1249_v21, %v1161_v13  ;;  %v1323_v13 = vld [vmem:[#allocation2 + $0x49] sm:$0xff]  ;;  %v1325_v19 = vld [vmem:[#allocation2 + $0x59] sm:$0xff] }
 0x24b   : > { %2285 = vmatmul.mubr.bf16.gmra.mrb[40].mxu1 %v1128_v20  ;;  %v1341_v45 = vpack.c.bf16 %v1323_v13, %v1409_v24  ;;  %v7801_v20 = vld [vmem:[%s9066_s4] ss:$0 sm:$0xff] }
 0x24c   : > { %2405 = vmatprep.mubr.bf16.mxu0 %v1260_v37  ;;  %2446 = vmatprep.mubr.bf16.mxu1 %v1338_v39  ;;  %v1342_v39 = vpack.c.bf16 %v1325_v19, %v1411_v40  ;;  %v1337_v49 = vld [vmem:[#allocation2 + $0xb9] sm:$0xff] }
 0x24d   : > { %2406 = vmatmul.mubr.bf16.gmra.mrb[84].mxu0 %v7755_v58 }
 0x24e   : > { %2567 = vmatprep.mubr.bf16.mxu0 %v1426_v41 }
 0x253   : > { %2447 = vmatmul.mubr.bf16.vlgmr.msra.gmra.mrb[44].mxu1 %v1294_v28  ;;  %v1428_v28 = vpack.c.bf16 %v1409_v24, %v1321_v62 }
 0x254   : > { %6541 = vmatpush3.bf16.msra.mxu1 %v6871_v46  ;;  %2454 = vmatprep.mubr.bf16.mxu1 %v1339_v52 }
 0x255   : > { %2568 = vmatmul.mubr.bf16.vlgmr.msra.gmra.mrb[88].mxu0 %v7550_v43  ;;  %6542 = vmatprep.subr.bf16.mxu1 %v7119_v18  ;;  %v6874_v43 = vld [vmem:[%s9064_s2 + $0x218] sm:$0xff]  }
 0x256   : > { %2575 = vmatprep.mubr.bf16.mxu0 %v1427_v54 }
 0x258   : > { %6543 = vmatpush3.bf16.msra.mxu1 %v6872_v17  ;;  %v6878_v17 = vld [vmem:[%s9064_s2 + $0x238] sm:$0xff]  }
 0x259   : > { %6544 = vmatprep.subr.bf16.mxu1 %v7119_v18 }
 0x25b   : > { %2455 = vmatmul.mubr.bf16.gmra.mrb[48].mxu1 %v1295_v48  ;;  %v1429_v48 = vpack.c.bf16 %v1411_v40, %v1323_v13  ;;  %v1327_v13 = vld [vmem:[#allocation2 + $0x69] sm:$0xff] }
 0x25c   : > { %2462 = vmatprep.mubr.bf16.mxu1 %v1340_v26  ;;  %6545 = vmatpush3.bf16.msra.mxu1 %v6873_v8  ;;  %v7087_v26 = vld [vmem:[%s7172_s8 + $0x20] sm:$0xff]  ;;  %v7089_v40 = vld [vmem:[%s7172_s8 + $0x30] sm:$0xff] }
 0x25d   : > { %2576 = vmatmul.mubr.bf16.gmra.mrb[92].mxu0 %v7584_v60  ;;  %6546 = vmatprep.subr.bf16.mxu1 %v7119_v18  ;;  %v6876_v60 = vld [vmem:[%s9064_s2 + $0x228] sm:$0xff]   ;;  %vm902_vm15 = vcmp.ne.s32.totalorder %v7087_v26, 100  ;;  %vm904_vm2 = vcmp.ne.s32.totalorder %v7089_v40, 100 }
 0x25e   : > { %2583 = vmatprep.mubr.bf16.mxu0 %v1428_v28  ;;  %v7088_v28 = vld [vmem:[%s7172_s8 + $0x28] sm:$0xff] }
 0x25f   : > { %vm903_vm1 = vcmp.ne.s32.totalorder %v7088_v28, 100  ;;  %v1417_v26 = vld [vmem:[#allocation2 + $0x81] sm:$0xff] }
 0x260   : > { %6547 = vmatpush3.bf16.msra.mxu1 %v6874_v43 }
 0x261   : > { %6548 = vmatprep.subr.bf16.mxu1 %v7119_v18 }
 0x263   : > { %2463 = vmatmul.mubr.bf16.gmra.mrb[52].mxu1 %v1296_v63 }
 0x264   : > { %2470 = vmatprep.mubr.bf16.mxu1 %v1341_v45  ;;  %6549 = vmatpush3.bf16.msra.mxu1 %v6875_v14  ;;  %v5509_v14 = vsel %vm902_vm15, 1.0, %v7119_v18 }
 0x265   : > { %2584 = vmatmul.mubr.bf16.gmra.mrb[96].mxu0 %v7624_v23  ;;  %6550 = vmatprep.subr.bf16.mxu1 %v7119_v18  ;;  %v1413_v23 = vld [vmem:[#allocation2 + $0x61] sm:$0xff] }
 0x266   : > { %2591 = vmatprep.mubr.bf16.mxu0 %v1429_v48  ;;  %v1430_v54 = vpack.c.bf16 %v1413_v23, %v1325_v19  ;;  %v5510_v48 = vsel %vm903_vm1, 1.0, %v7119_v18  ;;  %v1343_v19 = vpack.c.bf16 %v1327_v13, %v1413_v23 }
 0x267   : > { %v5796_v15 = vpop.f32.mrb[0].mxu1 }
 0x268   : > { %v5797_v4 = vpop.f32.mrb[1].mxu1  ;;  %6551 = vmatpush3.bf16.msra.mxu1 %v6876_v60  ;;  %v5511_v60 = vsel %vm904_vm2, 1.0, %v7119_v18 }
 0x269   : > { %v5798_v63 = vadd.f32 %v5797_v4, %v5796_v15  ;;  %v5799_v21 = vpop.f32.mrb[2].mxu1  ;;  %v5878_v22 = vpop.f32.mrb[44].mxu0  ;;  %6552 = vmatprep.subr.bf16.mxu1 %v7119_v18  ;;  %v1415_v15 = vld [vmem:[#allocation2 + $0x71] sm:$0xff] }
 0x26a   : > { %v5800_v33 = vpop.f32.mrb[3].mxu1  ;;  %v5879_v37 = vpop.f32.mrb[45].mxu0 }
 0x26b   : > { %v2207_v41 = vadd.f32 %v5798_v63, %v7801_v20  ;;  %v5801_v42 = vadd.f32 %v5800_v33, %v5799_v21  ;;  %v5880_v46 = vadd.f32 %v5879_v37, %v5878_v22  ;;  %v5881_v50 = vpop.f32.mrb[46].mxu0  ;;  %2471 = vmatmul.mubr.bf16.gmra.mrb[56].mxu1 %v1297_v30  ;;  %v7086_v30 = vld [vmem:[%s7172_s8 + $0x18] sm:$0xff]  ;;  %v7090_v63 = vld [vmem:[%s7172_s8 + $0x48] sm:$0xff]  ;;  %v7091_v21 = vld [vmem:[%s7172_s8 + $0x50] sm:$0xff]  ;;  %v1431_v33 = vpack.c.bf16 %v1415_v15, %v1327_v13 }
 0x26c   : > { %v5882_v52 = vpop.f32.mrb[47].mxu0  ;;  %2478 = vmatprep.mubr.bf16.mxu1 %v1342_v39  ;;  %6553 = vmatpush3.bf16.msra.mxu1 %v6877_v61  ;;  %vm901_vm14 = vcmp.ne.s32.totalorder %v7086_v30, 100  ;;  %v6765_v61 = vpack.i.bf16 %v5511_v60, %v5510_v48  ;;  %vm907_vm3 = vcmp.ne.s32.totalorder %v7090_v63, 100  ;;  %vm908_vm4 = vcmp.ne.s32.totalorder %v7091_v21, 100  ;;  %v7095_v48 = vld [vmem:[%s7172_s8 + $0x70] sm:$0xff] }
 0x26d   : > { %v2210_v62 = vadd.f32 %v5801_v42, %v7801_v20  ;;  %v7815_v8 = vadd.f32 %v5880_v46, %v2207_v41  ;;  %v5883_v24 = vadd.f32 %v5882_v52, %v5881_v50  ;;  %2592 = vmatmul.mubr.bf16.gmra.mrb[100].mxu0 %v7671_v53  ;;  %6554 = vmatprep.subr.bf16.mxu1 %v7119_v18  ;;  %v5508_v53 = vsel %vm901_vm14, 1.0, %v7119_v18  ;;  %v1331_v63 = vld [vmem:[#allocation2 + $0x89] sm:$0xff] }
 0x26e   : > { %2599 = vmatprep.mubr.bf16.mxu0 %v1430_v54  ;;  %v6760_v45 = vpack.i.bf16 %v5509_v14, %v5508_v53  ;;  %v5514_v37 = vsel %vm907_vm3, 1.0, %v7119_v18  ;;  %v5515_v39 = vsel %vm908_vm4, 1.0, %v7119_v18  ;;  %v1329_v54 = vld [vmem:[#allocation2 + $0x79] sm:$0xff]  ;;  %v5507_v53 = vsel %vm900_vm6, 1.0, %v7119_v18 }
 0x26f   : > { %v7824_v43 = vadd.f32 %v5883_v24, %v2210_v62  ;;  %v7092_v24 = vld [vmem:[%s7172_s8 + $0x8] sm:$0xff]  ;;  %v1344_v13 = vpack.c.bf16 %v1329_v54, %v1415_v15  ;;  %vm912_vm8 = vcmp.ne.s32.totalorder %v7095_v48, 100  ;;  %v1432_v60 = vpack.c.bf16 %v1417_v26, %v1329_v54  ;;  %v7104_v54 = vld [vmem:[%s7172_s8 + $0x80] sm:$0xff] }
 0x270   : > { %6555 = vmatpush3.bf16.msra.mxu1 %v6878_v17  ;;  %6761 = vperm.xlu1 %6753, %v6760_v45   ;;  %v6775_v17 = vpack.i.bf16 %v5515_v39, %v5514_v37  ;;  %vm899_vm5 = vcmp.ne.s32.totalorder %v7092_v24, 100  ;;  %v7094_v45 = vld [vmem:[%s7172_s8 + $0x68] sm:$0xff]  ;;  %v7100_v39 = vld [vmem:[%s7172_s8 + $0x58] sm:$0xff]  ;;  %vm914_vm2 = vcmp.ne.s32.totalorder %v7104_v54, 100  ;;  %vm918_vm4 = vcmp.ne.s32.totalorder %v7106_v16, 100 }
 0x271   : > { %v5506_v28 = vsel %vm899_vm5, 1.0, %v7119_v18  ;;  %vm911_vm7 = vcmp.ne.s32.totalorder %v7094_v45, 100  ;;  %vm909_vm11 = vcmp.ne.s32.totalorder %v7100_v39, 100  ;;  %v7105_v24 = vld [vmem:[%s7172_s8 + $0x98] sm:$0xff]  ;;  %vm4600_vm5 = vcmask 1040384  }
 0x272   : > { %v6755_v40 = vpack.i.bf16 %v5507_v53, %v5506_v28  ;;  %v5518_v15 = vsel %vm911_vm7, 1.0, %v7119_v18  ;;  %vm917_vm3 = vcmp.ne.s32.totalorder %v7105_v24, 100  ;;  %v1423_v39 = vld [vmem:[#allocation2 + $0xb1] sm:$0xff]  ;;  %v1448_v16 = vld [vmem:[#allocation2 + $0x1a] sm:$0xff]  ;;  %vm5357_vm6 = vcmask 1041408  }
 0x273   : > { %v5802_v4 = vpop.f32.mrb[4].mxu1  ;;  %2479 = vmatmul.mubr.bf16.gmra.mrb[60].mxu1 %v1298_v57  ;;  %v5524_v32 = vsel %vm917_vm3, 1.0, %v7119_v18 }
 0x274   : > { %v5803_v22 = vpop.f32.mrb[5].mxu1  ;;  %2486 = vmatprep.mubr.bf16.mxu1 %v1343_v19  ;;  %6766 = vperm.xlu1 %6753, %v6765_v61   ;;  %v5519_v19 = vsel %vm912_vm8, 1.0, %v7119_v18 }
 0x275   : > { %v5804_v23 = vadd.f32 %v5803_v22, %v5802_v4  ;;  %v5805_v41 = vpop.f32.mrb[6].mxu1  ;;  %v5884_v42 = vpop.f32.mrb[48].mxu0  ;;  %2600 = vmatmul.mubr.bf16.gmra.mrb[104].mxu0 %v7690_v9  ;;  %6756 = vperm.xlu0 %6754, %v6755_v40   ;;  %v6785_v7 = vpack.i.bf16 %v5519_v19, %v5518_v15  ;;  %v5512_v4 = vsel %vm905_vm9, 1.0, %v7119_v18  ;;  %v7098_v22 = vld [vmem:[%s7172_s8 + $0x88] sm:$0xff] }
 0x276   : > { %v5806_v5 = vpop.f32.mrb[7].mxu1  ;;  %v5885_v55 = vpop.f32.mrb[49].mxu0  ;;  %2607 = vmatprep.mubr.bf16.mxu0 %v1431_v33  ;;  %vm915_vm12 = vcmp.ne.s32.totalorder %v7098_v22, 100  ;;  %v1421_v15 = vld [vmem:[#allocation2 + $0xa1] sm:$0xff] }
 0x277   : > { %v2215_v57 = vadd.f32 %v5804_v23, %v7801_v20  ;;  %v5807_v46 = vadd.f32 %v5806_v5, %v5805_v41  ;;  %v5886_v50 = vadd.f32 %v5885_v55, %v5884_v42  ;;  %v5887_v52 = vpop.f32.mrb[50].mxu0  ;;  %v5522_v33 = vsel %vm915_vm12, 1.0, %v7119_v18  ;;  %v7101_v23 = vld [vmem:[%s7172_s8 + $0x60] sm:$0xff]  ;;  %v1419_v41 = vld [vmem:[#allocation2 + $0x91] sm:$0xff] }
 0x278   : > { %v5888_v62 = vpop.f32.mrb[51].mxu0  ;;  %6776 = vperm.xlu1 %6753, %v6775_v17   ;;  %vm910_vm14 = vcmp.ne.s32.totalorder %v7101_v23, 100  ;;  %v5516_v5 = vsel %vm909_vm11, 1.0, %v7119_v18 }
 0x279   : > { %v2218_v9 = vadd.f32 %v5807_v46, %v7801_v20  ;;  %v7843_v27 = vadd.f32 %v5886_v50, %v2215_v57  ;;  %v5889_v30 = vadd.f32 %v5888_v62, %v5887_v52  ;;  %v5517_v55 = vsel %vm910_vm14, 1.0, %v7119_v18  ;;  %v7102_v57 = vld [vmem:[%s7172_s8 + $0xa8] sm:$0xff]  ;;  %v7103_v52 = vld [vmem:[%s7172_s8 + $0x78] sm:$0xff] }
 0x27a   : > { %vm919_vm15 = vcmp.ne.s32.totalorder %v7102_v57, 100  ;;  %v1345_v46 = vpack.c.bf16 %v1331_v63, %v1417_v26  ;;  %v6780_v50 = vpack.i.bf16 %v5517_v55, %v5516_v5  ;;  %vm913_vm1 = vcmp.ne.s32.totalorder %v7103_v52, 100 }
 0x27b   : > { %v7847_v14 = vadd.f32 %v5889_v30, %v2218_v9  ;;  %2487 = vmatmul.mubr.bf16.gmra.mrb[64].mxu1 %v1299_v12  ;;  %v7097_v12 = vld [vmem:[%s7172_s8 + $0x40] sm:$0xff]  ;;  %v5520_v17 = vsel %vm913_vm1, 1.0, %v7119_v18  ;;  %v5521_v62 = vsel %vm914_vm2, 1.0, %v7119_v18  ;;  %v1433_v9 = vpack.c.bf16 %v1419_v41, %v1331_v63 }
 0x27c   : > { %2494 = vmatprep.mubr.bf16.mxu1 %v1344_v13  ;;  %vm906_vm10 = vcmp.ne.s32.totalorder %v7097_v12, 100  ;;  %6786 = vperm.xlu1 %6753, %v6785_v7   ;;  %v5526_v30 = vsel %vm919_vm15, 1.0, %v7119_v18  ;;  %v6790_v26 = vpack.i.bf16 %v5521_v62, %v5520_v17  ;;  %v1333_v13 = vld [vmem:[#allocation2 + $0x99] sm:$0xff] }
 0x27d   : > { %2608 = vmatmul.mubr.bf16.gmra.mrb[108].mxu0 %v7703_v31  ;;  %v5513_v61 = vsel %vm906_vm10, 1.0, %v7119_v18  ;;  %v7099_v31 = vld [vmem:[%s7172_s8 + $0x90] sm:$0xff] }
 0x27e   : > { %2615 = vmatprep.mubr.bf16.mxu0 %v1432_v60  ;;  %v6770_v21 = vpack.i.bf16 %v5513_v61, %v5512_v4  ;;  %vm916_vm13 = vcmp.ne.s32.totalorder %v7099_v31, 100  ;;  %v1346_v4 = vpack.c.bf16 %v1333_v13, %v1419_v41  ;;  %v1434_v31 = vpack.c.bf16 %v1421_v15, %v1333_v13  ;;  %v1425_v41 = vld [vmem:[#allocation2 + $0xc1] sm:$0xff] }
 0x27f   : > { %v5523_v37 = vsel %vm916_vm13, 1.0, %v7119_v18  ;;  %v1436_v3 = vpack.c.bf16 %v1425_v41, %v1337_v49 }
 0x280   : > { %6771 = vperm.xlu0 %6754, %v6770_v21   ;;  %v6795_v42 = vpack.i.bf16 %v5523_v37, %v5522_v33  ;;  %v1335_v37 = vld [vmem:[#allocation2 + $0xa9] sm:$0xff] }
 0x281   : > { %v1347_v23 = vpack.c.bf16 %v1335_v37, %v1421_v15  ;;  %v1435_v44 = vpack.c.bf16 %v1423_v39, %v1335_v37 }
 0x282   : > { %6796 = vperm.xlu1 %6753, %v6795_v42   ;;  %v1348_v42 = vpack.c.bf16 %v1337_v49, %v1423_v39  ;;  %v1454_v39 = vld [vmem:[#allocation2 + $0x4a] sm:$0xff] }
 0x283   : > { %2495 = vmatmul.mubr.bf16.gmra.mrb[68].mxu1 %v1300_v34  ;;  %v5525_v34 = vsel %vm918_vm4, 1.0, %v7119_v18 }
 0x284   : > { %2502 = vmatprep.mubr.bf16.mxu1 %v1345_v46  ;;  %6781 = vperm.xlu0 %6754, %v6780_v50   ;;  %v6800_v19 = vpack.i.bf16 %v5525_v34, %v5524_v32 }
 0x285   : > { %2616 = vmatmul.mubr.bf16.gmra.mrb[112].mxu0 %v7716_v47 }
 0x286   : > { %v5808_v25 = vpop.f32.mrb[8].mxu1  ;;  %2623 = vmatprep.mubr.bf16.mxu0 %v1433_v9  ;;  %1071 = vperm.xlu1 %6753, %v5526_v30  }
 0x287   : > { %v5809_v28 = vpop.f32.mrb[9].mxu1 }
 0x288   : > { %v5810_v53 = vadd.f32 %v5809_v28, %v5808_v25  ;;  %v5811_v40 = vpop.f32.mrb[10].mxu1  ;;  %v5890_v45 = vpop.f32.mrb[52].mxu0  ;;  %6791 = vperm.xlu0 %6754, %v6790_v26  }
 0x289   : > { %v5812_v48 = vpop.f32.mrb[11].mxu1  ;;  %v5891_v60 = vpop.f32.mrb[53].mxu0 }
 0x28a   : > { %v2223_v47 = vadd.f32 %v5810_v53, %v7801_v20  ;;  %v5813_v7 = vadd.f32 %v5812_v48, %v5811_v40  ;;  %v5892_v10 = vadd.f32 %v5891_v60, %v5890_v45  ;;  %v5893_v12 = vpop.f32.mrb[54].mxu0  ;;  %v1450_v45 = vld [vmem:[#allocation2 + $0x2a] sm:$0xff] }
 0x28b   : > { %v5894_v61 = vpop.f32.mrb[55].mxu0  ;;  %2503 = vmatmul.mubr.bf16.gmra.mrb[72].mxu1 %v1301_v51  ;;  %v1471_v60 = vpack.c.bf16 %v1451_v56, %v1450_v45 }
 0x28c   : > { %v2226_v63 = vadd.f32 %v5813_v7, %v7801_v20  ;;  %v7889_v21 = vadd.f32 %v5892_v10, %v2223_v47  ;;  %v5895_v22 = vadd.f32 %v5894_v61, %v5893_v12  ;;  %2510 = vmatprep.mubr.bf16.mxu1 %v1346_v4  ;;  %6801 = vperm.xlu0 %6754, %v6800_v19   ;;  %v1453_v10 = vld [vmem:[#allocation2 + $0x42] sm:$0xff]  ;;  %v1452_v12 = vld [vmem:[#allocation2 + $0x3a] sm:$0xff] }
 0x28d   : > { %2624 = vmatmul.mubr.bf16.gmra.mrb[116].mxu0 %v7729_v2  ;;  %v1472_v4 = vpack.c.bf16 %v1453_v10, %v1452_v12  ;;  %v6879_v61 = vld [vmem:[%s9064_s2 + $0x280] sm:$0xff]  }
 0x28e   : > { %v7892_v33 = vadd.f32 %v5895_v22, %v2226_v63  ;;  %2631 = vmatprep.mubr.bf16.mxu0 %v1434_v31  ;;  %v6880_v63 = vld [vmem:[%s9064_s2 + $0x240] sm:$0xff]   ;;  %6127 = vmatprep.subr.bf16.mxu0 %v6879_v61  ;;  %v1455_v22 = vld [vmem:[#allocation2 + $0x52] sm:$0xff] }
 0x28f   : > { %6128 = vmatpush3.bf16.msra.mxu0 %v6880_v63  ;;  %v6886_v61 = vld [vmem:[%s9064_s2 + $0x258] sm:$0xff]  }
 0x290   : > { %v1463_v63 = vld [vmem:[#allocation2 + $0x92] sm:$0xff] }
 0x293   : > { %2511 = vmatmul.mubr.bf16.gmra.mrb[76].mxu1 %v1302_v11 }
 0x294   : > { %2518 = vmatprep.mubr.bf16.mxu1 %v1347_v23 }
 0x295   : > { %2632 = vmatmul.mubr.bf16.gmra.mrb[120].mxu0 %v7742_v35 }
 0x296   : > { %2639 = vmatprep.mubr.bf16.mxu0 %v1435_v44 }
 0x299   : > { %v5814_v51 = vpop.f32.mrb[12].mxu1 }
 0x29a   : > { %v5815_v2 = vpop.f32.mrb[13].mxu1 }
 0x29b   : > { %v5816_v5 = vadd.f32 %v5815_v2, %v5814_v51  ;;  %v5817_v55 = vpop.f32.mrb[14].mxu1  ;;  %v5896_v57 = vpop.f32.mrb[56].mxu0  ;;  %2519 = vmatmul.mubr.bf16.gmra.mrb[80].mxu1 %v1303_v38  ;;  %v1392_v38 = vpack.c.bf16 %v1381_v29, %v7757_v59  ;;  %v1473_v51 = vpack.c.bf16 %v1455_v22, %v1454_v39  ;;  %v6883_v29 = vld [vmem:[%s9064_s2 + $0x290] sm:$0xff]   ;;  %v6888_v39 = vld [vmem:[%s9064_s2 + $0x260] sm:$0xff]  }
 0x29c   : > { %v5818_v46 = vpop.f32.mrb[15].mxu1  ;;  %v5897_v0 = vpop.f32.mrb[57].mxu0  ;;  %2526 = vmatprep.mubr.bf16.mxu1 %v1348_v42  ;;  %v1462_v22 = vld [vmem:[#allocation2 + $0x8a] sm:$0xff] }
 0x29d   : > { %v2231_v11 = vadd.f32 %v5816_v5, %v7801_v20  ;;  %v5819_v35 = vadd.f32 %v5818_v46, %v5817_v55  ;;  %v5898_v50 = vadd.f32 %v5897_v0, %v5896_v57  ;;  %v5899_v52 = vpop.f32.mrb[58].mxu0  ;;  %2640 = vmatmul.mubr.bf16.gmra.mrb[124].mxu0 %v7755_v58  ;;  %v1449_v58 = vld [vmem:[#allocation2 + $0x22] sm:$0xff] }
 0x29e   : > { %v5900_v54 = vpop.f32.mrb[59].mxu0  ;;  %2647 = vmatprep.mubr.bf16.mxu0 %v1436_v3  ;;  %v1470_v9 = vpack.c.bf16 %v1449_v58, %v1448_v16  ;;  %v6881_v0 = vld [vmem:[%s9064_s2 + $0x288] sm:$0xff]   ;;  %v6884_v58 = vld [vmem:[%s9064_s2 + $0x250] sm:$0xff]  }
 0x29f   : > { %v2234_v17 = vadd.f32 %v5819_v35, %v7801_v20  ;;  %v7904_v62 = vadd.f32 %v5898_v50, %v2231_v11  ;;  %v5901_v24 = vadd.f32 %v5900_v54, %v5899_v52  ;;  %v6882_v3 = vld [vmem:[%s9064_s2 + $0x248] sm:$0xff]   ;;  %6129 = vmatprep.subr.bf16.mxu0 %v6881_v0 }
 0x2a0   : > { %v1457_v52 = vld [vmem:[#allocation2 + $0x62] sm:$0xff]  ;;  %6130 = vmatpush3.bf16.msra.mxu0 %v6882_v3  ;;  %v1458_v16 = vld [vmem:[#allocation2 + $0x6a] sm:$0xff] }
 0x2a1   : > { %v7906_v36 = vadd.f32 %v5901_v24, %v2234_v17  ;;  %v1456_v17 = vld [vmem:[#allocation2 + $0x5a] sm:$0xff]  ;;  %6131 = vmatprep.subr.bf16.mxu0 %v6883_v29 }
 0x2a2   : > { %v1474_v24 = vpack.c.bf16 %v1457_v52, %v1456_v17 }
 0x2a3   : > { %2527 = vmatmul.mubr.bf16.gmra.mrb[84].mxu1 %v1304_v1 }
 0x2a4   : > { %6556 = vmatprep.mubr.msk.bf16.mxu1 %vm7120_vm0, %v7119_v18  ;;  %6132 = vmatpush3.bf16.msra.mxu0 %v6884_v58  ;;  %v6889_v58 = vld [vmem:[%s9064_s2 + $0x2a8] sm:$0xff]  }
 0x2a5   : > { %2648 = vmatmul.mubr.bf16.gmra.mrb[128].mxu0 %v1392_v38  ;;  %v1459_v38 = vld [vmem:[#allocation2 + $0x72] sm:$0xff] }
 0x2ab   : > { %6557 = vmatmul.mubr.bf16.vlgmr.msra.gmra.mrb[88].mxu1 %v1470_v9  ;;  %v1475_v9 = vpack.c.bf16 %v1459_v38, %v1458_v16  ;;  %v1467_v38 = vld [vmem:[#allocation2 + $0xb2] sm:$0xff]  ;;  %v1466_v16 = vld [vmem:[#allocation2 + $0xaa] sm:$0xff] }
 0x2ac   : > { %v5820_v30 = vpop.f32.mrb[16].mxu1  ;;  %6560 = vmatprep.mubr.msk.bf16.mxu1 %vm7120_vm0, %v7119_v18 }
 0x2ad   : > { %v5821_v26 = vpop.f32.mrb[17].mxu1 }
 0x2ae   : > { %v5822_v25 = vadd.f32 %v5821_v26, %v5820_v30  ;;  %v5823_v32 = vpop.f32.mrb[18].mxu1  ;;  %v5902_v34 = vpop.f32.mrb[60].mxu0 }
 0x2af   : > { %v5824_v1 = vpop.f32.mrb[19].mxu1  ;;  %v5903_v28 = vpop.f32.mrb[61].mxu0 }
 0x2b0   : > { %v2239_v59 = vadd.f32 %v5822_v25, %v7801_v20  ;;  %v5825_v13 = vadd.f32 %v5824_v1, %v5823_v32  ;;  %v5904_v53 = vadd.f32 %v5903_v28, %v5902_v34  ;;  %v5905_v40 = vpop.f32.mrb[62].mxu0 }
 0x2b1   : > { %v5906_v48 = vpop.f32.mrb[63].mxu0 }
 0x2b2   : > { %v2242_v15 = vadd.f32 %v5825_v13, %v7801_v20  ;;  %v7918_v19 = vadd.f32 %v5904_v53, %v2239_v59  ;;  %v5907_v47 = vadd.f32 %v5906_v48, %v5905_v40  ;;  %v1461_v40 = vld [vmem:[#allocation2 + $0x82] sm:$0xff] }
 0x2b3   : > { %6561 = vmatmul.mubr.bf16.gmra.mrb[92].mxu1 %v1471_v60 }
 0x2b4   : > { %v7920_v7 = vadd.f32 %v5907_v47, %v2242_v15  ;;  %6564 = vmatprep.mubr.msk.bf16.mxu1 %vm7120_vm0, %v7119_v18  ;;  %v1460_v47 = vld [vmem:[#allocation2 + $0x7a] sm:$0xff] }
 0x2b5   : > { %v1476_v10 = vpack.c.bf16 %v1461_v40, %v1460_v47 }
 0x2bb   : > { %6565 = vmatmul.mubr.bf16.gmra.mrb[96].mxu1 %v1472_v4  ;;  %v6885_v4 = vld [vmem:[%s9064_s2 + $0x298] sm:$0xff]  }
 0x2bc   : > { %6568 = vmatprep.mubr.msk.bf16.mxu1 %vm7120_vm0, %v7119_v18  ;;  %6133 = vmatprep.subr.bf16.mxu0 %v6885_v4 }
 0x2bd   : > { %6134 = vmatpush3.bf16.msra.mxu0 %v6886_v61 }
 0x2bf   : > { %v5826_v31 = vpop.f32.mrb[20].mxu1 }
 0x2c0   : > { %v5827_v37 = vpop.f32.mrb[21].mxu1 }
 0x2c1   : > { %v5828_v23 = vadd.f32 %v5827_v37, %v5826_v31  ;;  %v5829_v44 = vpop.f32.mrb[22].mxu1  ;;  %v5908_v49 = vpop.f32.mrb[64].mxu0  ;;  %v1477_v31 = vpack.c.bf16 %v1463_v63, %v1462_v22  ;;  %v6887_v37 = vld [vmem:[%s9064_s2 + $0x2a0] sm:$0xff]   ;;  %v6895_v63 = vld [vmem:[%s9064_s2 + $0x2b0] sm:$0xff]  }
 0x2c2   : > { %v5830_v41 = vpop.f32.mrb[23].mxu1  ;;  %v5909_v2 = vpop.f32.mrb[65].mxu0  ;;  %6135 = vmatprep.subr.bf16.mxu0 %v6887_v37  ;;  %v6896_v22 = vld [vmem:[%s9064_s2 + $0x270] sm:$0xff]  }
 0x2c3   : > { %v2247_v42 = vadd.f32 %v5828_v23, %v7801_v20  ;;  %v5831_v5 = vadd.f32 %v5830_v41, %v5829_v44  ;;  %v5910_v55 = vadd.f32 %v5909_v2, %v5908_v49  ;;  %v5911_v57 = vpop.f32.mrb[66].mxu0  ;;  %6569 = vmatmul.mubr.bf16.gmra.mrb[100].mxu1 %v1473_v51  ;;  %v1465_v49 = vld [vmem:[#allocation2 + $0xa2] sm:$0xff]  ;;  %6136 = vmatpush3.bf16.msra.mxu0 %v6888_v39  ;;  %v6898_v39 = vld [vmem:[%s9064_s2 + $0x2d0] sm:$0xff]  }
 0x2c4   : > { %v5912_v46 = vpop.f32.mrb[67].mxu0  ;;  %6572 = vmatprep.mubr.msk.bf16.mxu1 %vm7120_vm0, %v7119_v18  ;;  %6137 = vmatprep.subr.bf16.mxu0 %v6889_v58  ;;  %v6908_v58 = vld [vmem:[%s9064_s2 + $0x2f0] sm:$0xff]  }
 0x2c5   : > { %v2250_v11 = vadd.f32 %v5831_v5, %v7801_v20  ;;  %v7942_v35 = vadd.f32 %v5910_v55, %v2247_v42  ;;  %v5913_v50 = vadd.f32 %v5912_v46, %v5911_v57  ;;  %v1464_v55 = vld [vmem:[#allocation2 + $0x9a] sm:$0xff] }
 0x2c7   : > { %v7944_v54 = vadd.f32 %v5913_v50, %v2250_v11  ;;  %v1478_v11 = vpack.c.bf16 %v1465_v49, %v1464_v55  ;;  %v6903_v55 = vld [vmem:[%s9064_s2 + $0x2b8] sm:$0xff]  }
 0x2cb   : > { %6573 = vmatmul.mubr.bf16.gmra.mrb[104].mxu1 %v1474_v24 }
 0x2cc   : > { %6576 = vmatprep.mubr.msk.bf16.mxu1 %vm7120_vm0, %v7119_v18 }
 0x2d2   : > { %v5832_v30 = vpop.f32.mrb[24].mxu1 }
 0x2d3   : > { %v5833_v26 = vpop.f32.mrb[25].mxu1  ;;  %6577 = vmatmul.mubr.bf16.gmra.mrb[108].mxu1 %v1475_v9  ;;  %v1479_v9 = vpack.c.bf16 %v1467_v38, %v1466_v16 }
 0x2d4   : > { %v5834_v25 = vadd.f32 %v5833_v26, %v5832_v30  ;;  %v5835_v32 = vpop.f32.mrb[26].mxu1  ;;  %v5914_v34 = vpop.f32.mrb[68].mxu0  ;;  %6580 = vmatprep.mubr.msk.bf16.mxu1 %vm7120_vm0, %v7119_v18  ;;  %v6890_v30 = vld [vmem:[%s9064_s2 + $0x268] sm:$0xff]   ;;  %v6891_v26 = vld [vmem:[%s9064_s2 + $0x300] sm:$0xff]  }
 0x2d5   : > { %v5836_v56 = vpop.f32.mrb[27].mxu1  ;;  %v5915_v1 = vpop.f32.mrb[69].mxu0  ;;  %6138 = vmatpush3.bf16.msra.mxu0 %v6890_v30  ;;  %6209 = vmatprep.subr.bf16.mxu1 %v6891_v26 }
 0x2d6   : > { %v2255_v28 = vadd.f32 %v5834_v25, %v7801_v20  ;;  %v5837_v59 = vadd.f32 %v5836_v56, %v5835_v32  ;;  %v5916_v13 = vadd.f32 %v5915_v1, %v5914_v34  ;;  %v5917_v53 = vpop.f32.mrb[70].mxu0  ;;  %v6892_v25 = vld [vmem:[%s9064_s2 + $0x2c0] sm:$0xff]   ;;  %v6893_v56 = vld [vmem:[%s9064_s2 + $0x308] sm:$0xff]   ;;  %6139 = vmatprep.subr.bf16.mxu0 %v6895_v63 }
 0x2d7   : > { %v5918_v45 = vpop.f32.mrb[71].mxu0  ;;  %v1468_v32 = vld [vmem:[#allocation2 + $0xba] sm:$0xff]  ;;  %v1469_v34 = vld [vmem:[#allocation2 + $0xc2] sm:$0xff]  ;;  %6210 = vmatpush3.bf16.msra.mxu1 %v6892_v25 }
 0x2d8   : > { %v2258_v48 = vadd.f32 %v5837_v59, %v7801_v20  ;;  %v7958_v60 = vadd.f32 %v5916_v13, %v2255_v28  ;;  %v5919_v15 = vadd.f32 %v5918_v45, %v5917_v53  ;;  %6211 = vmatprep.subr.bf16.mxu1 %v6893_v56  ;;  %v1480_v59 = vpack.c.bf16 %v1469_v34, %v1468_v32  ;;  %v6894_v13 = vld [vmem:[%s9064_s2 + $0x2c8] sm:$0xff]   ;;  %v6909_v56 = vld [vmem:[%s9064_s2 + $0x338] sm:$0xff]  }
 0x2d9   : > { %6140 = vmatpush3.bf16.msra.mxu0 %v6896_v22 }
 0x2da   : > { %v7960_v12 = vadd.f32 %v5919_v15, %v2258_v48  ;;  %6141 = vmatprep.subr.bf16.mxu0 %v6903_v55 }
 0x2db   : > { %6581 = vmatmul.mubr.bf16.gmra.mrb[112].mxu1 %v1476_v10 }
 0x2dc   : > { %6584 = vmatprep.mubr.msk.bf16.mxu1 %vm7120_vm0, %v7119_v18  ;;  %6212 = vmatpush3.bf16.msra.mxu1 %v6894_v13  ;;  %v6910_v13 = vld [vmem:[%s9064_s2 + $0x2f8] sm:$0xff]  }
 0x2e3   : > { %6585 = vmatmul.mubr.bf16.gmra.mrb[116].mxu1 %v1477_v31  ;;  %v6897_v31 = vld [vmem:[%s9064_s2 + $0x310] sm:$0xff]  }
 0x2e4   : > { %6588 = vmatprep.mubr.msk.bf16.mxu1 %vm7120_vm0, %v7119_v18  ;;  %6213 = vmatprep.subr.bf16.mxu1 %v6897_v31 }
 0x2e5   : > { %v5838_v23 = vpop.f32.mrb[28].mxu1  ;;  %6214 = vmatpush3.bf16.msra.mxu1 %v6898_v39 }
 0x2e6   : > { %v5839_v44 = vpop.f32.mrb[29].mxu1 }
 0x2e7   : > { %v5840_v51 = vadd.f32 %v5839_v44, %v5838_v23  ;;  %v5841_v41 = vpop.f32.mrb[30].mxu1  ;;  %v5920_v2 = vpop.f32.mrb[72].mxu0 }
 0x2e8   : > { %v5842_v42 = vpop.f32.mrb[31].mxu1  ;;  %v5921_v5 = vpop.f32.mrb[73].mxu0 }
 0x2e9   : > { %v2263_v57 = vadd.f32 %v5840_v51, %v7801_v20  ;;  %v5843_v46 = vadd.f32 %v5842_v42, %v5841_v41  ;;  %v5922_v0 = vadd.f32 %v5921_v5, %v5920_v2  ;;  %v5923_v3 = vpop.f32.mrb[74].mxu0  ;;  %v6899_v41 = vld [vmem:[%s9064_s2 + $0x318] sm:$0xff]   ;;  %v6901_v42 = vld [vmem:[%s9064_s2 + $0x320] sm:$0xff]  }
 0x2ea   : > { %v5924_v50 = vpop.f32.mrb[75].mxu0  ;;  %v6900_v2 = vld [vmem:[%s9064_s2 + $0x2d8] sm:$0xff]   ;;  %6215 = vmatprep.subr.bf16.mxu1 %v6899_v41  ;;  %v6902_v5 = vld [vmem:[%s9064_s2 + $0x2e0] sm:$0xff]  }
 0x2eb   : > { %v2266_v52 = vadd.f32 %v5843_v46, %v7801_v20  ;;  %v7980_v17 = vadd.f32 %v5922_v0, %v2263_v57  ;;  %v5925_v24 = vadd.f32 %v5924_v50, %v5923_v3  ;;  %6589 = vmatmul.mubr.bf16.gmra.mrb[120].mxu1 %v1478_v11  ;;  %v6904_v57 = vld [vmem:[%s9064_s2 + $0x278] sm:$0xff]   ;;  %v6905_v46 = vld [vmem:[%s9064_s2 + $0x328] sm:$0xff]   ;;  %v6907_v50 = vld [vmem:[%s9064_s2 + $0x330] sm:$0xff]  }
 0x2ec   : > { %6592 = vmatprep.mubr.msk.bf16.mxu1 %vm7120_vm0, %v7119_v18  ;;  %6216 = vmatpush3.bf16.msra.mxu1 %v6900_v2  ;;  %v6906_v0 = vld [vmem:[%s9064_s2 + $0x2e8] sm:$0xff]  }
 0x2ed   : > { %v7984_v29 = vadd.f32 %v5925_v24, %v2266_v52  ;;  %6217 = vmatprep.subr.bf16.mxu1 %v6901_v42  ;;  %6142 = vmatpush3.bf16.msra.mxu0 %v6904_v57 }
 0x2f0   : > { %6218 = vmatpush3.bf16.msra.mxu1 %v6902_v5 }
 0x2f1   : > { %6219 = vmatprep.subr.bf16.mxu1 %v6905_v46 }
 0x2f3   : > { %6593 = vmatmul.mubr.bf16.gmra.mrb[124].mxu1 %v1479_v9 }
 0x2f4   : > { %6596 = vmatprep.mubr.msk.bf16.mxu1 %vm7120_vm0, %v7119_v18  ;;  %6220 = vmatpush3.bf16.msra.mxu1 %v6906_v0 }
 0x2f5   : > { %6221 = vmatprep.subr.bf16.mxu1 %v6907_v50 }
 0x2f8   : > { %v5844_v1 = vpop.f32.mrb[32].mxu1  ;;  %6222 = vmatpush3.bf16.msra.mxu1 %v6908_v58 }
 0x2f9   : > { %v5845_v28 = vpop.f32.mrb[33].mxu1  ;;  %6223 = vmatprep.subr.bf16.mxu1 %v6909_v56 }
 0x2fa   : > { %v5846_v53 = vadd.f32 %v5845_v28, %v5844_v1  ;;  %v5847_v40 = vpop.f32.mrb[34].mxu1  ;;  %v5926_v45 = vpop.f32.mrb[76].mxu0 }
 0x2fb   : > { %v5848_v48 = vpop.f32.mrb[35].mxu1  ;;  %v5927_v15 = vpop.f32.mrb[77].mxu0  ;;  %6597 = vmatmul.mubr.bf16.gmra.mrb[128].mxu1 %v1480_v59 }
 0x2fc   : > { %v2271_v47 = vadd.f32 %v5846_v53, %v7801_v20  ;;  %v5849_v10 = vadd.f32 %v5848_v48, %v5847_v40  ;;  %v5928_v4 = vadd.f32 %v5927_v15, %v5926_v45  ;;  %v5929_v61 = vpop.f32.mrb[78].mxu0  ;;  %6224 = vmatpush3.bf16.msra.mxu1 %v6910_v13  ;;  %v6911_v40 = vld [vmem:[%s9064_s2 + $0x380] sm:$0xff]  }
 0x2fd   : > { %v5930_v37 = vpop.f32.mrb[79].mxu0  ;;  %6291 = vmatprep.subr.bf16.mxu0 %v6911_v40 }
 0x2fe   : > { %v2274_v23 = vadd.f32 %v5849_v10, %v7801_v20  ;;  %v8020_v44 = vadd.f32 %v5928_v4, %v2271_v47  ;;  %v5931_v49 = vadd.f32 %v5930_v37, %v5929_v61 }
 0x300   : > { %v8022_v51 = vadd.f32 %v5931_v49, %v2274_v23 }
 0x30b   : > { %v5850_v3 = vpop.f32.mrb[36].mxu1 }
 0x30c   : > { %v5851_v11 = vpop.f32.mrb[37].mxu1 }
 0x30d   : > { %v5852_v52 = vadd.f32 %v5851_v11, %v5850_v3  ;;  %v5853_v24 = vpop.f32.mrb[38].mxu1  ;;  %v5932_v38 = vpop.f32.mrb[80].mxu0 }
 0x30e   : > { %v5854_v16 = vpop.f32.mrb[39].mxu1  ;;  %v5933_v9 = vpop.f32.mrb[81].mxu0 }
 0x30f   : > { %v2279_v30 = vadd.f32 %v5852_v52, %v7801_v20  ;;  %v5855_v26 = vadd.f32 %v5854_v16, %v5853_v24  ;;  %v5934_v25 = vadd.f32 %v5933_v9, %v5932_v38  ;;  %v5935_v32 = vpop.f32.mrb[82].mxu0 }
 0x310   : > { %v5936_v34 = vpop.f32.mrb[83].mxu0 }
 0x311   : > { %v2282_v1 = vadd.f32 %v5855_v26, %v7801_v20  ;;  %v8059_v28 = vadd.f32 %v5934_v25, %v2279_v30  ;;  %v5937_v59 = vadd.f32 %v5936_v34, %v5935_v32 }
 0x313   : > { %v8064_v53 = vadd.f32 %v5937_v59, %v2282_v1 }
 0x31e   : > { %v5856_v45 = vpop.f32.mrb[40].mxu1 }
 0x31f   : > { %v5857_v48 = vpop.f32.mrb[41].mxu1 }
 0x320   : > { %v5858_v15 = vadd.f32 %v5857_v48, %v5856_v45  ;;  %v5859_v47 = vpop.f32.mrb[42].mxu1  ;;  %v5938_v10 = vpop.f32.mrb[84].mxu0 }
 0x321   : > { %v5860_v4 = vpop.f32.mrb[43].mxu1  ;;  %v5939_v61 = vpop.f32.mrb[85].mxu0 }
 0x322   : > { %v2287_v63 = vadd.f32 %v5858_v15, %v7801_v20  ;;  %v5861_v22 = vadd.f32 %v5860_v4, %v5859_v47  ;;  %v5940_v31 = vadd.f32 %v5939_v61, %v5938_v10  ;;  %v5941_v37 = vpop.f32.mrb[86].mxu0 }
 0x323   : > { %v5942_v39 = vpop.f32.mrb[87].mxu0 }
 0x324   : > { %v2290_v23 = vadd.f32 %v5861_v22, %v7801_v20  ;;  %v8071_v49 = vadd.f32 %v5940_v31, %v2287_v63  ;;  %v5943_v41 = vadd.f32 %v5942_v39, %v5941_v37 }
 0x326   : > { %v8073_v2 = vadd.f32 %v5943_v41, %v2290_v23  ;;  %v5960_v42 = vpop.f32.mrb[44].mxu1 }
 0x327   : > { %v5961_v5 = vpop.f32.mrb[45].mxu1 }
 0x328   : > { %v5962_v55 = vadd.f32 %v5961_v5, %v5960_v42  ;;  %v5963_v57 = vpop.f32.mrb[46].mxu1  ;;  %v6042_v46 = vpop.f32.mrb[88].mxu0 }
 0x329   : > { %v5964_v0 = vpop.f32.mrb[47].mxu1  ;;  %v6043_v3 = vpop.f32.mrb[89].mxu0 }
 0x32a   : > { %v2449_v11 = vadd.f32 %v5962_v55, %v7815_v8  ;;  %v5965_v50 = vadd.f32 %v5964_v0, %v5963_v57  ;;  %v6044_v52 = vadd.f32 %v6043_v3, %v6042_v46  ;;  %v6045_v24 = vpop.f32.mrb[90].mxu0 }
 0x32b   : > { %v6046_v38 = vpop.f32.mrb[91].mxu0 }
 0x32c   : > { %v2452_v20 = vadd.f32 %v5965_v50, %v7824_v43  ;;  %v6047_v58 = vadd.f32 %v6046_v38, %v6045_v24  ;;  %v8077_v16 = vadd.f32 %v6044_v52, %v2449_v11 }
 0x32e   : > { %v5966_v9 = vpop.f32.mrb[48].mxu1  ;;  %v8079_v30 = vadd.f32 %v6047_v58, %v2452_v20 }
 0x32f   : > { %v5967_v26 = vpop.f32.mrb[49].mxu1 }
 0x330   : > { %v5968_v25 = vadd.f32 %v5967_v26, %v5966_v9  ;;  %v5969_v32 = vpop.f32.mrb[50].mxu1  ;;  %v6048_v34 = vpop.f32.mrb[92].mxu0 }
 0x331   : > { %v5970_v56 = vpop.f32.mrb[51].mxu1  ;;  %v6049_v1 = vpop.f32.mrb[93].mxu0 }
 0x332   : > { %v2457_v8 = vadd.f32 %v5968_v25, %v7843_v27  ;;  %v5971_v59 = vadd.f32 %v5970_v56, %v5969_v32  ;;  %v6050_v13 = vadd.f32 %v6049_v1, %v6048_v34  ;;  %v6051_v40 = vpop.f32.mrb[94].mxu0 }
 0x333   : > { %v6052_v45 = vpop.f32.mrb[95].mxu0 }
 0x334   : > { %v2460_v43 = vadd.f32 %v5971_v59, %v7847_v14  ;;  %v6053_v48 = vadd.f32 %v6052_v45, %v6051_v40  ;;  %v8083_v15 = vadd.f32 %v6050_v13, %v2457_v8 }
 0x336   : > { %v5972_v47 = vpop.f32.mrb[52].mxu1  ;;  %v8085_v10 = vadd.f32 %v6053_v48, %v2460_v43 }
 0x337   : > { %v5973_v4 = vpop.f32.mrb[53].mxu1 }
 0x338   : > { %v5974_v61 = vadd.f32 %v5973_v4, %v5972_v47  ;;  %v5975_v63 = vpop.f32.mrb[54].mxu1  ;;  %v6054_v22 = vpop.f32.mrb[96].mxu0 }
 0x339   : > { %v5976_v31 = vpop.f32.mrb[55].mxu1  ;;  %v6055_v37 = vpop.f32.mrb[97].mxu0 }
 0x33a   : > { %v2465_v27 = vadd.f32 %v5974_v61, %v7889_v21  ;;  %v5977_v39 = vadd.f32 %v5976_v31, %v5975_v63  ;;  %v6056_v23 = vadd.f32 %v6055_v37, %v6054_v22  ;;  %v6057_v41 = vpop.f32.mrb[98].mxu0  ;;  %v6923_v63 = vld [vmem:[%s9064_s2 + $0x400] sm:$0xff]  }
 0x33b   : > { %v6058_v42 = vpop.f32.mrb[99].mxu0  ;;  %6373 = vmatprep.subr.bf16.mxu1 %v6923_v63 }
 0x33c   : > { %v2468_v14 = vadd.f32 %v5977_v39, %v7892_v33  ;;  %v6059_v5 = vadd.f32 %v6058_v42, %v6057_v41  ;;  %v8089_v55 = vadd.f32 %v6056_v23, %v2465_v27 }
 0x33e   : > { %v5978_v57 = vpop.f32.mrb[56].mxu1  ;;  %v8091_v46 = vadd.f32 %v6059_v5, %v2468_v14 }
 0x33f   : > { %v5979_v0 = vpop.f32.mrb[57].mxu1 }
 0x340   : > { %v5980_v3 = vadd.f32 %v5979_v0, %v5978_v57  ;;  %v5981_v11 = vpop.f32.mrb[58].mxu1  ;;  %v6060_v50 = vpop.f32.mrb[100].mxu0 }
 0x341   : > { %v5982_v52 = vpop.f32.mrb[59].mxu1  ;;  %v6061_v24 = vpop.f32.mrb[101].mxu0 }
 0x342   : > { %v2473_v21 = vadd.f32 %v5980_v3, %v7904_v62  ;;  %v5983_v38 = vadd.f32 %v5982_v52, %v5981_v11  ;;  %v6062_v20 = vadd.f32 %v6061_v24, %v6060_v50  ;;  %v6063_v58 = vpop.f32.mrb[102].mxu0 }
 0x343   : > { %v6064_v9 = vpop.f32.mrb[103].mxu0 }
 0x344   : > { %v2476_v33 = vadd.f32 %v5983_v38, %v7906_v36  ;;  %v6065_v26 = vadd.f32 %v6064_v9, %v6063_v58  ;;  %v8095_v25 = vadd.f32 %v6062_v20, %v2473_v21 }
 0x346   : > { %v5984_v32 = vpop.f32.mrb[60].mxu1  ;;  %v8097_v34 = vadd.f32 %v6065_v26, %v2476_v33 }
 0x347   : > { %v5985_v56 = vpop.f32.mrb[61].mxu1 }
 0x348   : > { %v5986_v1 = vadd.f32 %v5985_v56, %v5984_v32  ;;  %v5987_v8 = vpop.f32.mrb[62].mxu1  ;;  %v6066_v59 = vpop.f32.mrb[104].mxu0 }
 0x349   : > { %v5988_v13 = vpop.f32.mrb[63].mxu1  ;;  %v6067_v40 = vpop.f32.mrb[105].mxu0 }
 0x34a   : > { %v2481_v62 = vadd.f32 %v5986_v1, %v7918_v19  ;;  %v5989_v45 = vadd.f32 %v5988_v13, %v5987_v8  ;;  %v6068_v43 = vadd.f32 %v6067_v40, %v6066_v59  ;;  %v6069_v48 = vpop.f32.mrb[106].mxu0 }
 0x34b   : > { %v6070_v47 = vpop.f32.mrb[107].mxu0 }
 0x34c   : > { %v2484_v36 = vadd.f32 %v5989_v45, %v7920_v7  ;;  %v6071_v4 = vadd.f32 %v6070_v47, %v6069_v48  ;;  %v8101_v61 = vadd.f32 %v6068_v43, %v2481_v62 }
 0x34e   : > { %v5990_v22 = vpop.f32.mrb[64].mxu1  ;;  %v8106_v31 = vadd.f32 %v6071_v4, %v2484_v36 }
 0x34f   : > { %v5991_v37 = vpop.f32.mrb[65].mxu1 }
 0x350   : > { %v5992_v27 = vadd.f32 %v5991_v37, %v5990_v22  ;;  %v5993_v19 = vpop.f32.mrb[66].mxu1  ;;  %v6072_v39 = vpop.f32.mrb[108].mxu0 }
 0x351   : > { %v5994_v23 = vpop.f32.mrb[67].mxu1  ;;  %v6073_v41 = vpop.f32.mrb[109].mxu0 }
 0x352   : > { %v2489_v42 = vadd.f32 %v5992_v27, %v7942_v35  ;;  %v5995_v7 = vadd.f32 %v5994_v23, %v5993_v19  ;;  %v6074_v14 = vadd.f32 %v6073_v41, %v6072_v39  ;;  %v6075_v5 = vpop.f32.mrb[110].mxu0 }
 0x353   : > { %v6076_v57 = vpop.f32.mrb[111].mxu0 }
 0x354   : > { %v2492_v0 = vadd.f32 %v5995_v7, %v7944_v54  ;;  %v6077_v3 = vadd.f32 %v6076_v57, %v6075_v5  ;;  %v8110_v11 = vadd.f32 %v6074_v14, %v2489_v42 }
 0x356   : > { %v5996_v50 = vpop.f32.mrb[68].mxu1  ;;  %v8112_v52 = vadd.f32 %v6077_v3, %v2492_v0 }
 0x357   : > { %v5997_v24 = vpop.f32.mrb[69].mxu1 }
 0x358   : > { %v5998_v21 = vadd.f32 %v5997_v24, %v5996_v50  ;;  %v5999_v38 = vpop.f32.mrb[70].mxu1  ;;  %v6078_v20 = vpop.f32.mrb[112].mxu0 }
 0x359   : > { %v6000_v58 = vpop.f32.mrb[71].mxu1  ;;  %v6079_v9 = vpop.f32.mrb[113].mxu0 }
 0x35a   : > { %v2497_v35 = vadd.f32 %v5998_v21, %v7958_v60  ;;  %v6001_v33 = vadd.f32 %v6000_v58, %v5999_v38  ;;  %v6080_v26 = vadd.f32 %v6079_v9, %v6078_v20  ;;  %v6081_v32 = vpop.f32.mrb[114].mxu0 }
 0x35b   : > { %v6082_v56 = vpop.f32.mrb[115].mxu0 }
 0x35c   : > { %v2500_v54 = vadd.f32 %v6001_v33, %v7960_v12  ;;  %v6083_v1 = vadd.f32 %v6082_v56, %v6081_v32  ;;  %v8116_v8 = vadd.f32 %v6080_v26, %v2497_v35 }
 0x35e   : > { %v6002_v59 = vpop.f32.mrb[72].mxu1  ;;  %v8118_v13 = vadd.f32 %v6083_v1, %v2500_v54 }
 0x35f   : > { %v6003_v40 = vpop.f32.mrb[73].mxu1 }
 0x360   : > { %v6004_v62 = vadd.f32 %v6003_v40, %v6002_v59  ;;  %v6005_v45 = vpop.f32.mrb[74].mxu1  ;;  %v6084_v43 = vpop.f32.mrb[116].mxu0 }
 0x361   : > { %v6006_v48 = vpop.f32.mrb[75].mxu1  ;;  %v6085_v47 = vpop.f32.mrb[117].mxu0 }
 0x362   : > { %v2505_v60 = vadd.f32 %v6004_v62, %v7980_v17  ;;  %v6007_v36 = vadd.f32 %v6006_v48, %v6005_v45  ;;  %v6086_v4 = vadd.f32 %v6085_v47, %v6084_v43  ;;  %v6087_v63 = vpop.f32.mrb[118].mxu0 }
 0x363   : > { %v6088_v22 = vpop.f32.mrb[119].mxu0 }
 0x364   : > { %v2508_v12 = vadd.f32 %v6007_v36, %v7984_v29  ;;  %v6089_v37 = vadd.f32 %v6088_v22, %v6087_v63  ;;  %v8122_v27 = vadd.f32 %v6086_v4, %v2505_v60 }
 0x366   : > { %v6008_v19 = vpop.f32.mrb[76].mxu1  ;;  %v8124_v39 = vadd.f32 %v6089_v37, %v2508_v12 }
 0x367   : > { %v6009_v23 = vpop.f32.mrb[77].mxu1 }
 0x368   : > { %v6010_v41 = vadd.f32 %v6009_v23, %v6008_v19  ;;  %v6011_v42 = vpop.f32.mrb[78].mxu1  ;;  %v6090_v7 = vpop.f32.mrb[120].mxu0 }
 0x369   : > { %v6012_v14 = vpop.f32.mrb[79].mxu1  ;;  %v6091_v5 = vpop.f32.mrb[121].mxu0 }
 0x36a   : > { %v2513_v17 = vadd.f32 %v6010_v41, %v8020_v44  ;;  %v6013_v57 = vadd.f32 %v6012_v14, %v6011_v42  ;;  %v6092_v0 = vadd.f32 %v6091_v5, %v6090_v7  ;;  %v6093_v3 = vpop.f32.mrb[122].mxu0 }
 0x36b   : > { %v6094_v50 = vpop.f32.mrb[123].mxu0 }
 0x36c   : > { %v2516_v29 = vadd.f32 %v6013_v57, %v8022_v51  ;;  %v6095_v24 = vadd.f32 %v6094_v50, %v6093_v3  ;;  %v8128_v21 = vadd.f32 %v6092_v0, %v2513_v17  ;;  %v8145_v17 = vpop.permute.xlu0 %6756 }
 0x36e   : > { %v6014_v38 = vpop.f32.mrb[80].mxu1  ;;  %v8130_v20 = vadd.f32 %v6095_v24, %v2516_v29  ;;  %v8149_v29 = vpop.permute.xlu1 %966 }
 0x36f   : > { %v6015_v58 = vpop.f32.mrb[81].mxu1 }
 0x370   : > { %v6016_v9 = vadd.f32 %v6015_v58, %v6014_v38  ;;  %v6017_v35 = vpop.f32.mrb[82].mxu1  ;;  %v6096_v33 = vpop.f32.mrb[124].mxu0  ;;  %v9081_v58 = vunpack.i.h.bf16 %v8145_v17 }
 0x371   : > { %v6018_v26 = vpop.f32.mrb[83].mxu1  ;;  %v6097_v32 = vpop.f32.mrb[125].mxu0 }
 0x372   : > { %v2521_v44 = vadd.f32 %v6016_v9, %v8059_v28  ;;  %v6019_v56 = vadd.f32 %v6018_v26, %v6017_v35  ;;  %v6098_v54 = vadd.f32 %v6097_v32, %v6096_v33  ;;  %v6099_v1 = vpop.f32.mrb[126].mxu0 }
 0x373   : > { %v6100_v59 = vpop.f32.mrb[127].mxu0 }
 0x374   : > { %v2524_v51 = vadd.f32 %v6019_v56, %v8064_v53  ;;  %v6101_v40 = vadd.f32 %v6100_v59, %v6099_v1  ;;  %v8134_v62 = vadd.f32 %v6098_v54, %v2521_v44  ;;  %v8160_v44 = vpop.permute.xlu1 %6761  ;;  %v2887_v56 = vld [vmem:[#allocation2 + $0x7] sm:$0xff] }
 0x375   : > { %v2843_v54 = vld [vmem:[#allocation2 + $0x6] sm:$0xff]  ;;  %v9078_v1 = vunpack.i.l.bf16 %v8160_v44 }
 0x376   : > { %v6020_v45 = vpop.f32.mrb[84].mxu1  ;;  %v8136_v43 = vadd.f32 %v6101_v40, %v2524_v51 }
 0x377   : > { %v6021_v48 = vpop.f32.mrb[85].mxu1 }
 0x378   : > { %v6022_v47 = vadd.f32 %v6021_v48, %v6020_v45  ;;  %v6023_v60 = vpop.f32.mrb[86].mxu1  ;;  %v6102_v36 = vpop.f32.mrb[128].mxu0 }
 0x379   : > { %v6024_v4 = vpop.f32.mrb[87].mxu1  ;;  %v6103_v63 = vpop.f32.mrb[129].mxu0 }
 0x37a   : > { %v2529_v28 = vadd.f32 %v6022_v47, %v8071_v49  ;;  %v6025_v22 = vadd.f32 %v6024_v4, %v6023_v60  ;;  %v6104_v12 = vadd.f32 %v6103_v63, %v6102_v36  ;;  %v6105_v37 = vpop.f32.mrb[130].mxu0  ;;  %v9084_v49 = vunpack.i.l.bf16 %v8145_v17  ;;  %v6912_v47 = vld [vmem:[%s9064_s2 + $0x340] sm:$0xff]   ;;  %v2931_v60 = vld [vmem:[#allocation2 + $0x8] sm:$0xff] }
 0x37b   : > { %v6106_v19 = vpop.f32.mrb[131].mxu0 }
 0x37c   : > { %v2532_v53 = vadd.f32 %v6025_v22, %v8073_v2  ;;  %v6107_v23 = vadd.f32 %v6106_v19, %v6105_v37  ;;  %v8140_v41 = vadd.f32 %v6104_v12, %v2529_v28  ;;  %v6913_v28 = vld [vmem:[%s9064_s2 + $0x388] sm:$0xff]   ;;  %v6924_v19 = vld [vmem:[%s9064_s2 + $0x3c0] sm:$0xff]  }
 0x37e   : > { %v2690_v42 = vpop.f32.mrb[88].mxu1  ;;  %v8142_v7 = vadd.f32 %v6107_v23, %v2532_v53 }
 0x37f   : > { %v2691_v14 = vadd.f32 %v2690_v42, %v8077_v16  ;;  %v6558_v5 = vpop.f32.mrb[89].mxu1 }
 0x380   : > { %v2693_v57 = vpop.f32.mrb[90].mxu1  ;;  %v9086_v5 = vunpack.i.h.bf16 %v8160_v44 }
 0x381   : > { %v2777_v0 = vmax.f32 %v2691_v14, 0.0  ;;  %v2694_v3 = vadd.f32 %v2693_v57, %v8079_v30  ;;  %v6559_v50 = vpop.f32.mrb[91].mxu1  ;;  %v6925_v14 = vld [vmem:[%s9064_s2 + $0x408] sm:$0xff]  }
 0x382   : > { %v8195_v50 = vpop.permute.xlu1 %6766 }
 0x383   : > { %v2799_v2 = vmul.f32 %v2777_v0, %v8149_v29  ;;  %v2778_v24 = vmax.f32 %v2694_v3, 0.0  ;;  %v6914_v3 = vld [vmem:[%s9064_s2 + $0x348] sm:$0xff]  }
 0x385   : > { %2821 = vst [vmem:[#allocation2 + $0x10] sm:$0xff] %v2799_v2  ;;  %v8154_v38 = vmul.f32 %v9084_v49, %v2778_v24  ;;  %v2953_v42 = vpack.c.bf16 %v2799_v2, %v2931_v60  ;;  %v6915_v2 = vld [vmem:[%s9064_s2 + $0x390] sm:$0xff]   ;;  %v9083_v24 = vunpack.i.l.bf16 %v8195_v50 }
 0x386   : > { %v2698_v16 = vpop.f32.mrb[92].mxu1 }
 0x387   : > { %2822 = vst [vmem:[#allocation2 + $0x18] sm:$0xff] %v8154_v38  ;;  %v2699_v9 = vadd.f32 %v2698_v16, %v8083_v15  ;;  %v6562_v35 = vpop.f32.mrb[93].mxu1 }
 0x388   : > { %v2701_v30 = vpop.f32.mrb[94].mxu1  ;;  %v6929_v35 = vld [vmem:[%s9064_s2 + $0x410] sm:$0xff]  }
 0x389   : > { %v2779_v33 = vmax.f32 %v2699_v9, 0.0  ;;  %v2702_v26 = vadd.f32 %v2701_v30, %v8085_v10  ;;  %v6563_v32 = vpop.f32.mrb[95].mxu1  ;;  %v6926_v9 = vld [vmem:[%s9064_s2 + $0x3c8] sm:$0xff]  }
 0x38b   : > { %v8165_v59 = vmul.f32 %v9081_v58, %v2779_v33  ;;  %v2780_v51 = vmax.f32 %v2702_v26, 0.0 }
 0x38c   : > { %v2888_v40 = vld [vmem:[#allocation2 + $0xf] sm:$0xff] }
 0x38d   : > { %v2844_v45 = vld [vmem:[#allocation2 + $0xe] sm:$0xff]  ;;  %2823 = vst [vmem:[#allocation2 + $0x20] sm:$0xff] %v8165_v59  ;;  %v8170_v15 = vmul.f32 %v9078_v1, %v2780_v51  ;;  %v2909_v10 = vpack.c.bf16 %v2888_v40, %v2887_v56  ;;  %v2954_v36 = vpack.c.bf16 %v8165_v59, %v8154_v38 }
 0x38e   : > { %v2865_v48 = vpack.c.bf16 %v2844_v45, %v2843_v54  ;;  %v2706_v4 = vpop.f32.mrb[96].mxu1  ;;  %v2976_v63 = vld [vmem:[#allocation2 + $0x17] sm:$0xff] }
 0x38f   : > { %2824 = vst [vmem:[#allocation2 + $0x28] sm:$0xff] %v8170_v15  ;;  %v2707_v22 = vadd.f32 %v2706_v4, %v8089_v55  ;;  %v6566_v12 = vpop.f32.mrb[97].mxu1  ;;  %3951 = vmatprep.mubr.bf16.mxu0 %v2909_v10  ;;  %v2997_v37 = vpack.c.bf16 %v2976_v63, %v2888_v40  ;;  %v3042_v53 = vpack.c.bf16 %v8170_v15, %v8165_v59  ;;  %v2845_v33 = vld [vmem:[#allocation2 + $0x16] sm:$0xff] }
 0x390   : > { %v2709_v23 = vpop.f32.mrb[98].mxu1  ;;  %3952 = vmatmul.mubr.bf16.vlgmr.msra.gmra.mrb[132].mxu0 %v2865_v48  ;;  %v6916_v40 = vld [vmem:[%s9064_s2 + $0x350] sm:$0xff]   ;;  %v6917_v48 = vld [vmem:[%s9064_s2 + $0x398] sm:$0xff]  }
 0x391   : > { %v2781_v55 = vmax.f32 %v2707_v22, 0.0  ;;  %v2710_v57 = vadd.f32 %v2709_v23, %v8091_v46  ;;  %6292 = vmatpush3.bf16.msra.mxu0 %v6912_v47  ;;  %v6567_v0 = vpop.f32.mrb[99].mxu1  ;;  %4072 = vmatprep.mubr.bf16.mxu1 %v2997_v37  ;;  %v6931_v22 = vld [vmem:[%s9064_s2 + $0x418] sm:$0xff]  }
 0x392   : > { %4073 = vmatmul.mubr.bf16.vlgmr.msra.gmra.mrb[132].mxu1 %v2953_v42  ;;  %6293 = vmatprep.subr.bf16.mxu0 %v6913_v28  ;;  %v6918_v42 = vld [vmem:[%s9064_s2 + $0x358] sm:$0xff]  }
 0x393   : > { %v8203_v46 = vmul.f32 %v9086_v5, %v2781_v55  ;;  %v2782_v16 = vmax.f32 %v2710_v57, 0.0  ;;  %6374 = vmatpush3.bf16.msra.mxu1 %v6924_v19  ;;  %v6919_v55 = vld [vmem:[%s9064_s2 + $0x3a0] sm:$0xff]  }
 0x394   : > { %v2890_v30 = vld [vmem:[#allocation2 + $0x1f] sm:$0xff]  ;;  %6375 = vmatprep.subr.bf16.mxu1 %v6925_v14  ;;  %v8241_v14 = vpop.permute.xlu0 %6771 }
 0x395   : > { %v2846_v26 = vld [vmem:[#allocation2 + $0x1e] sm:$0xff]  ;;  %2825 = vst [vmem:[#allocation2 + $0x30] sm:$0xff] %v8203_v46  ;;  %v8214_v32 = vmul.f32 %v9083_v24, %v2782_v16  ;;  %v2910_v56 = vpack.c.bf16 %v2890_v30, %v2976_v63  ;;  %6294 = vmatpush3.bf16.msra.mxu0 %v6914_v3  ;;  %v8218_v51 = vpack.c.bf16 %v8203_v46, %v8170_v15  ;;  %v6930_v63 = vld [vmem:[%s9064_s2 + $0x3d0] sm:$0xff]  }
 0x396   : > { %v2866_v54 = vpack.c.bf16 %v2846_v26, %v2845_v33  ;;  %v2714_v45 = vpop.f32.mrb[100].mxu1  ;;  %v2978_v10 = vld [vmem:[#allocation2 + $0x27] sm:$0xff]  ;;  %6295 = vmatprep.subr.bf16.mxu0 %v6915_v2  ;;  %v6932_v3 = vld [vmem:[%s9064_s2 + $0x3d8] sm:$0xff]  }
 0x397   : > { %2826 = vst [vmem:[#allocation2 + $0x38] sm:$0xff] %v8214_v32  ;;  %v2715_v47 = vadd.f32 %v2714_v45, %v8095_v25  ;;  %v6570_v60 = vpop.f32.mrb[101].mxu1  ;;  %3959 = vmatprep.mubr.bf16.mxu0 %v2910_v56  ;;  %v2998_v4 = vpack.c.bf16 %v2978_v10, %v2890_v30  ;;  %6376 = vmatpush3.bf16.msra.mxu1 %v6926_v9  ;;  %v9079_v25 = vunpack.i.h.bf16 %v8195_v50  ;;  %v2847_v16 = vld [vmem:[#allocation2 + $0x26] sm:$0xff] }
 0x398   : > { %v2717_v28 = vpop.f32.mrb[102].mxu1  ;;  %3960 = vmatmul.mubr.bf16.gmra.mrb[136].mxu0 %v2866_v54  ;;  %6377 = vmatprep.subr.bf16.mxu1 %v6929_v35  ;;  %v3043_v12 = vpack.c.bf16 %v8214_v32, %v8203_v46  ;;  %v6920_v56 = vld [vmem:[%s9064_s2 + $0x360] sm:$0xff]   ;;  %v6921_v45 = vld [vmem:[%s9064_s2 + $0x3a8] sm:$0xff]  }
 0x399   : > { %v2783_v37 = vmax.f32 %v2715_v47, 0.0  ;;  %v2718_v19 = vadd.f32 %v2717_v28, %v8097_v34  ;;  %v6571_v23 = vpop.f32.mrb[103].mxu1  ;;  %4080 = vmatprep.mubr.bf16.mxu1 %v2998_v4  ;;  %6296 = vmatpush3.bf16.msra.mxu0 %v6916_v40  ;;  %v9076_v34 = vunpack.i.l.bf16 %v8241_v14  ;;  %v6934_v60 = vld [vmem:[%s9064_s2 + $0x3e0] sm:$0xff]  }
 0x39a   : > { %4081 = vmatmul.mubr.bf16.gmra.mrb[136].mxu1 %v2954_v36  ;;  %6297 = vmatprep.subr.bf16.mxu0 %v6917_v48  ;;  %v6933_v36 = vld [vmem:[%s9064_s2 + $0x420] sm:$0xff]   ;;  %v6922_v23 = vld [vmem:[%s9064_s2 + $0x368] sm:$0xff]  }
 0x39b   : > { %v8252_v57 = vmul.f32 %v9079_v25, %v2783_v37  ;;  %v2784_v0 = vmax.f32 %v2718_v19, 0.0  ;;  %6378 = vmatpush3.bf16.msra.mxu1 %v6930_v63  ;;  %v6937_v63 = vld [vmem:[%s9064_s2 + $0x428] sm:$0xff]  }
 0x39c   : > { %v2892_v2 = vld [vmem:[#allocation2 + $0x2f] sm:$0xff]  ;;  %6379 = vmatprep.subr.bf16.mxu1 %v6931_v22 }
 0x39d   : > { %v2848_v9 = vld [vmem:[#allocation2 + $0x2e] sm:$0xff]  ;;  %2827 = vst [vmem:[#allocation2 + $0x40] sm:$0xff] %v8252_v57  ;;  %v8263_v35 = vmul.f32 %v9076_v34, %v2784_v0  ;;  %v2911_v30 = vpack.c.bf16 %v2892_v2, %v2978_v10  ;;  %v8267_v26 = vpack.c.bf16 %v8252_v57, %v8214_v32  ;;  %6298 = vmatpush3.bf16.msra.mxu0 %v6918_v42  ;;  %v8290_v42 = vpop.permute.xlu1 %6776 }
 0x39e   : > { %v2867_v33 = vpack.c.bf16 %v2848_v9, %v2847_v16  ;;  %v2722_v54 = vpop.f32.mrb[104].mxu1  ;;  %v2980_v40 = vld [vmem:[#allocation2 + $0x37] sm:$0xff]  ;;  %6299 = vmatprep.subr.bf16.mxu0 %v6919_v55  ;;  %v9073_v0 = vunpack.i.l.bf16 %v8290_v42 }
 0x39f   : > { %2828 = vst [vmem:[#allocation2 + $0x48] sm:$0xff] %v8263_v35  ;;  %v2723_v10 = vadd.f32 %v2722_v54, %v8101_v61  ;;  %v6574_v48 = vpop.f32.mrb[105].mxu1  ;;  %3967 = vmatprep.mubr.bf16.mxu0 %v2911_v30  ;;  %v2999_v47 = vpack.c.bf16 %v2980_v40, %v2892_v2  ;;  %6380 = vmatpush3.bf16.msra.mxu1 %v6932_v3  ;;  %v9074_v61 = vunpack.i.h.bf16 %v8241_v14  ;;  %v6927_v55 = vld [vmem:[%s9064_s2 + $0x3b0] sm:$0xff]  }
 0x3a0   : > { %v2725_v4 = vpop.f32.mrb[106].mxu1  ;;  %3968 = vmatmul.mubr.bf16.gmra.mrb[140].mxu0 %v2867_v33  ;;  %6381 = vmatprep.subr.bf16.mxu1 %v6933_v36  ;;  %v3044_v28 = vpack.c.bf16 %v8263_v35, %v8252_v57  ;;  %v6938_v36 = vld [vmem:[%s9064_s2 + $0x3e8] sm:$0xff]   ;;  %v6939_v2 = vld [vmem:[%s9064_s2 + $0x430] sm:$0xff]  }
 0x3a1   : > { %v2785_v22 = vmax.f32 %v2723_v10, 0.0  ;;  %v2726_v37 = vadd.f32 %v2725_v4, %v8106_v31  ;;  %v6575_v19 = vpop.f32.mrb[107].mxu1  ;;  %4088 = vmatprep.mubr.bf16.mxu1 %v2999_v47  ;;  %6300 = vmatpush3.bf16.msra.mxu0 %v6920_v56  ;;  %v2849_v9 = vld [vmem:[#allocation2 + $0x36] sm:$0xff] }
 0x3a2   : > { %4089 = vmatmul.mubr.bf16.gmra.mrb[140].mxu1 %v8218_v51  ;;  %6301 = vmatprep.subr.bf16.mxu0 %v6921_v45  ;;  %v6928_v10 = vld [vmem:[%s9064_s2 + $0x370] sm:$0xff]   ;;  %v6941_v19 = vld [vmem:[%s9064_s2 + $0x438] sm:$0xff]  }
 0x3a3   : > { %v8299_v31 = vmul.f32 %v9074_v61, %v2785_v22  ;;  %v2786_v3 = vmax.f32 %v2726_v37, 0.0  ;;  %6382 = vmatpush3.bf16.msra.mxu1 %v6934_v60  ;;  %v6935_v60 = vld [vmem:[%s9064_s2 + $0x3b8] sm:$0xff]   ;;  %v6940_v22 = vld [vmem:[%s9064_s2 + $0x3f0] sm:$0xff]  }
 0x3a4   : > { %v2894_v16 = vld [vmem:[#allocation2 + $0x3f] sm:$0xff]  ;;  %6383 = vmatprep.subr.bf16.mxu1 %v6937_v63  ;;  %v3063_v34 = vld [vmem:[#allocation2 + $0x11] sm:$0xff] }
 0x3a5   : > { %v2850_v30 = vld [vmem:[#allocation2 + $0x3e] sm:$0xff]  ;;  %2829 = vst [vmem:[#allocation2 + $0x50] sm:$0xff] %v8299_v31  ;;  %v8310_v33 = vmul.f32 %v9073_v0, %v2786_v3  ;;  %v2912_v56 = vpack.c.bf16 %v2894_v16, %v2980_v40  ;;  %v8314_v45 = vpack.c.bf16 %v8299_v31, %v8263_v35  ;;  %6302 = vmatpush3.bf16.msra.mxu0 %v6922_v23 }
 0x3a6   : > { %v2868_v54 = vpack.c.bf16 %v2850_v30, %v2849_v9  ;;  %v2730_v48 = vpop.f32.mrb[108].mxu1  ;;  %v2982_v47 = vld [vmem:[#allocation2 + $0x47] sm:$0xff]  ;;  %6303 = vmatprep.subr.bf16.mxu0 %v6927_v55 }
 0x3a7   : > { %2830 = vst [vmem:[#allocation2 + $0x58] sm:$0xff] %v8310_v33  ;;  %v2731_v40 = vadd.f32 %v2730_v48, %v8110_v11  ;;  %v6578_v4 = vpop.f32.mrb[109].mxu1  ;;  %3975 = vmatprep.mubr.bf16.mxu0 %v2912_v56  ;;  %v3000_v63 = vpack.c.bf16 %v2982_v47, %v2894_v16  ;;  %6384 = vmatpush3.bf16.msra.mxu1 %v6938_v36  ;;  %v9071_v11 = vunpack.i.h.bf16 %v8290_v42  ;;  %v6936_v16 = vld [vmem:[%s9064_s2 + $0x378] sm:$0xff]  }
 0x3a8   : > { %v2733_v37 = vpop.f32.mrb[110].mxu1  ;;  %3976 = vmatmul.mubr.bf16.gmra.mrb[144].mxu0 %v2868_v54  ;;  %6385 = vmatprep.subr.bf16.mxu1 %v6939_v2  ;;  %v3045_v23 = vpack.c.bf16 %v8310_v33, %v8299_v31  ;;  %v8337_v2 = vpop.permute.xlu0 %6781 }
 0x3a9   : > { %v2787_v55 = vmax.f32 %v2731_v40, 0.0  ;;  %v2734_v3 = vadd.f32 %v2733_v37, %v8112_v52  ;;  %v6579_v36 = vpop.f32.mrb[111].mxu1  ;;  %4096 = vmatprep.mubr.bf16.mxu1 %v3000_v63  ;;  %6304 = vmatpush3.bf16.msra.mxu0 %v6928_v10  ;;  %v9069_v9 = vunpack.i.l.bf16 %v8337_v2  ;;  %v6942_v52 = vld [vmem:[%s9064_s2 + $0x3f8] sm:$0xff]   ;;  %v2851_v10 = vld [vmem:[#allocation2 + $0x46] sm:$0xff] }
 0x3aa   : > { %4097 = vmatmul.mubr.bf16.gmra.mrb[144].mxu1 %v8267_v26  ;;  %6305 = vmatprep.subr.bf16.mxu0 %v6935_v60 }
 0x3ab   : > { %v8343_v30 = vmul.f32 %v9071_v11, %v2787_v55  ;;  %v2788_v56 = vmax.f32 %v2734_v3, 0.0  ;;  %6386 = vmatpush3.bf16.msra.mxu1 %v6940_v22  ;;  %v3152_v11 = vld [vmem:[#allocation2 + $0x21] sm:$0xff] }
 0x3ac   : > { %v2896_v54 = vld [vmem:[#allocation2 + $0x4f] sm:$0xff]  ;;  %6387 = vmatprep.subr.bf16.mxu1 %v6941_v19  ;;  %v8387_v0 = vpop.permute.xlu0 %6791 }
 0x3ad   : > { %v2852_v48 = vld [vmem:[#allocation2 + $0x4e] sm:$0xff]  ;;  %2831 = vst [vmem:[#allocation2 + $0x60] sm:$0xff] %v8343_v30  ;;  %v8351_v60 = vmul.f32 %v9069_v9, %v2788_v56  ;;  %v2913_v40 = vpack.c.bf16 %v2896_v54, %v2982_v47  ;;  %v8355_v63 = vpack.c.bf16 %v8343_v30, %v8310_v33  ;;  %6306 = vmatpush3.bf16.msra.mxu0 %v6936_v16  ;;  %v9070_v56 = vunpack.i.h.bf16 %v8337_v2  ;;  %v8364_v9 = vpop.permute.xlu1 %6786 }
 0x3ae   : > { %v2869_v4 = vpack.c.bf16 %v2852_v48, %v2851_v10  ;;  %v2738_v22 = vpop.f32.mrb[112].mxu1  ;;  %v2984_v37 = vld [vmem:[#allocation2 + $0x57] sm:$0xff]  ;;  %6600 = vmatprep.subr.bf16.mxu0 %v7119_v18 }
 0x3af   : > { %2832 = vst [vmem:[#allocation2 + $0x68] sm:$0xff] %v8351_v60  ;;  %v2739_v19 = vadd.f32 %v2738_v22, %v8116_v8  ;;  %v6582_v55 = vpop.f32.mrb[113].mxu1  ;;  %3983 = vmatprep.mubr.bf16.mxu0 %v2913_v40  ;;  %v3001_v3 = vpack.c.bf16 %v2984_v37, %v2896_v54  ;;  %6388 = vmatpush3.bf16.msra.mxu1 %v6942_v52  ;;  %v9072_v8 = vunpack.i.l.bf16 %v8364_v9 }
 0x3b0   : > { %v2741_v36 = vpop.f32.mrb[114].mxu1  ;;  %3984 = vmatmul.mubr.bf16.gmra.mrb[148].mxu0 %v2869_v4  ;;  %v2853_v4 = vld [vmem:[#allocation2 + $0x56] sm:$0xff] }
 0x3b1   : > { %v2789_v16 = vmax.f32 %v2739_v19, 0.0  ;;  %v2742_v10 = vadd.f32 %v2741_v36, %v8118_v13  ;;  %v6583_v48 = vpop.f32.mrb[115].mxu1  ;;  %4104 = vmatprep.mubr.bf16.mxu1 %v3001_v3  ;;  %v8410_v1 = vpop.permute.xlu1 %6796 }
 0x3b2   : > { %4105 = vmatmul.mubr.bf16.gmra.mrb[148].mxu1 %v8314_v45 }
 0x3b3   : > { %v8370_v52 = vmul.f32 %v9070_v56, %v2789_v16  ;;  %v2790_v54 = vmax.f32 %v2742_v10, 0.0 }
 0x3b4   : > { %v2898_v40 = vld [vmem:[#allocation2 + $0x5f] sm:$0xff] }
 0x3b5   : > { %v2854_v22 = vld [vmem:[#allocation2 + $0x5e] sm:$0xff]  ;;  %2833 = vst [vmem:[#allocation2 + $0x70] sm:$0xff] %v8370_v52  ;;  %v8375_v13 = vmul.f32 %v9072_v8, %v2790_v54  ;;  %v2914_v19 = vpack.c.bf16 %v2898_v40, %v2984_v37  ;;  %v8379_v3 = vpack.c.bf16 %v8370_v52, %v8351_v60  ;;  %v9075_v37 = vunpack.i.h.bf16 %v8364_v9 }
 0x3b6   : > { %v2870_v55 = vpack.c.bf16 %v2854_v22, %v2853_v4  ;;  %v2746_v36 = vpop.f32.mrb[116].mxu1  ;;  %v2986_v48 = vld [vmem:[#allocation2 + $0x67] sm:$0xff] }
 0x3b7   : > { %2834 = vst [vmem:[#allocation2 + $0x78] sm:$0xff] %v8375_v13  ;;  %v2747_v16 = vadd.f32 %v2746_v36, %v8122_v27  ;;  %v6586_v10 = vpop.f32.mrb[117].mxu1  ;;  %3991 = vmatprep.mubr.bf16.mxu0 %v2914_v19  ;;  %v3002_v56 = vpack.c.bf16 %v2986_v48, %v2898_v40  ;;  %v9077_v27 = vunpack.i.l.bf16 %v8387_v0  ;;  %v3160_v46 = vld [vmem:[#allocation2 + $0x61] sm:$0xff] }
 0x3b8   : > { %v2749_v54 = vpop.f32.mrb[118].mxu1  ;;  %3992 = vmatmul.mubr.bf16.gmra.mrb[152].mxu0 %v2870_v55  ;;  %v2855_v55 = vld [vmem:[#allocation2 + $0x66] sm:$0xff] }
 0x3b9   : > { %v2791_v4 = vmax.f32 %v2747_v16, 0.0  ;;  %v2750_v22 = vadd.f32 %v2749_v54, %v8124_v39  ;;  %v6587_v8 = vpop.f32.mrb[119].mxu1  ;;  %4112 = vmatprep.mubr.bf16.mxu1 %v3002_v56 }
 0x3ba   : > { %4113 = vmatmul.mubr.bf16.gmra.mrb[152].mxu1 %v8355_v63 }
 0x3bb   : > { %v8393_v40 = vmul.f32 %v9075_v37, %v2791_v4  ;;  %v2792_v19 = vmax.f32 %v2750_v22, 0.0 }
 0x3bc   : > { %v2900_v36 = vld [vmem:[#allocation2 + $0x6f] sm:$0xff] }
 0x3bd   : > { %v2856_v10 = vld [vmem:[#allocation2 + $0x6e] sm:$0xff]  ;;  %2835 = vst [vmem:[#allocation2 + $0x80] sm:$0xff] %v8393_v40  ;;  %v8398_v39 = vmul.f32 %v9077_v27, %v2792_v19  ;;  %v2915_v56 = vpack.c.bf16 %v2900_v36, %v2986_v48  ;;  %v8402_v16 = vpack.c.bf16 %v8393_v40, %v8375_v13  ;;  %v9080_v48 = vunpack.i.h.bf16 %v8387_v0 }
 0x3be   : > { %v2871_v8 = vpack.c.bf16 %v2856_v10, %v2855_v55  ;;  %v2754_v54 = vpop.f32.mrb[120].mxu1  ;;  %v2988_v61 = vld [vmem:[#allocation2 + $0x77] sm:$0xff] }
 0x3bf   : > { %2836 = vst [vmem:[#allocation2 + $0x88] sm:$0xff] %v8398_v39  ;;  %v2755_v4 = vadd.f32 %v2754_v54, %v8128_v21  ;;  %v6590_v22 = vpop.f32.mrb[121].mxu1  ;;  %3999 = vmatprep.mubr.bf16.mxu0 %v2915_v56  ;;  %v3003_v37 = vpack.c.bf16 %v2988_v61, %v2900_v36  ;;  %v9082_v21 = vunpack.i.l.bf16 %v8410_v1 }
 0x3c0   : > { %v2757_v19 = vpop.f32.mrb[122].mxu1  ;;  %4000 = vmatmul.mubr.bf16.gmra.mrb[156].mxu0 %v2871_v8  ;;  %v2857_v8 = vld [vmem:[#allocation2 + $0x76] sm:$0xff] }
 0x3c1   : > { %v2793_v55 = vmax.f32 %v2755_v4, 0.0  ;;  %v2758_v10 = vadd.f32 %v2757_v19, %v8130_v20  ;;  %v6591_v27 = vpop.f32.mrb[123].mxu1  ;;  %4120 = vmatprep.mubr.bf16.mxu1 %v3003_v37 }
 0x3c2   : > { %4121 = vmatmul.mubr.bf16.gmra.mrb[156].mxu1 %v8379_v3 }
 0x3c3   : > { %v8416_v36 = vmul.f32 %v9080_v48, %v2793_v55  ;;  %v2794_v56 = vmax.f32 %v2758_v10, 0.0 }
 0x3c4   : > { %v2902_v54 = vld [vmem:[#allocation2 + $0x7f] sm:$0xff] }
 0x3c5   : > { %v2858_v22 = vld [vmem:[#allocation2 + $0x7e] sm:$0xff]  ;;  %2837 = vst [vmem:[#allocation2 + $0x90] sm:$0xff] %v8416_v36  ;;  %v8421_v20 = vmul.f32 %v9082_v21, %v2794_v56  ;;  %v2916_v37 = vpack.c.bf16 %v2902_v54, %v2988_v61  ;;  %v8425_v4 = vpack.c.bf16 %v8416_v36, %v8398_v39  ;;  %v8431_v56 = vpop.permute.xlu0 %6801 }
 0x3c6   : > { %v2872_v27 = vpack.c.bf16 %v2858_v22, %v2857_v8  ;;  %v2762_v19 = vpop.f32.mrb[124].mxu1  ;;  %v2990_v25 = vld [vmem:[#allocation2 + $0x87] sm:$0xff]  ;;  %v9085_v8 = vunpack.i.h.bf16 %v8410_v1  ;;  %v3076_v35 = vld [vmem:[#allocation2 + $0x79] sm:$0xff] }
 0x3c7   : > { %2838 = vst [vmem:[#allocation2 + $0x98] sm:$0xff] %v8421_v20  ;;  %v2763_v55 = vadd.f32 %v2762_v19, %v8134_v62  ;;  %v6594_v10 = vpop.f32.mrb[125].mxu1  ;;  %4007 = vmatprep.mubr.bf16.mxu0 %v2916_v37  ;;  %v3004_v48 = vpack.c.bf16 %v2990_v25, %v2902_v54  ;;  %v9087_v62 = vunpack.i.l.bf16 %v8431_v56 }
 0x3c8   : > { %v2765_v61 = vpop.f32.mrb[126].mxu1  ;;  %4008 = vmatmul.mubr.bf16.gmra.mrb[160].mxu0 %v2872_v27  ;;  %v2859_v10 = vld [vmem:[#allocation2 + $0x86] sm:$0xff] }
 0x3c9   : > { %v2795_v22 = vmax.f32 %v2763_v55, 0.0  ;;  %v2766_v21 = vadd.f32 %v2765_v61, %v8136_v43  ;;  %v6595_v24 = vpop.f32.mrb[127].mxu1  ;;  %4128 = vmatprep.mubr.bf16.mxu1 %v3004_v48 }
 0x3ca   : > { %4129 = vmatmul.mubr.bf16.gmra.mrb[160].mxu1 %v8402_v16 }
 0x3cb   : > { %v8439_v54 = vmul.f32 %v9085_v8, %v2795_v22  ;;  %v2796_v37 = vmax.f32 %v2766_v21, 0.0 }
 0x3cc   : > { %v2904_v19 = vld [vmem:[#allocation2 + $0x8f] sm:$0xff] }
 0x3cd   : > { %v2860_v49 = vld [vmem:[#allocation2 + $0x8e] sm:$0xff]  ;;  %2839 = vst [vmem:[#allocation2 + $0xa0] sm:$0xff] %v8439_v54  ;;  %v8444_v27 = vmul.f32 %v9087_v62, %v2796_v37  ;;  %v2917_v43 = vpack.c.bf16 %v2904_v19, %v2990_v25  ;;  %v8448_v48 = vpack.c.bf16 %v8439_v54, %v8421_v20 }
 0x3ce   : > { %v2873_v24 = vpack.c.bf16 %v2860_v49, %v2859_v10  ;;  %v2770_v55 = vpop.f32.mrb[128].mxu1  ;;  %v2992_v61 = vld [vmem:[#allocation2 + $0x97] sm:$0xff]  ;;  %v9088_v49 = vunpack.i.h.bf16 %v8431_v56 }
 0x3cf   : > { %2840 = vst [vmem:[#allocation2 + $0xa8] sm:$0xff] %v8444_v27  ;;  %v2771_v21 = vadd.f32 %v2770_v55, %v8140_v41  ;;  %v6598_v22 = vpop.f32.mrb[129].mxu1  ;;  %4015 = vmatprep.mubr.bf16.mxu0 %v2917_v43  ;;  %v3005_v8 = vpack.c.bf16 %v2992_v61, %v2904_v19  ;;  %v8461_v19 = vpop.permute.xlu1 %1071  ;;  %v3166_v31 = vld [vmem:[#allocation2 + $0x91] sm:$0xff] }
 0x3d0   : > { %v2773_v37 = vpop.f32.mrb[130].mxu1  ;;  %4016 = vmatmul.mubr.bf16.gmra.mrb[164].mxu0 %v2873_v24  ;;  %v2861_v22 = vld [vmem:[#allocation2 + $0x96] sm:$0xff] }
 0x3d1   : > { %v2797_v25 = vmax.f32 %v2771_v21, 0.0  ;;  %v2774_v10 = vadd.f32 %v2773_v37, %v8142_v7  ;;  %v6599_v62 = vpop.f32.mrb[131].mxu1  ;;  %4136 = vmatprep.mubr.bf16.mxu1 %v3005_v8 }
 0x3d2   : > { %4137 = vmatmul.mubr.bf16.gmra.mrb[164].mxu1 %v8425_v4 }
 0x3d3   : > { %v8459_v41 = vmul.f32 %v9088_v49, %v2797_v25  ;;  %v2798_v43 = vmax.f32 %v2774_v10, 0.0  ;;  %v3064_v10 = vld [vmem:[#allocation2 + $0x19] sm:$0xff]  ;;  %v3154_v25 = vld [vmem:[#allocation2 + $0x31] sm:$0xff] }
 0x3d4   : > { %v2906_v55 = vld [vmem:[#allocation2 + $0x9f] sm:$0xff] }
 0x3d5   : > { %v2862_v5 = vld [vmem:[#allocation2 + $0x9e] sm:$0xff]  ;;  %2841 = vst [vmem:[#allocation2 + $0xb0] sm:$0xff] %v8459_v41  ;;  %v8465_v24 = vmul.f32 %v2798_v43, %v8461_v19  ;;  %v2918_v7 = vpack.c.bf16 %v2906_v55, %v2992_v61  ;;  %v8469_v8 = vpack.c.bf16 %v8459_v41, %v8444_v27 }
 0x3d6   : > { %v2874_v62 = vpack.c.bf16 %v2862_v5, %v2861_v22  ;;  %v2994_v21 = vld [vmem:[#allocation2 + $0xa7] sm:$0xff] }
 0x3d7   : > { %2842 = vst [vmem:[#allocation2 + $0xb8] sm:$0xff] %v8465_v24  ;;  %4023 = vmatprep.mubr.bf16.mxu0 %v2918_v7  ;;  %v3006_v37 = vpack.c.bf16 %v2994_v21, %v2906_v55  ;;  %v2863_v61 = vld [vmem:[#allocation2 + $0xa6] sm:$0xff]  ;;  %v3085_v7 = vpack.c.bf16 %v3064_v10, %v3063_v34  ;;  %v3173_v55 = vpack.c.bf16 %v3152_v11, %v3064_v10 }
 0x3d8   : > { %4024 = vmatmul.mubr.bf16.gmra.mrb[168].mxu0 %v2874_v62  ;;  %v3019_v62 = vld [vmem:[#allocation2 + $0x10] sm:$0xff] }
 0x3d9   : > { %4144 = vmatprep.mubr.bf16.mxu1 %v3006_v37  ;;  %v3066_v37 = vld [vmem:[#allocation2 + $0x29] sm:$0xff] }
 0x3da   : > { %4145 = vmatmul.mubr.bf16.gmra.mrb[168].mxu1 %v8448_v48  ;;  %v3174_v34 = vpack.c.bf16 %v3154_v25, %v3066_v37 }
 0x3dc   : > { %v2908_v43 = vld [vmem:[#allocation2 + $0xaf] sm:$0xff] }
 0x3dd   : > { %v2864_v5 = vld [vmem:[#allocation2 + $0xae] sm:$0xff]  ;;  %v2919_v22 = vpack.c.bf16 %v2908_v43, %v2994_v21  ;;  %v6943_v21 = vld [vmem:[%s9064_s2 + $0x440] sm:$0xff]  }
 0x3de   : > { %v2875_v49 = vpack.c.bf16 %v2864_v5, %v2863_v61  ;;  %v2996_v58 = vld [vmem:[#allocation2 + $0xb7] sm:$0xff]  ;;  %v3041_v5 = vpack.c.bf16 %v8154_v38, %v3019_v62 }
 0x3df   : > { %4031 = vmatprep.mubr.bf16.mxu0 %v2919_v22  ;;  %v3007_v47 = vpack.c.bf16 %v2996_v58, %v2908_v43  ;;  %v3107_v61 = vld [vmem:[#allocation2 + $0x18] sm:$0xff]  ;;  %v3086_v22 = vpack.c.bf16 %v3066_v37, %v3152_v11  ;;  %v6945_v38 = vld [vmem:[%s9064_s2 + $0x450] sm:$0xff]   ;;  %v3156_v11 = vld [vmem:[#allocation2 + $0x41] sm:$0xff] }
 0x3e0   : > { %4032 = vmatmul.mubr.bf16.gmra.mrb[172].mxu0 %v2875_v49  ;;  %v3129_v58 = vpack.c.bf16 %v8165_v59, %v3107_v61  ;;  %v3068_v49 = vld [vmem:[#allocation2 + $0x39] sm:$0xff]  ;;  %v3158_v59 = vld [vmem:[#allocation2 + $0x51] sm:$0xff] }
 0x3e1   : > { %4152 = vmatprep.mubr.bf16.mxu1 %v3007_v47  ;;  %4193 = vmatprep.mubr.bf16.mxu0 %v3085_v7  ;;  %v6944_v47 = vld [vmem:[%s9064_s2 + $0x448] sm:$0xff]   ;;  %v3087_v10 = vpack.c.bf16 %v3068_v49, %v3154_v25  ;;  %v3175_v43 = vpack.c.bf16 %v3156_v11, %v3068_v49  ;;  %v6946_v7 = vld [vmem:[%s9064_s2 + $0x458] sm:$0xff]   ;;  %v6947_v25 = vld [vmem:[%s9064_s2 + $0x460] sm:$0xff]   ;;  %v9091_v49 = vpack.c.bf16 %v8398_v39, %v8393_v40 }
 0x3e2   : > { %4153 = vmatmul.mubr.bf16.gmra.mrb[172].mxu1 %v8469_v8  ;;  %v3072_v62 = vld [vmem:[#allocation2 + $0x59] sm:$0xff]  ;;  %v6949_v37 = vld [vmem:[%s9064_s2 + $0x470] sm:$0xff]   ;;  %v3172_v40 = vld [vmem:[#allocation2 + $0xc1] sm:$0xff] }
 0x3e3   : > { %4314 = vmatprep.mubr.bf16.mxu1 %v3173_v55  ;;  %v3070_v55 = vld [vmem:[#allocation2 + $0x49] sm:$0xff]  ;;  %v3089_v32 = vpack.c.bf16 %v3072_v62, %v3158_v59  ;;  %v3162_v61 = vld [vmem:[#allocation2 + $0x71] sm:$0xff] }
 0x3e4   : > { %v3088_v15 = vpack.c.bf16 %v3070_v55, %v3156_v11  ;;  %v9092_v11 = vpack.c.bf16 %v8421_v20, %v8416_v36  ;;  %v9094_v36 = vpack.c.bf16 %v8465_v24, %v8459_v41  ;;  %v3200_v41 = vld [vmem:[#allocation2 + $0x42] sm:$0xff] }
 0x3e8   : > { %4194 = vmatmul.mubr.bf16.vlgmr.msra.gmra.mrb[176].mxu0 %v3041_v5 }
 0x3e9   : > { %6601 = vmatpush3.bf16.msra.mxu0 %v6943_v21  ;;  %4201 = vmatprep.mubr.bf16.mxu0 %v3086_v22  ;;  %v3074_v21 = vld [vmem:[#allocation2 + $0x69] sm:$0xff]  ;;  %v3091_v22 = vpack.c.bf16 %v3076_v35, %v3162_v61 }
 0x3ea   : > { %4315 = vmatmul.mubr.bf16.vlgmr.msra.gmra.mrb[176].mxu1 %v3129_v58  ;;  %6602 = vmatprep.subr.bf16.mxu0 %v7119_v18  ;;  %v3090_v5 = vpack.c.bf16 %v3074_v21, %v3160_v46  ;;  %v3178_v57 = vpack.c.bf16 %v3162_v61, %v3074_v21 }
 0x3eb   : > { %4322 = vmatprep.mubr.bf16.mxu1 %v3174_v34  ;;  %v3078_v34 = vld [vmem:[#allocation2 + $0x89] sm:$0xff] }
 0x3ed   : > { %6603 = vmatpush3.bf16.msra.mxu0 %v6944_v47  ;;  %v3080_v47 = vld [vmem:[#allocation2 + $0x99] sm:$0xff] }
 0x3ee   : > { %6604 = vmatprep.subr.bf16.mxu0 %v7119_v18 }
 0x3f0   : > { %4202 = vmatmul.mubr.bf16.gmra.mrb[180].mxu0 %v3042_v53  ;;  %v3176_v53 = vpack.c.bf16 %v3158_v59, %v3070_v55  ;;  %v3195_v55 = vld [vmem:[#allocation2 + $0x1a] sm:$0xff] }
 0x3f1   : > { %4209 = vmatprep.mubr.bf16.mxu0 %v3087_v10  ;;  %6605 = vmatpush3.bf16.msra.mxu0 %v6945_v38  ;;  %v3082_v38 = vld [vmem:[#allocation2 + $0xa9] sm:$0xff]  ;;  %v3084_v10 = vld [vmem:[#allocation2 + $0xb9] sm:$0xff] }
 0x3f2   : > { %4323 = vmatmul.mubr.bf16.gmra.mrb[180].mxu1 %v8218_v51  ;;  %6606 = vmatprep.subr.bf16.mxu0 %v7119_v18  ;;  %v6948_v51 = vld [vmem:[%s9064_s2 + $0x468] sm:$0xff]  }
 0x3f3   : > { %4330 = vmatprep.mubr.bf16.mxu1 %v3175_v43  ;;  %v9093_v43 = vpack.c.bf16 %v8444_v27, %v8439_v54  ;;  %v3198_v27 = vld [vmem:[#allocation2 + $0x32] sm:$0xff] }
 0x3f5   : > { %6607 = vmatpush3.bf16.msra.mxu0 %v6946_v7  ;;  %v3128_v7 = vld [vmem:[#allocation2 + $0xc0] sm:$0xff] }
 0x3f6   : > { %6608 = vmatprep.subr.bf16.mxu0 %v7119_v18  ;;  %v3139_v20 = vpack.c.bf16 %v3128_v7, %v8465_v24  ;;  %v3199_v24 = vld [vmem:[#allocation2 + $0x3a] sm:$0xff] }
 0x3f7   : > { %v3219_v59 = vpack.c.bf16 %v3200_v41, %v3199_v24 }
 0x3f8   : > { %4210 = vmatmul.mubr.bf16.gmra.mrb[184].mxu0 %v3043_v12  ;;  %v3177_v12 = vpack.c.bf16 %v3160_v46, %v3072_v62  ;;  %v3204_v62 = vld [vmem:[#allocation2 + $0x62] sm:$0xff] }
 0x3f9   : > { %4217 = vmatprep.mubr.bf16.mxu0 %v3088_v15  ;;  %6609 = vmatpush3.bf16.msra.mxu0 %v6947_v25  ;;  %v3202_v15 = vld [vmem:[#allocation2 + $0x52] sm:$0xff] }
 0x3fa   : > { %4331 = vmatmul.mubr.bf16.gmra.mrb[184].mxu1 %v8267_v26  ;;  %6610 = vmatprep.subr.bf16.mxu0 %v7119_v18  ;;  %v6950_v26 = vld [vmem:[%s9064_s2 + $0x478] sm:$0xff]  }
 0x3fb   : > { %4338 = vmatprep.mubr.bf16.mxu1 %v3176_v53  ;;  %v3201_v53 = vld [vmem:[#allocation2 + $0x4a] sm:$0xff] }
 0x3fd   : > { %6611 = vmatpush3.bf16.msra.mxu0 %v6948_v51  ;;  %v3220_v51 = vpack.c.bf16 %v3202_v15, %v3201_v53  ;;  %v3209_v53 = vld [vmem:[#allocation2 + $0x8a] sm:$0xff] }
 0x3fe   : > { %6612 = vmatprep.subr.bf16.mxu0 %v7119_v18 }
 0x400   : > { %4218 = vmatmul.mubr.bf16.gmra.mrb[188].mxu0 %v3044_v28  ;;  %v3164_v28 = vld [vmem:[#allocation2 + $0x81] sm:$0xff] }
 0x401   : > { %4225 = vmatprep.mubr.bf16.mxu0 %v3089_v32  ;;  %6613 = vmatpush3.bf16.msra.mxu0 %v6949_v37  ;;  %v3179_v58 = vpack.c.bf16 %v3164_v28, %v3076_v35  ;;  %v3092_v33 = vpack.c.bf16 %v3078_v34, %v3164_v28  ;;  %v3203_v37 = vld [vmem:[#allocation2 + $0x5a] sm:$0xff]  ;;  %v3205_v35 = vld [vmem:[#allocation2 + $0x6a] sm:$0xff] }
 0x402   : > { %4339 = vmatmul.mubr.bf16.gmra.mrb[188].mxu1 %v8314_v45  ;;  %6614 = vmatprep.subr.bf16.mxu0 %v7119_v18  ;;  %v9089_v45 = vpack.c.bf16 %v8351_v60, %v8343_v30  ;;  %v3168_v30 = vld [vmem:[#allocation2 + $0xa1] sm:$0xff]  ;;  %v3093_v60 = vpack.c.bf16 %v3080_v47, %v3166_v31  ;;  %v3221_v46 = vpack.c.bf16 %v3204_v62, %v3203_v37 }
 0x403   : > { %4346 = vmatprep.mubr.bf16.mxu1 %v3177_v12  ;;  %v3206_v12 = vld [vmem:[#allocation2 + $0x72] sm:$0xff] }
 0x405   : > { %6615 = vmatpush3.bf16.msra.mxu0 %v6950_v26  ;;  %v8564_v26 = vld [vmem:[%s9066_s4 + $0x1] ss:$0 sm:$0xff] }
 0x408   : > { %4226 = vmatmul.mubr.bf16.gmra.mrb[192].mxu0 %v3045_v23  ;;  %v9090_v23 = vpack.c.bf16 %v8375_v13, %v8370_v52  ;;  %v3170_v52 = vld [vmem:[#allocation2 + $0xb1] sm:$0xff]  ;;  %v3094_v13 = vpack.c.bf16 %v3082_v38, %v3168_v30 }
 0x409   : > { %4233 = vmatprep.mubr.bf16.mxu0 %v3090_v5  ;;  %v3095_v39 = vpack.c.bf16 %v3084_v10, %v3170_v52 }
 0x40a   : > { %4347 = vmatmul.mubr.bf16.gmra.mrb[192].mxu1 %v8355_v63  ;;  %v3180_v63 = vpack.c.bf16 %v3166_v31, %v3078_v34 }
 0x40b   : > { %4354 = vmatprep.mubr.bf16.mxu1 %v3178_v57 }
 0x410   : > { %4234 = vmatmul.mubr.bf16.gmra.mrb[196].mxu0 %v9089_v45  ;;  %v3222_v45 = vpack.c.bf16 %v3206_v12, %v3205_v35 }
 0x411   : > { %4241 = vmatprep.mubr.bf16.mxu0 %v3091_v22 }
 0x412   : > { %4355 = vmatmul.mubr.bf16.gmra.mrb[196].mxu1 %v8379_v3  ;;  %v3181_v3 = vpack.c.bf16 %v3168_v30, %v3080_v47 }
 0x413   : > { %4362 = vmatprep.mubr.bf16.mxu1 %v3179_v58 }
 0x418   : > { %4242 = vmatmul.mubr.bf16.gmra.mrb[200].mxu0 %v9090_v23 }
 0x419   : > { %4249 = vmatprep.mubr.bf16.mxu0 %v3092_v33 }
 0x41a   : > { %4363 = vmatmul.mubr.bf16.gmra.mrb[200].mxu1 %v8402_v16  ;;  %v3182_v16 = vpack.c.bf16 %v3170_v52, %v3082_v38 }
 0x41b   : > { %4370 = vmatprep.mubr.bf16.mxu1 %v3180_v63 }
 0x420   : > { %4250 = vmatmul.mubr.bf16.gmra.mrb[204].mxu0 %v9091_v49 }
 0x421   : > { %4257 = vmatprep.mubr.bf16.mxu0 %v3093_v60 }
 0x422   : > { %4371 = vmatmul.mubr.bf16.gmra.mrb[204].mxu1 %v8425_v4  ;;  %v3183_v4 = vpack.c.bf16 %v3172_v40, %v3084_v10 }
 0x423   : > { %4378 = vmatprep.mubr.bf16.mxu1 %v3181_v3  ;;  %v3208_v3 = vld [vmem:[#allocation2 + $0x82] sm:$0xff] }
 0x428   : > { %4258 = vmatmul.mubr.bf16.gmra.mrb[208].mxu0 %v9092_v11 }
 0x429   : > { %4265 = vmatprep.mubr.bf16.mxu0 %v3094_v13 }
 0x42a   : > { %4379 = vmatmul.mubr.bf16.gmra.mrb[208].mxu1 %v8448_v48  ;;  %v3196_v48 = vld [vmem:[#allocation2 + $0x22] sm:$0xff] }
 0x42b   : > { %4386 = vmatprep.mubr.bf16.mxu1 %v3182_v16  ;;  %v3217_v54 = vpack.c.bf16 %v3196_v48, %v3195_v55  ;;  %v3207_v16 = vld [vmem:[#allocation2 + $0x7a] sm:$0xff] }
 0x430   : > { %4266 = vmatmul.mubr.bf16.gmra.mrb[212].mxu0 %v9093_v43 }
 0x431   : > { %4273 = vmatprep.mubr.bf16.mxu0 %v3095_v39  ;;  %v3223_v39 = vpack.c.bf16 %v3208_v3, %v3207_v16 }
 0x432   : > { %4387 = vmatmul.mubr.bf16.gmra.mrb[212].mxu1 %v8469_v8  ;;  %v3197_v8 = vld [vmem:[#allocation2 + $0x2a] sm:$0xff] }
 0x433   : > { %4394 = vmatprep.mubr.bf16.mxu1 %v3183_v4  ;;  %v3218_v25 = vpack.c.bf16 %v3198_v27, %v3197_v8 }
 0x438   : > { %4274 = vmatmul.mubr.bf16.gmra.mrb[216].mxu0 %v9094_v36 }
 0x439   : > { %6616 = vmatprep.mubr.msk.bf16.mxu0 %vm7120_vm0, %v7119_v18 }
 0x43a   : > { %4395 = vmatmul.mubr.bf16.gmra.mrb[216].mxu1 %v3139_v20 }
 0x440   : > { %6617 = vmatmul.mubr.bf16.vlgmr.msra.gmra.mrb[220].mxu0 %v3217_v54 }
 0x441   : > { %6620 = vmatprep.mubr.msk.bf16.mxu0 %vm7120_vm0, %v7119_v18 }
 0x448   : > { %6621 = vmatmul.mubr.bf16.gmra.mrb[224].mxu0 %v3218_v25  ;;  %v3210_v25 = vld [vmem:[#allocation2 + $0x92] sm:$0xff] }
 0x449   : > { %6624 = vmatprep.mubr.msk.bf16.mxu0 %vm7120_vm0, %v7119_v18  ;;  %v3224_v37 = vpack.c.bf16 %v3210_v25, %v3209_v53 }
 0x450   : > { %6625 = vmatmul.mubr.bf16.gmra.mrb[228].mxu0 %v3219_v59 }
 0x451   : > { %6628 = vmatprep.mubr.msk.bf16.mxu0 %vm7120_vm0, %v7119_v18 }
 0x458   : > { %6629 = vmatmul.mubr.bf16.gmra.mrb[232].mxu0 %v3220_v51 }
 0x459   : > { %6632 = vmatprep.mubr.msk.bf16.mxu0 %vm7120_vm0, %v7119_v18 }
 0x460   : > { %6633 = vmatmul.mubr.bf16.gmra.mrb[236].mxu0 %v3221_v46 }
 0x461   : > { %6636 = vmatprep.mubr.msk.bf16.mxu0 %vm7120_vm0, %v7119_v18 }
 0x463   : > { %v6143_v32 = vpop.f32.mrb[132].mxu0 }
 0x464   : > { %v6144_v21 = vpop.f32.mrb[133].mxu0 }
 0x465   : > { %v6145_v61 = vadd.f32 %v6144_v21, %v6143_v32  ;;  %v6146_v5 = vpop.f32.mrb[134].mxu0  ;;  %v6225_v57 = vpop.f32.mrb[132].mxu1 }
 0x466   : > { %v6147_v28 = vpop.f32.mrb[135].mxu0  ;;  %v6226_v22 = vpop.f32.mrb[133].mxu1 }
 0x467   : > { %v3954_v58 = vadd.f32 %v6145_v61, %v8564_v26  ;;  %v6148_v34 = vadd.f32 %v6147_v28, %v6146_v5  ;;  %v6227_v31 = vadd.f32 %v6226_v22, %v6225_v57  ;;  %v6228_v33 = vpop.f32.mrb[134].mxu1 }
 0x468   : > { %v6229_v23 = vpop.f32.mrb[135].mxu1  ;;  %6637 = vmatmul.mubr.bf16.gmra.mrb[240].mxu0 %v3222_v45  ;;  %v3212_v45 = vld [vmem:[#allocation2 + $0xa2] sm:$0xff] }
 0x469   : > { %v3957_v63 = vadd.f32 %v6148_v34, %v8564_v26  ;;  %v8568_v47 = vadd.f32 %v6227_v31, %v3954_v58  ;;  %v6230_v30 = vadd.f32 %v6229_v23, %v6228_v33  ;;  %6640 = vmatprep.mubr.msk.bf16.mxu0 %vm7120_vm0, %v7119_v18  ;;  %v3211_v23 = vld [vmem:[#allocation2 + $0x9a] sm:$0xff] }
 0x46b   : > { %v8572_v60 = vadd.f32 %v6230_v30, %v3957_v63  ;;  %v6149_v49 = vpop.f32.mrb[136].mxu0 }
 0x46c   : > { %v6150_v38 = vpop.f32.mrb[137].mxu0 }
 0x46d   : > { %v6151_v52 = vadd.f32 %v6150_v38, %v6149_v49  ;;  %v6152_v13 = vpop.f32.mrb[138].mxu0  ;;  %v6231_v11 = vpop.f32.mrb[136].mxu1  ;;  %v3225_v49 = vpack.c.bf16 %v3212_v45, %v3211_v23 }
 0x46e   : > { %v6153_v10 = vpop.f32.mrb[139].mxu0  ;;  %v6232_v40 = vpop.f32.mrb[137].mxu1 }
 0x46f   : > { %v3962_v43 = vadd.f32 %v6151_v52, %v8564_v26  ;;  %v6154_v4 = vadd.f32 %v6153_v10, %v6152_v13  ;;  %v6233_v7 = vadd.f32 %v6232_v40, %v6231_v11  ;;  %v6234_v36 = vpop.f32.mrb[138].mxu1 }
 0x470   : > { %v6235_v20 = vpop.f32.mrb[139].mxu1  ;;  %6641 = vmatmul.mubr.bf16.gmra.mrb[244].mxu0 %v3223_v39 }
 0x471   : > { %v3965_v48 = vadd.f32 %v6154_v4, %v8564_v26  ;;  %v8576_v55 = vadd.f32 %v6233_v7, %v3962_v43  ;;  %v6236_v54 = vadd.f32 %v6235_v20, %v6234_v36  ;;  %6644 = vmatprep.mubr.msk.bf16.mxu0 %vm7120_vm0, %v7119_v18  ;;  %v3214_v4 = vld [vmem:[#allocation2 + $0xb2] sm:$0xff] }
 0x473   : > { %v8580_v27 = vadd.f32 %v6236_v54, %v3965_v48  ;;  %v6155_v8 = vpop.f32.mrb[140].mxu0  ;;  %v3213_v54 = vld [vmem:[#allocation2 + $0xaa] sm:$0xff] }
 0x474   : > { %v6156_v41 = vpop.f32.mrb[141].mxu0 }
 0x475   : > { %v6157_v24 = vadd.f32 %v6156_v41, %v6155_v8  ;;  %v6158_v59 = vpop.f32.mrb[142].mxu0  ;;  %v6237_v15 = vpop.f32.mrb[140].mxu1  ;;  %v3226_v41 = vpack.c.bf16 %v3214_v4, %v3213_v54 }
 0x476   : > { %v6159_v51 = vpop.f32.mrb[143].mxu0  ;;  %v6238_v62 = vpop.f32.mrb[141].mxu1 }
 0x477   : > { %v3970_v46 = vadd.f32 %v6157_v24, %v8564_v26  ;;  %v6160_v32 = vadd.f32 %v6159_v51, %v6158_v59  ;;  %v6239_v12 = vadd.f32 %v6238_v62, %v6237_v15  ;;  %v6240_v21 = vpop.f32.mrb[142].mxu1 }
 0x478   : > { %v6241_v61 = vpop.f32.mrb[143].mxu1  ;;  %6645 = vmatmul.mubr.bf16.gmra.mrb[248].mxu0 %v3224_v37 }
 0x479   : > { %v3973_v5 = vadd.f32 %v6160_v32, %v8564_v26  ;;  %v8584_v57 = vadd.f32 %v6239_v12, %v3970_v46  ;;  %v6242_v35 = vadd.f32 %v6241_v61, %v6240_v21  ;;  %6648 = vmatprep.mubr.msk.bf16.mxu0 %vm7120_vm0, %v7119_v18  ;;  %v3215_v21 = vld [vmem:[#allocation2 + $0xba] sm:$0xff]  ;;  %v3216_v61 = vld [vmem:[#allocation2 + $0xc2] sm:$0xff] }
 0x47b   : > { %v8588_v28 = vadd.f32 %v6242_v35, %v3973_v5  ;;  %v6161_v22 = vpop.f32.mrb[144].mxu0 }
 0x47c   : > { %v6162_v58 = vpop.f32.mrb[145].mxu0 }
 0x47d   : > { %v6163_v34 = vadd.f32 %v6162_v58, %v6161_v22  ;;  %v6164_v31 = vpop.f32.mrb[146].mxu0  ;;  %v6243_v33 = vpop.f32.mrb[144].mxu1 }
 0x47e   : > { %v6165_v63 = vpop.f32.mrb[147].mxu0  ;;  %v6244_v30 = vpop.f32.mrb[145].mxu1 }
 0x47f   : > { %v3978_v3 = vadd.f32 %v6163_v34, %v8564_v26  ;;  %v6166_v38 = vadd.f32 %v6165_v63, %v6164_v31  ;;  %v6245_v52 = vadd.f32 %v6244_v30, %v6243_v33  ;;  %v6246_v13 = vpop.f32.mrb[146].mxu1  ;;  %v3227_v31 = vpack.c.bf16 %v3216_v61, %v3215_v21 }
 0x480   : > { %v6247_v11 = vpop.f32.mrb[147].mxu1  ;;  %6649 = vmatmul.mubr.bf16.gmra.mrb[252].mxu0 %v3225_v49 }
 0x481   : > { %v3981_v16 = vadd.f32 %v6166_v38, %v8564_v26  ;;  %v8592_v10 = vadd.f32 %v6245_v52, %v3978_v3  ;;  %v6248_v40 = vadd.f32 %v6247_v11, %v6246_v13  ;;  %6652 = vmatprep.mubr.msk.bf16.mxu0 %vm7120_vm0, %v7119_v18 }
 0x483   : > { %v8596_v39 = vadd.f32 %v6248_v40, %v3981_v16  ;;  %v6167_v43 = vpop.f32.mrb[148].mxu0 }
 0x484   : > { %v6168_v7 = vpop.f32.mrb[149].mxu0 }
 0x485   : > { %v6169_v36 = vadd.f32 %v6168_v7, %v6167_v43  ;;  %v6170_v20 = vpop.f32.mrb[150].mxu0  ;;  %v6249_v48 = vpop.f32.mrb[148].mxu1 }
 0x486   : > { %v6171_v8 = vpop.f32.mrb[151].mxu0  ;;  %v6250_v25 = vpop.f32.mrb[149].mxu1 }
 0x487   : > { %v3986_v24 = vadd.f32 %v6169_v36, %v8564_v26  ;;  %v6172_v59 = vadd.f32 %v6171_v8, %v6170_v20  ;;  %v6251_v15 = vadd.f32 %v6250_v25, %v6249_v48  ;;  %v6252_v53 = vpop.f32.mrb[150].mxu1 }
 0x488   : > { %v6253_v51 = vpop.f32.mrb[151].mxu1  ;;  %6653 = vmatmul.mubr.bf16.gmra.mrb[0].mxu0 %v3226_v41 }
 0x489   : > { %v3989_v62 = vadd.f32 %v6172_v59, %v8564_v26  ;;  %v8600_v37 = vadd.f32 %v6251_v15, %v3986_v24  ;;  %v6254_v46 = vadd.f32 %v6253_v51, %v6252_v53  ;;  %6656 = vmatprep.mubr.msk.bf16.mxu0 %vm7120_vm0, %v7119_v18 }
 0x48b   : > { %v8604_v32 = vadd.f32 %v6254_v46, %v3989_v62  ;;  %v6173_v12 = vpop.f32.mrb[152].mxu0 }
 0x48c   : > { %v6174_v5 = vpop.f32.mrb[153].mxu0 }
 0x48d   : > { %v6175_v35 = vadd.f32 %v6174_v5, %v6173_v12  ;;  %v6176_v22 = vpop.f32.mrb[154].mxu0  ;;  %v6255_v45 = vpop.f32.mrb[152].mxu1 }
 0x48e   : > { %v6177_v58 = vpop.f32.mrb[155].mxu0  ;;  %v6256_v34 = vpop.f32.mrb[153].mxu1 }
 0x48f   : > { %v3994_v33 = vadd.f32 %v6175_v35, %v8564_v26  ;;  %v6178_v23 = vadd.f32 %v6177_v58, %v6176_v22  ;;  %v6257_v63 = vadd.f32 %v6256_v34, %v6255_v45  ;;  %v6258_v30 = vpop.f32.mrb[154].mxu1 }
 0x490   : > { %v6259_v49 = vpop.f32.mrb[155].mxu1  ;;  %6657 = vmatmul.mubr.bf16.gmra.mrb[4].mxu0 %v3227_v31 }
 0x491   : > { %v3997_v3 = vadd.f32 %v6178_v23, %v8564_v26  ;;  %v8608_v38 = vadd.f32 %v6257_v63, %v3994_v33  ;;  %v6260_v52 = vadd.f32 %v6259_v49, %v6258_v30 }
 0x493   : > { %v8610_v13 = vadd.f32 %v6260_v52, %v3997_v3  ;;  %v6179_v11 = vpop.f32.mrb[156].mxu0 }
 0x494   : > { %v6180_v16 = vpop.f32.mrb[157].mxu0 }
 0x495   : > { %v6181_v40 = vadd.f32 %v6180_v16, %v6179_v11  ;;  %v6182_v43 = vpop.f32.mrb[158].mxu0  ;;  %v6261_v4 = vpop.f32.mrb[156].mxu1 }
 0x496   : > { %v6183_v7 = vpop.f32.mrb[159].mxu0  ;;  %v6262_v36 = vpop.f32.mrb[157].mxu1 }
 0x497   : > { %v4002_v20 = vadd.f32 %v6181_v40, %v8564_v26  ;;  %v6184_v48 = vadd.f32 %v6183_v7, %v6182_v43  ;;  %v6263_v54 = vadd.f32 %v6262_v36, %v6261_v4  ;;  %v6264_v8 = vpop.f32.mrb[158].mxu1 }
 0x498   : > { %v6265_v25 = vpop.f32.mrb[159].mxu1 }
 0x499   : > { %v4005_v41 = vadd.f32 %v6184_v48, %v8564_v26  ;;  %v8614_v24 = vadd.f32 %v6263_v54, %v4002_v20  ;;  %v6266_v59 = vadd.f32 %v6265_v25, %v6264_v8 }
 0x49b   : > { %v8616_v15 = vadd.f32 %v6266_v59, %v4005_v41  ;;  %v6185_v53 = vpop.f32.mrb[160].mxu0  ;;  %v6951_v59 = vld [vmem:[%s9065_s3] ss:$16 sps:$4 sm:$0xff]  }
 0x49c   : > { %v6186_v51 = vpop.f32.mrb[161].mxu0 }
 0x49d   : > { %v6187_v62 = vadd.f32 %v6186_v51, %v6185_v53  ;;  %v6188_v46 = vpop.f32.mrb[162].mxu0  ;;  %v6267_v12 = vpop.f32.mrb[160].mxu1  ;;  %v6953_v53 = vld [vmem:[%s9065_s3 + $0x4] ss:$16 sps:$4 sm:$0xff]  }
 0x49e   : > { %v6189_v21 = vpop.f32.mrb[163].mxu0  ;;  %v6268_v61 = vpop.f32.mrb[161].mxu1  ;;  %4991 = vmatprep.subr.bf16.mxu1 %v6953_v53 }
 0x49f   : > { %v4010_v5 = vadd.f32 %v6187_v62, %v8564_v26  ;;  %v6190_v35 = vadd.f32 %v6189_v21, %v6188_v46  ;;  %v6269_v22 = vadd.f32 %v6268_v61, %v6267_v12  ;;  %v6270_v45 = vpop.f32.mrb[162].mxu1  ;;  %4992 = vmatpush1.bf16.msra.mxu1 %v6951_v59 }
 0x4a0   : > { %v6271_v58 = vpop.f32.mrb[163].mxu1 }
 0x4a1   : > { %v4013_v34 = vadd.f32 %v6190_v35, %v8564_v26  ;;  %v8620_v31 = vadd.f32 %v6269_v22, %v4010_v5  ;;  %v6272_v33 = vadd.f32 %v6271_v58, %v6270_v45 }
 0x4a3   : > { %v8622_v23 = vadd.f32 %v6272_v33, %v4013_v34  ;;  %v6191_v63 = vpop.f32.mrb[164].mxu0 }
 0x4a4   : > { %v6192_v30 = vpop.f32.mrb[165].mxu0 }
 0x4a5   : > { %v6193_v49 = vadd.f32 %v6192_v30, %v6191_v63  ;;  %v6194_v3 = vpop.f32.mrb[166].mxu0  ;;  %v6273_v52 = vpop.f32.mrb[164].mxu1 }
 0x4a6   : > { %v6195_v11 = vpop.f32.mrb[167].mxu0  ;;  %v6274_v16 = vpop.f32.mrb[165].mxu1 }
 0x4a7   : > { %v4018_v40 = vadd.f32 %v6193_v49, %v8564_v26  ;;  %v6196_v43 = vadd.f32 %v6195_v11, %v6194_v3  ;;  %v6275_v4 = vadd.f32 %v6274_v16, %v6273_v52  ;;  %v6276_v7 = vpop.f32.mrb[166].mxu1  ;;  %v6954_v3 = vld [vmem:[%s9065_s3 + $0x20] ss:$16 sps:$4 sm:$0xff]   ;;  %v6956_v52 = vld [vmem:[%s9065_s3 + $0x24] ss:$16 sps:$4 sm:$0xff]  }
 0x4a8   : > { %v6277_v36 = vpop.f32.mrb[167].mxu1  ;;  %4993 = vmatprep.subr.bf16.mxu1 %v6956_v52 }
 0x4a9   : > { %v4021_v20 = vadd.f32 %v6196_v43, %v8564_v26  ;;  %v8626_v48 = vadd.f32 %v6275_v4, %v4018_v40  ;;  %v6278_v54 = vadd.f32 %v6277_v36, %v6276_v7  ;;  %4994 = vmatpush1.bf16.msra.mxu1 %v6954_v3  ;;  %v6962_v3 = vld [vmem:[%s9065_s3 + $0xc] ss:$16 sps:$4 sm:$0xff]  }
 0x4aa   : > { %5032 = vmatprep.subr.bf16.mxu0 %v6962_v3  ;;  %v6972_v3 = vld [vmem:[%s9065_s3 + $0x48] ss:$16 sps:$4 sm:$0xff]  }
 0x4ab   : > { %v8628_v8 = vadd.f32 %v6278_v54, %v4021_v20  ;;  %v6197_v25 = vpop.f32.mrb[168].mxu0 }
 0x4ac   : > { %v6198_v41 = vpop.f32.mrb[169].mxu0 }
 0x4ad   : > { %v6199_v51 = vadd.f32 %v6198_v41, %v6197_v25  ;;  %v6200_v62 = vpop.f32.mrb[170].mxu0  ;;  %v6279_v46 = vpop.f32.mrb[168].mxu1 }
 0x4ae   : > { %v6201_v12 = vpop.f32.mrb[171].mxu0  ;;  %v6280_v21 = vpop.f32.mrb[169].mxu1 }
 0x4af   : > { %v4026_v61 = vadd.f32 %v6199_v51, %v8564_v26  ;;  %v6202_v5 = vadd.f32 %v6201_v12, %v6200_v62  ;;  %v6281_v35 = vadd.f32 %v6280_v21, %v6279_v46  ;;  %v6282_v22 = vpop.f32.mrb[170].mxu1 }
 0x4b0   : > { %v6283_v45 = vpop.f32.mrb[171].mxu1 }
 0x4b1   : > { %v4029_v58 = vadd.f32 %v6202_v5, %v8564_v26  ;;  %v8638_v34 = vadd.f32 %v6281_v35, %v4026_v61  ;;  %v6284_v33 = vadd.f32 %v6283_v45, %v6282_v22  ;;  %v6957_v22 = vld [vmem:[%s9065_s3 + $0x40] ss:$16 sps:$4 sm:$0xff]  }
 0x4b3   : > { %v8640_v63 = vadd.f32 %v6284_v33, %v4029_v58  ;;  %v6203_v30 = vpop.f32.mrb[172].mxu0 }
 0x4b4   : > { %v6204_v49 = vpop.f32.mrb[173].mxu0 }
 0x4b5   : > { %v6205_v11 = vadd.f32 %v6204_v49, %v6203_v30  ;;  %v6206_v16 = vpop.f32.mrb[174].mxu0  ;;  %v6285_v40 = vpop.f32.mrb[172].mxu1  ;;  %v6960_v49 = vld [vmem:[%s9065_s3 + $0x8] ss:$16 sps:$4 sm:$0xff]  }
 0x4b6   : > { %v6207_v43 = vpop.f32.mrb[175].mxu0  ;;  %v6286_v4 = vpop.f32.mrb[173].mxu1  ;;  %5033 = vmatpush1.bf16.msra.mxu0 %v6960_v49 }
 0x4b7   : > { %v4034_v7 = vadd.f32 %v6205_v11, %v8564_v26  ;;  %v6208_v36 = vadd.f32 %v6207_v43, %v6206_v16  ;;  %v6287_v20 = vadd.f32 %v6286_v4, %v6285_v40  ;;  %v6288_v54 = vpop.f32.mrb[174].mxu1 }
 0x4b8   : > { %v6289_v25 = vpop.f32.mrb[175].mxu1 }
 0x4b9   : > { %v4037_v41 = vadd.f32 %v6208_v36, %v8564_v26  ;;  %v8650_v59 = vadd.f32 %v6287_v20, %v4034_v7  ;;  %v6290_v53 = vadd.f32 %v6289_v25, %v6288_v54  ;;  %v6959_v26 = vld [vmem:[%s9065_s3 + $0x44] ss:$16 sps:$4 sm:$0xff]  }
 0x4ba   : > { %4995 = vmatprep.subr.bf16.mxu1 %v6959_v26 }
 0x4bb   : > { %v8652_v51 = vadd.f32 %v6290_v53, %v4037_v41  ;;  %v6307_v62 = vpop.f32.mrb[176].mxu0  ;;  %4996 = vmatpush1.bf16.msra.mxu1 %v6957_v22 }
 0x4bc   : > { %v6308_v46 = vpop.f32.mrb[177].mxu0 }
 0x4bd   : > { %v6309_v12 = vadd.f32 %v6308_v46, %v6307_v62  ;;  %v6310_v21 = vpop.f32.mrb[178].mxu0  ;;  %v6389_v61 = vpop.f32.mrb[176].mxu1 }
 0x4be   : > { %v6311_v5 = vpop.f32.mrb[179].mxu0  ;;  %v6390_v35 = vpop.f32.mrb[177].mxu1 }
 0x4bf   : > { %v4196_v45 = vadd.f32 %v6309_v12, %v8568_v47  ;;  %v6312_v58 = vadd.f32 %v6311_v5, %v6310_v21  ;;  %v6391_v33 = vadd.f32 %v6390_v35, %v6389_v61  ;;  %v6392_v30 = vpop.f32.mrb[178].mxu1  ;;  %v6968_v5 = vld [vmem:[%s9065_s3 + $0x2c] ss:$16 sps:$4 sm:$0xff]   ;;  %v6966_v35 = vld [vmem:[%s9065_s3 + $0x28] ss:$16 sps:$4 sm:$0xff]  }
 0x4c0   : > { %v6393_v52 = vpop.f32.mrb[179].mxu1  ;;  %5034 = vmatprep.subr.bf16.mxu0 %v6968_v5 }
 0x4c1   : > { %v4199_v11 = vadd.f32 %v6312_v58, %v8572_v60  ;;  %v6394_v16 = vadd.f32 %v6393_v52, %v6392_v30  ;;  %v8668_v40 = vadd.f32 %v6391_v33, %v4196_v45  ;;  %5035 = vmatpush1.bf16.msra.mxu0 %v6966_v35  ;;  %v6974_v33 = vld [vmem:[%s9065_s3 + $0x4c] ss:$16 sps:$4 sm:$0xff]   ;;  %v6977_v35 = vld [vmem:[%s9065_s3 + $0xa4] ss:$16 sps:$4 sm:$0xff]  }
 0x4c2   : > { %5036 = vmatprep.subr.bf16.mxu0 %v6974_v33 }
 0x4c3   : > { %v6313_v47 = vpop.f32.mrb[180].mxu0  ;;  %v8670_v43 = vadd.f32 %v6394_v16, %v4199_v11 }
 0x4c4   : > { %v6314_v4 = vpop.f32.mrb[181].mxu0 }
 0x4c5   : > { %v6315_v7 = vadd.f32 %v6314_v4, %v6313_v47  ;;  %v6316_v36 = vpop.f32.mrb[182].mxu0  ;;  %v6395_v20 = vpop.f32.mrb[180].mxu1  ;;  %5037 = vmatpush1.bf16.msra.mxu0 %v6972_v3 }
 0x4c6   : > { %v6317_v54 = vpop.f32.mrb[183].mxu0  ;;  %v6396_v25 = vpop.f32.mrb[181].mxu1 }
 0x4c7   : > { %v4204_v41 = vadd.f32 %v6315_v7, %v8576_v55  ;;  %v6318_v53 = vadd.f32 %v6317_v54, %v6316_v36  ;;  %v6397_v62 = vadd.f32 %v6396_v25, %v6395_v20  ;;  %v6398_v60 = vpop.f32.mrb[182].mxu1  ;;  %v6965_v54 = vld [vmem:[%s9065_s3 + $0x64] ss:$16 sps:$4 sm:$0xff]   ;;  %v6980_v25 = vld [vmem:[%s9065_s3 + $0x6c] ss:$16 sps:$4 sm:$0xff]  }
 0x4c8   : > { %v6399_v46 = vpop.f32.mrb[183].mxu1  ;;  %4997 = vmatprep.subr.bf16.mxu1 %v6965_v54  ;;  %5038 = vmatprep.subr.bf16.mxu0 %v6980_v25  ;;  %v6981_v25 = vld [vmem:[%s9065_s3 + $0xc0] ss:$16 sps:$4 sm:$0xff]  }
 0x4c9   : > { %v4207_v12 = vadd.f32 %v6318_v53, %v8580_v27  ;;  %v6400_v21 = vadd.f32 %v6399_v46, %v6398_v60  ;;  %v8674_v61 = vadd.f32 %v6397_v62, %v4204_v41  ;;  %v6971_v41 = vld [vmem:[%s9065_s3 + $0x84] ss:$16 sps:$4 sm:$0xff]   ;;  %v6969_v60 = vld [vmem:[%s9065_s3 + $0x80] ss:$16 sps:$4 sm:$0xff]   ;;  %v6978_v46 = vld [vmem:[%s9065_s3 + $0x68] ss:$16 sps:$4 sm:$0xff]  }
 0x4ca   : > { %5039 = vmatpush1.bf16.msra.mxu0 %v6978_v46 }
 0x4cb   : > { %v6319_v22 = vpop.f32.mrb[184].mxu0  ;;  %v8682_v26 = vadd.f32 %v6400_v21, %v4207_v12 }
 0x4cc   : > { %v6320_v55 = vpop.f32.mrb[185].mxu0 }
 0x4cd   : > { %v6321_v45 = vadd.f32 %v6320_v55, %v6319_v22  ;;  %v6322_v58 = vpop.f32.mrb[186].mxu0  ;;  %v6401_v27 = vpop.f32.mrb[184].mxu1 }
 0x4ce   : > { %v6323_v30 = vpop.f32.mrb[187].mxu0  ;;  %v6402_v49 = vpop.f32.mrb[185].mxu1 }
 0x4cf   : > { %v4212_v52 = vadd.f32 %v6321_v45, %v8584_v57  ;;  %v6324_v11 = vadd.f32 %v6323_v30, %v6322_v58  ;;  %v6403_v16 = vadd.f32 %v6402_v49, %v6401_v27  ;;  %v6404_v47 = vpop.f32.mrb[186].mxu1  ;;  %v6963_v57 = vld [vmem:[%s9065_s3 + $0x60] ss:$16 sps:$4 sm:$0xff]   ;;  %v6984_v45 = vld [vmem:[%s9065_s3 + $0x88] ss:$16 sps:$4 sm:$0xff]  }
 0x4d0   : > { %v6405_v4 = vpop.f32.mrb[187].mxu1  ;;  %4998 = vmatpush1.bf16.msra.mxu1 %v6963_v57  ;;  %v6986_v58 = vld [vmem:[%s9065_s3 + $0x8c] ss:$16 sps:$4 sm:$0xff]  }
 0x4d1   : > { %v4215_v7 = vadd.f32 %v6324_v11, %v8588_v28  ;;  %v6406_v36 = vadd.f32 %v6405_v4, %v6404_v47  ;;  %v8692_v20 = vadd.f32 %v6403_v16, %v4212_v52  ;;  %4999 = vmatprep.subr.bf16.mxu1 %v6971_v41  ;;  %v6975_v52 = vld [vmem:[%s9065_s3 + $0xa0] ss:$16 sps:$4 sm:$0xff]   ;;  %5040 = vmatprep.subr.bf16.mxu0 %v6986_v58  ;;  %v6992_v4 = vld [vmem:[%s9065_s3 + $0xac] ss:$16 sps:$4 sm:$0xff]  }
 0x4d2   : > { %5041 = vmatpush1.bf16.msra.mxu0 %v6984_v45  ;;  %v6987_v58 = vld [vmem:[%s9065_s3 + $0xe0] ss:$16 sps:$4 sm:$0xff]  }
 0x4d3   : > { %v6325_v28 = vpop.f32.mrb[188].mxu0  ;;  %v8706_v53 = vadd.f32 %v6406_v36, %v4215_v7  ;;  %v6990_v7 = vld [vmem:[%s9065_s3 + $0xa8] ss:$16 sps:$4 sm:$0xff]   ;;  %5042 = vmatprep.subr.bf16.mxu0 %v6992_v4 }
 0x4d4   : > { %v6326_v62 = vpop.f32.mrb[189].mxu0  ;;  %5000 = vmatpush1.bf16.msra.mxu1 %v6969_v60  ;;  %v6998_v60 = vld [vmem:[%s9065_s3 + $0xcc] ss:$16 sps:$4 sm:$0xff]  }
 0x4d5   : > { %v6327_v12 = vadd.f32 %v6326_v62, %v6325_v28  ;;  %v6328_v21 = vpop.f32.mrb[190].mxu0  ;;  %v6407_v5 = vpop.f32.mrb[188].mxu1  ;;  %5001 = vmatprep.subr.bf16.mxu1 %v6977_v35  ;;  %v6989_v62 = vld [vmem:[%s9065_s3 + $0xe4] ss:$16 sps:$4 sm:$0xff]  }
 0x4d6   : > { %v6329_v22 = vpop.f32.mrb[191].mxu0  ;;  %v6408_v55 = vpop.f32.mrb[189].mxu1  ;;  %5043 = vmatpush1.bf16.msra.mxu0 %v6990_v7 }
 0x4d7   : > { %v4220_v27 = vadd.f32 %v6327_v12, %v8592_v10  ;;  %v6330_v33 = vadd.f32 %v6329_v22, %v6328_v21  ;;  %v6409_v30 = vadd.f32 %v6408_v55, %v6407_v5  ;;  %v6410_v49 = vpop.f32.mrb[190].mxu1  ;;  %v6983_v10 = vld [vmem:[%s9065_s3 + $0xc4] ss:$16 sps:$4 sm:$0xff]   ;;  %v6996_v21 = vld [vmem:[%s9065_s3 + $0xc8] ss:$16 sps:$4 sm:$0xff]   ;;  %5044 = vmatprep.subr.bf16.mxu0 %v6998_v60 }
 0x4d8   : > { %v6411_v3 = vpop.f32.mrb[191].mxu1  ;;  %5002 = vmatpush1.bf16.msra.mxu1 %v6975_v52 }
 0x4d9   : > { %v4223_v11 = vadd.f32 %v6330_v33, %v8596_v39  ;;  %v6412_v16 = vadd.f32 %v6411_v3, %v6410_v49  ;;  %v8728_v47 = vadd.f32 %v6409_v30, %v4220_v27  ;;  %5003 = vmatprep.subr.bf16.mxu1 %v6983_v10  ;;  %v7004_v49 = vld [vmem:[%s9065_s3 + $0xec] ss:$16 sps:$4 sm:$0xff]   ;;  %v7002_v3 = vld [vmem:[%s9065_s3 + $0xe8] ss:$16 sps:$4 sm:$0xff]  }
 0x4da   : > { %5045 = vmatpush1.bf16.msra.mxu0 %v6996_v21  ;;  %v6999_v21 = vld [vmem:[%s9065_s3 + $0x120] ss:$16 sps:$4 sm:$0xff]  }
 0x4db   : > { %v6331_v36 = vpop.f32.mrb[192].mxu0  ;;  %v8739_v54 = vadd.f32 %v6412_v16, %v4223_v11  ;;  %5046 = vmatprep.subr.bf16.mxu0 %v7004_v49  ;;  %v6993_v16 = vld [vmem:[%s9065_s3 + $0x100] ss:$16 sps:$4 sm:$0xff]  }
 0x4dc   : > { %v6332_v39 = vpop.f32.mrb[193].mxu0  ;;  %5004 = vmatpush1.bf16.msra.mxu1 %v6981_v25 }
 0x4dd   : > { %v6333_v57 = vadd.f32 %v6332_v39, %v6331_v36  ;;  %v6334_v41 = vpop.f32.mrb[194].mxu0  ;;  %v6413_v28 = vpop.f32.mrb[192].mxu1  ;;  %5005 = vmatprep.subr.bf16.mxu1 %v6989_v62  ;;  %v7001_v36 = vld [vmem:[%s9065_s3 + $0x124] ss:$16 sps:$4 sm:$0xff]   ;;  %v7010_v39 = vld [vmem:[%s9065_s3 + $0x10c] ss:$16 sps:$4 sm:$0xff]  }
 0x4de   : > { %v6335_v46 = vpop.f32.mrb[195].mxu0  ;;  %v6414_v12 = vpop.f32.mrb[193].mxu1  ;;  %5047 = vmatpush1.bf16.msra.mxu0 %v7002_v3 }
 0x4df   : > { %v4228_v5 = vadd.f32 %v6333_v57, %v8600_v37  ;;  %v6336_v35 = vadd.f32 %v6335_v46, %v6334_v41  ;;  %v6415_v22 = vadd.f32 %v6414_v12, %v6413_v28  ;;  %v6416_v55 = vpop.f32.mrb[194].mxu1  ;;  %v6995_v37 = vld [vmem:[%s9065_s3 + $0x104] ss:$16 sps:$4 sm:$0xff]   ;;  %v7008_v41 = vld [vmem:[%s9065_s3 + $0x108] ss:$16 sps:$4 sm:$0xff]   ;;  %5048 = vmatprep.subr.bf16.mxu0 %v7010_v39 }
 0x4e0   : > { %v6417_v45 = vpop.f32.mrb[195].mxu1  ;;  %5006 = vmatpush1.bf16.msra.mxu1 %v6987_v58 }
 0x4e1   : > { %v4231_v27 = vadd.f32 %v6336_v35, %v8604_v32  ;;  %v6418_v33 = vadd.f32 %v6417_v45, %v6416_v55  ;;  %v8758_v30 = vadd.f32 %v6415_v22, %v4228_v5  ;;  %5007 = vmatprep.subr.bf16.mxu1 %v6995_v37  ;;  %v7016_v55 = vld [vmem:[%s9065_s3 + $0x12c] ss:$16 sps:$4 sm:$0xff]   ;;  %v7014_v45 = vld [vmem:[%s9065_s3 + $0x128] ss:$16 sps:$4 sm:$0xff]  }
 0x4e2   : > { %5049 = vmatpush1.bf16.msra.mxu0 %v7008_v41 }
 0x4e3   : > { %v6337_v52 = vpop.f32.mrb[196].mxu0  ;;  %v8769_v11 = vadd.f32 %v6418_v33, %v4231_v27  ;;  %5050 = vmatprep.subr.bf16.mxu0 %v7016_v55  ;;  %v7005_v33 = vld [vmem:[%s9065_s3 + $0x140] ss:$16 sps:$4 sm:$0xff]   ;;  %v7022_v55 = vld [vmem:[%s9065_s3 + $0x184] ss:$16 sps:$4 sm:$0xff]  }
 0x4e4   : > { %v6338_v32 = vpop.f32.mrb[197].mxu0  ;;  %5008 = vmatpush1.bf16.msra.mxu1 %v6993_v16 }
 0x4e5   : > { %v6339_v10 = vadd.f32 %v6338_v32, %v6337_v52  ;;  %v6340_v4 = vpop.f32.mrb[198].mxu0  ;;  %v6419_v7 = vpop.f32.mrb[196].mxu1  ;;  %5009 = vmatprep.subr.bf16.mxu1 %v7001_v36  ;;  %v7019_v52 = vld [vmem:[%s9065_s3 + $0x14c] ss:$16 sps:$4 sm:$0xff]  }
 0x4e6   : > { %v6341_v25 = vpop.f32.mrb[199].mxu0  ;;  %v6420_v57 = vpop.f32.mrb[197].mxu1  ;;  %5051 = vmatpush1.bf16.msra.mxu0 %v7014_v45  ;;  %v7031_v45 = vld [vmem:[%s9065_s3 + $0x18c] ss:$16 sps:$4 sm:$0xff]  }
 0x4e7   : > { %v4236_v28 = vadd.f32 %v6339_v10, %v8608_v38  ;;  %v6342_v62 = vadd.f32 %v6341_v25, %v6340_v4  ;;  %v6421_v60 = vadd.f32 %v6420_v57, %v6419_v7  ;;  %v6422_v46 = vpop.f32.mrb[198].mxu1  ;;  %v7007_v38 = vld [vmem:[%s9065_s3 + $0x144] ss:$16 sps:$4 sm:$0xff]   ;;  %v7017_v10 = vld [vmem:[%s9065_s3 + $0x148] ss:$16 sps:$4 sm:$0xff]   ;;  %5052 = vmatprep.subr.bf16.mxu0 %v7019_v52 }
 0x4e8   : > { %v6423_v12 = vpop.f32.mrb[199].mxu1  ;;  %5010 = vmatpush1.bf16.msra.mxu1 %v6999_v21 }
 0x4e9   : > { %v4239_v5 = vadd.f32 %v6342_v62, %v8610_v13  ;;  %v6424_v35 = vadd.f32 %v6423_v12, %v6422_v46  ;;  %v8788_v22 = vadd.f32 %v6421_v60, %v4236_v28  ;;  %5011 = vmatprep.subr.bf16.mxu1 %v7007_v38  ;;  %v7013_v62 = vld [vmem:[%s9065_s3 + $0x164] ss:$16 sps:$4 sm:$0xff]   ;;  %v7025_v60 = vld [vmem:[%s9065_s3 + $0x16c] ss:$16 sps:$4 sm:$0xff]  }
 0x4ea   : > { %5053 = vmatpush1.bf16.msra.mxu0 %v7017_v10 }
 0x4eb   : > { %v6343_v58 = vpop.f32.mrb[200].mxu0  ;;  %v8799_v27 = vadd.f32 %v6424_v35, %v4239_v5  ;;  %5054 = vmatprep.subr.bf16.mxu0 %v7025_v60  ;;  %v7034_v60 = vld [vmem:[%s9065_s3 + $0x1c4] ss:$16 sps:$4 sm:$0xff]  }
 0x4ec   : > { %v6344_v13 = vpop.f32.mrb[201].mxu0  ;;  %5012 = vmatpush1.bf16.msra.mxu1 %v7005_v33  ;;  %v7020_v33 = vld [vmem:[%s9065_s3 + $0x180] ss:$16 sps:$4 sm:$0xff]  }
 0x4ed   : > { %v6345_v37 = vadd.f32 %v6344_v13, %v6343_v58  ;;  %v6346_v49 = vpop.f32.mrb[202].mxu0  ;;  %v6425_v3 = vpop.f32.mrb[200].mxu1  ;;  %5013 = vmatprep.subr.bf16.mxu1 %v7013_v62  ;;  %v7032_v62 = vld [vmem:[%s9065_s3 + $0x1c0] ss:$16 sps:$4 sm:$0xff]  }
 0x4ee   : > { %v6347_v32 = vpop.f32.mrb[203].mxu0  ;;  %v6426_v16 = vpop.f32.mrb[201].mxu1 }
 0x4ef   : > { %v4244_v4 = vadd.f32 %v6345_v37, %v8614_v24  ;;  %v6348_v7 = vadd.f32 %v6347_v32, %v6346_v49  ;;  %v6427_v36 = vadd.f32 %v6426_v16, %v6425_v3  ;;  %v6428_v39 = vpop.f32.mrb[202].mxu1  ;;  %v7011_v24 = vld [vmem:[%s9065_s3 + $0x160] ss:$16 sps:$4 sm:$0xff]   ;;  %v7029_v37 = vld [vmem:[%s9065_s3 + $0x188] ss:$16 sps:$4 sm:$0xff]  }
 0x4f0   : > { %v6429_v25 = vpop.f32.mrb[203].mxu1  ;;  %5014 = vmatpush1.bf16.msra.mxu1 %v7011_v24 }
 0x4f1   : > { %v4247_v57 = vadd.f32 %v6348_v7, %v8616_v15  ;;  %v6430_v41 = vadd.f32 %v6429_v25, %v6428_v39  ;;  %v8812_v28 = vadd.f32 %v6427_v36, %v4244_v4  ;;  %v7023_v15 = vld [vmem:[%s9065_s3 + $0x168] ss:$16 sps:$4 sm:$0xff]   ;;  %5015 = vmatprep.subr.bf16.mxu1 %v7022_v55  ;;  %v7028_v36 = vld [vmem:[%s9065_s3 + $0x1a4] ss:$16 sps:$4 sm:$0xff]   ;;  %v7026_v39 = vld [vmem:[%s9065_s3 + $0x1a0] ss:$16 sps:$4 sm:$0xff]  }
 0x4f2   : > { %5055 = vmatpush1.bf16.msra.mxu0 %v7023_v15  ;;  %v7043_v55 = vld [vmem:[%s9065_s3 + $0x1e4] ss:$16 sps:$4 sm:$0xff]  }
 0x4f3   : > { %v6349_v46 = vpop.f32.mrb[204].mxu0  ;;  %v8826_v12 = vadd.f32 %v6430_v41, %v4247_v57  ;;  %5056 = vmatprep.subr.bf16.mxu0 %v7031_v45 }
 0x4f4   : > { %v6350_v21 = vpop.f32.mrb[205].mxu0  ;;  %5016 = vmatpush1.bf16.msra.mxu1 %v7020_v33 }
 0x4f5   : > { %v6351_v5 = vadd.f32 %v6350_v21, %v6349_v46  ;;  %v6352_v35 = vpop.f32.mrb[206].mxu0  ;;  %v6431_v38 = vpop.f32.mrb[204].mxu1  ;;  %5017 = vmatprep.subr.bf16.mxu1 %v7028_v36  ;;  %v7040_v21 = vld [vmem:[%s9065_s3 + $0x1cc] ss:$16 sps:$4 sm:$0xff]  }
 0x4f6   : > { %v6353_v58 = vpop.f32.mrb[207].mxu0  ;;  %v6432_v13 = vpop.f32.mrb[205].mxu1  ;;  %5057 = vmatpush1.bf16.msra.mxu0 %v7029_v37  ;;  %v7046_v37 = vld [vmem:[%s9065_s3 + $0x1ec] ss:$16 sps:$4 sm:$0xff]  }
 0x4f7   : > { %v4252_v49 = vadd.f32 %v6351_v5, %v8620_v31  ;;  %v6354_v3 = vadd.f32 %v6353_v58, %v6352_v35  ;;  %v6433_v52 = vadd.f32 %v6432_v13, %v6431_v38  ;;  %v6434_v32 = vpop.f32.mrb[206].mxu1  ;;  %v7037_v31 = vld [vmem:[%s9065_s3 + $0x1ac] ss:$16 sps:$4 sm:$0xff]   ;;  %v7038_v38 = vld [vmem:[%s9065_s3 + $0x1c8] ss:$16 sps:$4 sm:$0xff]  }
 0x4f8   : > { %v6435_v16 = vpop.f32.mrb[207].mxu1  ;;  %5058 = vmatprep.subr.bf16.mxu0 %v7037_v31  ;;  %5018 = vmatpush1.bf16.msra.mxu1 %v7026_v39 }
 0x4f9   : > { %v4255_v10 = vadd.f32 %v6354_v3, %v8622_v23  ;;  %v6436_v4 = vadd.f32 %v6435_v16, %v6434_v32  ;;  %v8842_v7 = vadd.f32 %v6433_v52, %v4252_v49  ;;  %v7035_v23 = vld [vmem:[%s9065_s3 + $0x1a8] ss:$16 sps:$4 sm:$0xff]   ;;  %5019 = vmatprep.subr.bf16.mxu1 %v7034_v60  ;;  %v7041_v3 = vld [vmem:[%s9065_s3 + $0x1e0] ss:$16 sps:$4 sm:$0xff]  }
 0x4fa   : > { %5059 = vmatpush1.bf16.msra.mxu0 %v7035_v23  ;;  %v4603_v52 = vld [vmem:[#allocation4] sm:$0x3] }
 0x4fb   : > { %v6355_v25 = vpop.f32.mrb[208].mxu0  ;;  %v8856_v57 = vadd.f32 %v6436_v4, %v4255_v10  ;;  %5060 = vmatprep.subr.bf16.mxu0 %v7040_v21  ;;  %v7044_v4 = vld [vmem:[%s9065_s3 + $0x1e8] ss:$16 sps:$4 sm:$0xff]  }
 0x4fc   : > { %v6356_v41 = vpop.f32.mrb[209].mxu0  ;;  %5020 = vmatpush1.bf16.msra.mxu1 %v7032_v62 }
 0x4fd   : > { %v6357_v24 = vadd.f32 %v6356_v41, %v6355_v25  ;;  %v6358_v15 = vpop.f32.mrb[210].mxu0  ;;  %v6437_v46 = vpop.f32.mrb[208].mxu1  ;;  %5021 = vmatprep.subr.bf16.mxu1 %v7043_v55 }
 0x4fe   : > { %v6359_v5 = vpop.f32.mrb[211].mxu0  ;;  %v6438_v35 = vpop.f32.mrb[209].mxu1  ;;  %5061 = vmatpush1.bf16.msra.mxu0 %v7038_v38 }
 0x4ff   : > { %v4260_v45 = vadd.f32 %v6357_v24, %v8626_v48  ;;  %v6360_v58 = vadd.f32 %v6359_v5, %v6358_v15  ;;  %v6439_v13 = vadd.f32 %v6438_v35, %v6437_v46  ;;  %v6440_v33 = vpop.f32.mrb[210].mxu1  ;;  %v4606_v48 = vpack.c.bf16 %v4603_v52, %v4603_v52  ;;  %5062 = vmatprep.subr.bf16.mxu0 %v7046_v37 }
 0x500   : > { %v6441_v49 = vpop.f32.mrb[211].mxu1  ;;  %5022 = vmatpush1.bf16.msra.mxu1 %v7041_v3 }
 0x501   : > { %v4263_v32 = vadd.f32 %v6360_v58, %v8628_v8  ;;  %v6442_v16 = vadd.f32 %v6441_v49, %v6440_v33  ;;  %v8881_v10 = vadd.f32 %v6439_v13, %v4260_v45  ;;  %5023 = vmatprep.mubr.bf16.mxu1 %v4606_v48  ;;  %5064 = vmatprep.mubr.bf16.mxu0 %v4606_v48 }
 0x502   : > { %6660 = vmatprep.subr.bf16.mxu1 %v7119_v18  ;;  %5063 = vmatpush1.bf16.msra.mxu0 %v7044_v4 }
 0x503   : > { %v6361_v36 = vpop.f32.mrb[212].mxu0  ;;  %v8886_v31 = vadd.f32 %v6442_v16, %v4263_v32 }
 0x504   : > { %v6362_v39 = vpop.f32.mrb[213].mxu0 }
 0x505   : > { %v6363_v23 = vadd.f32 %v6362_v39, %v6361_v36  ;;  %v6364_v8 = vpop.f32.mrb[214].mxu0  ;;  %v6443_v25 = vpop.f32.mrb[212].mxu1 }
 0x506   : > { %v6365_v41 = vpop.f32.mrb[215].mxu0  ;;  %v6444_v62 = vpop.f32.mrb[213].mxu1 }
 0x507   : > { %v4268_v60 = vadd.f32 %v6363_v23, %v8638_v34  ;;  %v6366_v24 = vadd.f32 %v6365_v41, %v6364_v8  ;;  %v6445_v15 = vadd.f32 %v6444_v62, %v6443_v25  ;;  %v6446_v46 = vpop.f32.mrb[214].mxu1 }
 0x508   : > { %v6447_v21 = vpop.f32.mrb[215].mxu1 }
 0x509   : > { %v4271_v5 = vadd.f32 %v6366_v24, %v8640_v63  ;;  %v6448_v35 = vadd.f32 %v6447_v21, %v6446_v46  ;;  %v8891_v38 = vadd.f32 %v6445_v15, %v4268_v60 }
 0x50b   : > { %v6367_v55 = vpop.f32.mrb[216].mxu0  ;;  %v8893_v45 = vadd.f32 %v6448_v35, %v4271_v5 }
 0x50c   : > { %v6368_v58 = vpop.f32.mrb[217].mxu0 }
 0x50d   : > { %v6369_v13 = vadd.f32 %v6368_v58, %v6367_v55  ;;  %v6370_v33 = vpop.f32.mrb[218].mxu0  ;;  %v6449_v37 = vpop.f32.mrb[216].mxu1 }
 0x50e   : > { %v6371_v49 = vpop.f32.mrb[219].mxu0  ;;  %v6450_v3 = vpop.f32.mrb[217].mxu1 }
 0x50f   : > { %v4276_v34 = vadd.f32 %v6369_v13, %v8650_v59  ;;  %v6372_v52 = vadd.f32 %v6371_v49, %v6370_v33  ;;  %v6451_v32 = vadd.f32 %v6450_v3, %v6449_v37  ;;  %v6452_v16 = vpop.f32.mrb[218].mxu1 }
 0x510   : > { %v6453_v48 = vpop.f32.mrb[219].mxu1 }
 0x511   : > { %v4279_v63 = vadd.f32 %v6372_v52, %v8652_v51  ;;  %v6454_v4 = vadd.f32 %v6453_v48, %v6452_v16  ;;  %v8897_v36 = vadd.f32 %v6451_v32, %v4276_v34  ;;  %v9097_v16 = vunpack.i.l.bf16 %v8195_v50 }
 0x513   : > { %v4437_v39 = vpop.f32.mrb[220].mxu0  ;;  %v8899_v23 = vadd.f32 %v6454_v4, %v4279_v63 }
 0x514   : > { %v4438_v8 = vadd.f32 %v4437_v39, %v8668_v40  ;;  %v6618_v25 = vpop.f32.mrb[221].mxu0 }
 0x515   : > { %v4440_v41 = vpop.f32.mrb[222].mxu0 }
 0x516   : > { %v4441_v62 = vadd.f32 %v4440_v41, %v8670_v43  ;;  %v6619_v60 = vpop.f32.mrb[223].mxu0  ;;  %v4524_v35 = vmax.f32 %v4438_v8, 0.0 }
 0x517   : > { %v9098_v60 = vunpack.i.h.bf16 %v8145_v17 }
 0x518   : > { %v4525_v40 = vmax.f32 %v4441_v62, 0.0  ;;  %v4546_v49 = vmul.f32 %v4524_v35, %v8149_v29 }
 0x51b   : > { %v4445_v59 = vpop.f32.mrb[224].mxu0 }
 0x51c   : > { %v4446_v24 = vadd.f32 %v4445_v59, %v8674_v61  ;;  %v6622_v15 = vpop.f32.mrb[225].mxu0  ;;  %v9095_v61 = vunpack.i.h.bf16 %v8160_v44 }
 0x51d   : > { %v4448_v46 = vpop.f32.mrb[226].mxu0  ;;  %v9099_v15 = vunpack.i.h.bf16 %v8195_v50  ;;  %v9102_v50 = vunpack.i.h.bf16 %v8241_v14 }
 0x51e   : > { %v4449_v51 = vadd.f32 %v4448_v46, %v8682_v26  ;;  %v6623_v21 = vpop.f32.mrb[227].mxu0  ;;  %v9096_v26 = vunpack.i.l.bf16 %v8145_v17  ;;  %v4526_v63 = vmax.f32 %v4446_v24, 0.0 }
 0x520   : > { %v4547_v52 = vmul.f32 %v9096_v26, %v4525_v40  ;;  %v4527_v25 = vmax.f32 %v4449_v51, 0.0  ;;  %v4548_v59 = vmul.f32 %v9098_v60, %v4526_v63 }
 0x523   : > { %v4453_v5 = vpop.f32.mrb[228].mxu0 }
 0x524   : > { %v4454_v55 = vadd.f32 %v4453_v5, %v8692_v20  ;;  %v6626_v58 = vpop.f32.mrb[229].mxu0  ;;  %v9100_v5 = vunpack.i.l.bf16 %v8160_v44 }
 0x525   : > { %v4456_v13 = vpop.f32.mrb[230].mxu0 }
 0x526   : > { %v4528_v33 = vmax.f32 %v4454_v55, 0.0  ;;  %v4457_v37 = vadd.f32 %v4456_v13, %v8706_v53  ;;  %v6627_v43 = vpop.f32.mrb[231].mxu0  ;;  %v4549_v24 = vmul.f32 %v9100_v5, %v4527_v25 }
 0x528   : > { %v4550_v3 = vmul.f32 %v9095_v61, %v4528_v33  ;;  %v4529_v34 = vmax.f32 %v4457_v37, 0.0  ;;  %v9103_v61 = vunpack.i.l.bf16 %v8290_v42 }
 0x52a   : > { %v4568_v32 = vmax.f32 %v4546_v49, %v4550_v3  ;;  %v4551_v20 = vmul.f32 %v9097_v16, %v4529_v34 }
 0x52b   : > { %v4461_v48 = vpop.f32.mrb[232].mxu0 }
 0x52c   : > { %v4569_v4 = vmax.f32 %v4547_v52, %v4551_v20  ;;  %v4462_v39 = vadd.f32 %v4461_v48, %v8728_v47  ;;  %v6630_v53 = vpop.f32.mrb[233].mxu0  ;;  %v9101_v47 = vunpack.i.l.bf16 %v8241_v14 }
 0x52d   : > { %v4464_v8 = vpop.f32.mrb[234].mxu0 }
 0x52e   : > { %v4530_v29 = vmax.f32 %v4462_v39, 0.0  ;;  %v4465_v41 = vadd.f32 %v4464_v8, %v8739_v54  ;;  %v6631_v62 = vpop.f32.mrb[235].mxu0  ;;  %v9104_v39 = vunpack.i.h.bf16 %v8290_v42 }
 0x530   : > { %v4552_v46 = vmul.f32 %v9099_v15, %v4530_v29  ;;  %v4531_v21 = vmax.f32 %v4465_v41, 0.0 }
 0x532   : > { %v4570_v35 = vmax.f32 %v4548_v59, %v4552_v46  ;;  %v4553_v55 = vmul.f32 %v9101_v47, %v4531_v21 }
 0x533   : > { %v4469_v58 = vpop.f32.mrb[236].mxu0 }
 0x534   : > { %v4571_v51 = vmax.f32 %v4549_v24, %v4553_v55  ;;  %v4470_v13 = vadd.f32 %v4469_v58, %v8758_v30  ;;  %v6634_v54 = vpop.f32.mrb[237].mxu0  ;;  %v9105_v24 = vunpack.i.l.bf16 %v8337_v2 }
 0x535   : > { %v4472_v40 = vpop.f32.mrb[238].mxu0 }
 0x536   : > { %v4532_v33 = vmax.f32 %v4470_v13, 0.0  ;;  %v4473_v17 = vadd.f32 %v4472_v40, %v8769_v11  ;;  %v6635_v37 = vpop.f32.mrb[239].mxu0 }
 0x538   : > { %v4554_v43 = vmul.f32 %v9102_v50, %v4532_v33  ;;  %v4533_v49 = vmax.f32 %v4473_v17, 0.0  ;;  %v9107_v17 = vunpack.i.h.bf16 %v8337_v2  ;;  %v9108_v50 = vunpack.i.h.bf16 %v8387_v0 }
 0x53a   : > { %v4572_v44 = vmax.f32 %v4568_v32, %v4554_v43  ;;  %v4555_v3 = vmul.f32 %v9103_v61, %v4533_v49 }
 0x53b   : > { %v4477_v34 = vpop.f32.mrb[240].mxu0 }
 0x53c   : > { %v4573_v26 = vmax.f32 %v4569_v4, %v4555_v3  ;;  %v4478_v52 = vadd.f32 %v4477_v34, %v8788_v22  ;;  %v6638_v16 = vpop.f32.mrb[241].mxu0 }
 0x53d   : > { %v4480_v30 = vpop.f32.mrb[242].mxu0 }
 0x53e   : > { %v4575_v20 = vmax.f32 %v4572_v44, %v4573_v26  ;;  %v4534_v48 = vmax.f32 %v4478_v52, 0.0  ;;  %v4481_v63 = vadd.f32 %v4480_v30, %v8799_v27  ;;  %v6639_v11 = vpop.f32.mrb[243].mxu0  ;;  %v9109_v44 = vunpack.i.l.bf16 %v8364_v9 }
 0x540   : > { %v4556_v14 = vmul.f32 %v9104_v39, %v4534_v48  ;;  %v4535_v46 = vmax.f32 %v4481_v63, 0.0  ;;  %v9111_v63 = vunpack.i.h.bf16 %v8364_v9  ;;  %v9112_v39 = vunpack.i.h.bf16 %v8410_v1 }
 0x542   : > { %v4574_v53 = vmax.f32 %v4570_v35, %v4556_v14  ;;  %v4557_v35 = vmul.f32 %v9105_v24, %v4535_v46 }
 0x543   : > { %v4485_v8 = vpop.f32.mrb[244].mxu0 }
 0x544   : > { %v4576_v32 = vmax.f32 %v4574_v53, %v4571_v51  ;;  %v4486_v25 = vadd.f32 %v4485_v8, %v8812_v28  ;;  %v6642_v29 = vpop.f32.mrb[245].mxu0  ;;  %v9106_v28 = vunpack.i.l.bf16 %v8387_v0 }
 0x545   : > { %v4488_v41 = vpop.f32.mrb[246].mxu0 }
 0x546   : > { %v4577_v4 = vmax.f32 %v4575_v20, %v4576_v32  ;;  %v4489_v22 = vadd.f32 %v4488_v41, %v8826_v12  ;;  %v6643_v62 = vpop.f32.mrb[247].mxu0  ;;  %v4536_v58 = vmax.f32 %v4486_v25, 0.0  ;;  %v9113_v32 = vunpack.i.l.bf16 %v8431_v56 }
 0x548   : > { %v4537_v54 = vmax.f32 %v4489_v22, 0.0  ;;  %v4558_v37 = vmul.f32 %v9107_v17, %v4536_v58  ;;  %v4578_v9 = vrot.slane %v4577_v4, 4  ;;  %v7050_v17 = vld [vmem:[%s9064_s2 + $0x498] sm:$0xff]  }
 0x54a   : > { %v4559_v61 = vmul.f32 %v9109_v44, %v4537_v54  ;;  %v5737_v44 = vld [vmem:[%s9066_s4 + $0x2] ss:$0 sm:$0xff] }
 0x54b   : > { %v4493_v60 = vpop.f32.mrb[248].mxu0 }
 0x54c   : > { %v4494_v59 = vadd.f32 %v4493_v60, %v8842_v7  ;;  %v6646_v15 = vpop.f32.mrb[249].mxu0 }
 0x54d   : > { %v4496_v27 = vpop.f32.mrb[250].mxu0  ;;  %v9114_v15 = vunpack.i.h.bf16 %v8431_v56 }
 0x54e   : > { %v4497_v42 = vadd.f32 %v4496_v27, %v8856_v57  ;;  %v6647_v21 = vpop.f32.mrb[251].mxu0  ;;  %v4538_v52 = vmax.f32 %v4494_v59, 0.0 }
 0x54f   : > { %v4579_v21 = vmax.f32 %v4577_v4, %v4578_v9  ;;  %v7048_v4 = vld [vmem:[%s9064_s2 + $0x488] sm:$0xff]  }
 0x550   : > { %v4539_v5 = vmax.f32 %v4497_v42, 0.0  ;;  %v4560_v11 = vmul.f32 %v9111_v63, %v4538_v52  ;;  %v5742_v63 = vld [vmem:[%s9066_s4 + $0x5] ss:$0 sm:$0xff] }
 0x552   : > { %v4561_v47 = vmul.f32 %v9106_v28, %v4539_v5  ;;  %v4580_v28 = vrot.slane %v4579_v21, 2 }
 0x553   : > { %v4501_v55 = vpop.f32.mrb[252].mxu0 }
 0x554   : > { %v4584_v12 = vmax.f32 %v4557_v35, %v4561_v47  ;;  %v4502_v51 = vadd.f32 %v4501_v55, %v8881_v10  ;;  %v6650_v13 = vpop.f32.mrb[253].mxu0  ;;  %v9110_v10 = vunpack.i.l.bf16 %v8410_v1  ;;  %v4581_v55 = vmax.f32 %v4579_v21, %v4580_v28  ;;  %v7058_v28 = vld [vmem:[%s9064_s2 + $0x4d8] sm:$0xff]  }
 0x555   : > { %v4504_v7 = vpop.f32.mrb[254].mxu0 }
 0x556   : > { %v4540_v40 = vmax.f32 %v4502_v51, 0.0  ;;  %v4505_v33 = vadd.f32 %v4504_v7, %v8886_v31  ;;  %v6651_v57 = vpop.f32.mrb[255].mxu0 }
 0x557   : > { %v7049_v57 = vld [vmem:[%s9064_s2 + $0x490] sm:$0xff]  }
 0x558   : > { %v4562_v43 = vmul.f32 %v9108_v50, %v4540_v40  ;;  %v4541_v49 = vmax.f32 %v4505_v33, 0.0  ;;  %v7052_v50 = vld [vmem:[%s9064_s2 + $0x4a8] sm:$0xff]  }
 0x55a   : > { %v4585_v3 = vmax.f32 %v4558_v37, %v4562_v43  ;;  %v4563_v34 = vmul.f32 %v9110_v10, %v4541_v49  ;;  %v7051_v37 = vld [vmem:[%s9064_s2 + $0x4a0] sm:$0xff]   ;;  %v7053_v43 = vld [vmem:[%s9064_s2 + $0x4b0] sm:$0xff]   ;;  %v7054_v49 = vld [vmem:[%s9064_s2 + $0x4b8] sm:$0xff]  }
 0x55b   : > { %v4509_v26 = vpop.f32.mrb[0].mxu0 }
 0x55c   : > { %v4586_v16 = vmax.f32 %v4559_v61, %v4563_v34  ;;  %v4510_v31 = vadd.f32 %v4509_v26, %v8891_v38  ;;  %v6654_v30 = vpop.f32.mrb[1].mxu0  ;;  %v5739_v61 = vld [vmem:[%s9066_s4 + $0x3] ss:$0 sm:$0xff] }
 0x55d   : > { %v4512_v20 = vpop.f32.mrb[2].mxu0 }
 0x55e   : > { %v4542_v2 = vmax.f32 %v4510_v31, 0.0  ;;  %v4513_v48 = vadd.f32 %v4512_v20, %v8893_v45  ;;  %v6655_v0 = vpop.f32.mrb[3].mxu0 }
 0x560   : > { %v4564_v14 = vmul.f32 %v9112_v39, %v4542_v2  ;;  %v4543_v53 = vmax.f32 %v4513_v48, 0.0  ;;  %v5741_v39 = vld [vmem:[%s9066_s4 + $0x4] ss:$0 sm:$0xff] }
 0x562   : > { %v4587_v8 = vmax.f32 %v4560_v11, %v4564_v14  ;;  %v4565_v25 = vmul.f32 %v9113_v32, %v4543_v53 }
 0x563   : > { %v4517_v29 = vpop.f32.mrb[4].mxu0 }
 0x564   : > { %v4588_v41 = vmax.f32 %v4584_v12, %v4565_v25  ;;  %v4518_v38 = vadd.f32 %v4517_v29, %v8897_v36  ;;  %v6658_v22 = vpop.f32.mrb[5].mxu0 }
 0x565   : > { %v4520_v62 = vpop.f32.mrb[6].mxu0  ;;  %v4604_v22 = vld [vmem:[#allocation4 + $0x2] sm:$0x3] }
 0x566   : > { %v4544_v60 = vmax.f32 %v4518_v38, 0.0  ;;  %v4521_v45 = vadd.f32 %v4520_v62, %v8899_v23  ;;  %v6659_v59 = vpop.f32.mrb[7].mxu0  ;;  %v4582_v23 = vrot.slane %v4581_v55, 1 }
 0x568   : > { %v4566_v1 = vmul.f32 %v9114_v15, %v4544_v60  ;;  %v4545_v27 = vmax.f32 %v4521_v45, 0.0  ;;  %v4583_v56 = vmax.f32 %v4581_v55, %v4582_v23  ;;  %v7061_v55 = vld [vmem:[%s9064_s2 + $0x4f0] sm:$0xff]  }
 0x56a   : > { %v4589_v46 = vmax.f32 %v4585_v3, %v4566_v1  ;;  %v4567_v42 = vmul.f32 %v4545_v27, %v8461_v19  ;;  %v7047_v19 = vld [vmem:[%s9064_s2 + $0x480] sm:$0xff]  }
 0x56c   : > { %v4591_v5 = vmax.f32 %v4588_v41, %v4589_v46  ;;  %v4590_v24 = vmax.f32 %v4586_v16, %v4567_v42  ;;  %v7055_v42 = vld [vmem:[%s9064_s2 + $0x4c0] sm:$0xff]  }
 0x56e   : > { %v4592_v35 = vmax.f32 %v4590_v24, %v4587_v8  ;;  %v7056_v24 = vld [vmem:[%s9064_s2 + $0x4c8] sm:$0xff]  }
 0x570   : > { %v4593_v36 = vmax.f32 %v4591_v5, %v4592_v35  ;;  %v7057_v35 = vld [vmem:[%s9064_s2 + $0x4d0] sm:$0xff]  }
 0x572   : > { %v4594_v47 = vrot.slane %v4593_v36, 4 }
 0x574   : > { %v4595_v58 = vmax.f32 %v4593_v36, %v4594_v47  ;;  %v7059_v36 = vld [vmem:[%s9064_s2 + $0x4e0] sm:$0xff]   ;;  %v7060_v47 = vld [vmem:[%s9064_s2 + $0x4e8] sm:$0xff]  }
 0x576   : > { %v4596_v12 = vrot.slane %v4595_v58, 2 }
 0x578   : > { %v4597_v51 = vmax.f32 %v4595_v58, %v4596_v12  ;;  %v7062_v58 = vld [vmem:[%s9064_s2 + $0x4f8] sm:$0xff]   ;;  %v5746_v12 = vld [vmem:[%s9066_s4 + $0x6] ss:$0 sm:$0xff] }
 0x57a   : > { %v4598_v13 = vrot.slane %v4597_v51, 1 }
 0x57c   : > { %v4599_v7 = vmax.f32 %v4597_v51, %v4598_v13 }
 0x57e   : > { %v4601_v54 = vsel %vm4600_vm5, %v4583_v56, %v4599_v7 }
 0x57f   : > { %v4602_v40 = vmax.f32 %v4601_v54, 0.0 }
 0x581   : > { %v4605_v33 = vpack.c.bf16 %v4602_v40, %v4602_v40 }
 0x583   : > { %5024 = vmatmul.mubr.bf16.vlgmr.msra.gmra.mrb[220].mxu1 %v4605_v33  ;;  %5065 = vmatmul.mubr.bf16.vlgmr.msra.gmra.mrb[8].mxu0 %v4605_v33 }
 0x584   : > { %6676 = vmatprep.mubr.msk.bf16.mxu1 %vm7120_vm0, %v7119_v18  ;;  %6661 = vmatpush3.bf16.msra.mxu1 %v7047_v19 }
 0x585   : > { %6662 = vmatprep.subr.bf16.mxu1 %v7119_v18 }
 0x588   : > { %6663 = vmatpush3.bf16.msra.mxu1 %v7048_v4 }
 0x589   : > { %6664 = vmatprep.subr.bf16.mxu1 %v7119_v18 }
 0x58c   : > { %6665 = vmatpush3.bf16.msra.mxu1 %v7049_v57 }
 0x58d   : > { %6666 = vmatprep.subr.bf16.mxu1 %v7119_v18 }
 0x590   : > { %6667 = vmatpush3.bf16.msra.mxu1 %v7050_v17 }
 0x591   : > { %6668 = vmatprep.subr.bf16.mxu1 %v7119_v18 }
 0x594   : > { %6669 = vmatpush3.bf16.msra.mxu1 %v7051_v37 }
 0x595   : > { %6670 = vmatprep.subr.bf16.mxu1 %v7119_v18 }
 0x598   : > { %6671 = vmatpush3.bf16.msra.mxu1 %v7052_v50 }
 0x599   : > { %6672 = vmatprep.subr.bf16.mxu1 %v7119_v18 }
 0x59c   : > { %6673 = vmatpush3.bf16.msra.mxu1 %v7053_v43 }
 0x59d   : > { %6674 = vmatprep.subr.bf16.mxu1 %v7119_v18 }
 0x5a0   : > { %6675 = vmatpush3.bf16.msra.mxu1 %v7054_v49 }
 0x5a1   : > { %6680 = vmatprep.subr.bf16.mxu1 %v7119_v18 }
 0x656   : > { %v5025_v3 = vpop.f32.mrb[220].mxu1  ;;  %v5066_v10 = vpop.f32.mrb[8].mxu0 }
 0x657   : > { %v5078_v34 = vadd.f32 %v5737_v44, %v5025_v3  ;;  %v5027_v26 = vpop.f32.mrb[221].mxu1  ;;  %v5068_v52 = vpop.f32.mrb[9].mxu0  ;;  %v5102_v53 = vadd.f32 %v5741_v39, %v5066_v10 }
 0x658   : > { %v5090_v16 = vadd.f32 %v5739_v61, %v5027_v26  ;;  %v5029_v31 = vpop.f32.mrb[222].mxu1  ;;  %v5070_v30 = vpop.f32.mrb[10].mxu0  ;;  %v5109_v11 = vadd.f32 %v5742_v63, %v5068_v52 }
 0x659   : > { %v5738_v20 = vmul.f32 -1.442695, %v5078_v34  ;;  %v5030_v2 = vpop.f32.mrb[223].mxu1  ;;  %v5071_v48 = vpop.f32.mrb[11].mxu0 }
 0x65a   : > { %v5740_v0 = vmul.f32 -1.442695, %v5090_v16  ;;  %v5743_v14 = vmul.f32 -1.442695, %v5109_v11 }
 0x65b   : > { %7063 = vpow2.f32 %v5738_v20 }
 0x65c   : > { %7065 = vpow2.f32 %v5740_v0 }
 0x65d   : > { %7067 = vpow2.f32 %v5743_v14 }
 0x65e   : > { %7069 = vtanh.f32 %v5102_v53 }
 0x665   : > { %v7064_v8 = vpop.eup %7063 }
 0x666   : > { %v7066_v32 = vpop.eup %7065  ;;  %v5082_v25 = vadd.f32 1.0, %v7064_v8 }
 0x667   : > { %v5094_v29 = vadd.f32 1.0, %v7066_v32  ;;  %v7068_v41 = vpop.eup %7067 }
 0x668   : > { %7071 = vrcp.f32 %v5082_v25  ;;  %v7070_v38 = vpop.eup %7069  ;;  %v5113_v59 = vadd.f32 1.0, %v7068_v41 }
 0x669   : > { %7073 = vrcp.f32 %v5094_v29 }
 0x66a   : > { %7075 = vrcp.f32 %v5113_v59 }
 0x672   : > { %v7072_v62 = vpop.eup %7071 }
 0x673   : > { %v7074_v60 = vpop.eup %7073  ;;  %v5117_v45 = vmul.f32 %v7072_v62, %v7070_v38 }
 0x674   : > { %v5116_v9 = vmul.f32 %v7074_v60, %v4604_v22  ;;  %v7076_v1 = vpop.eup %7075 }
 0x676   : > { %v5118_v15 = vadd.f32 %v5117_v45, %v5116_v9 }
 0x678   : > { %7077 = vtanh.f32 %v5118_v15 }
 0x682   : > { %v7078_v27 = vpop.eup %7077 }
 0x683   : > { %v5120_v46 = vmul.f32 %v7078_v27, %v7076_v1 }
 0x685   : > { %v5123_v21 = vcombine.low %v5120_v46, %v5118_v15  ;;  %v5134_v5 = vpack.c.bf16 %v5120_v46, %v5120_v46 }
 0x687   : > { %5744 = vst.sshfl [vmem:[#allocation4] sm:$0x33 pattern:$0x76325410] %v5123_v21  ;;  %6677 = vmatmul.mubr.bf16.vlgmr.msra.gmra.mrb[224].mxu1 %v5134_v5 }
 0x688   : > { %5745 = vst.sshfl [vmem:[%s7177_s11] sm:$0x33 pattern:$0x76325410] %v5123_v21  ;;  %6681 = vmatpush3.bf16.msra.mxu1 %v7055_v42  ;;  %6696 = vmatprep.mubr.msk.bf16.mxu1 %vm7120_vm0, %v7119_v18  ;;  %vm5355_vm0 = vcmp.lt.s32.totalorder %v7274_v6, 7 }
 0x689   : > { %6682 = vmatprep.subr.bf16.mxu1 %v7119_v18 }
 0x68c   : > { %6683 = vmatpush3.bf16.msra.mxu1 %v7056_v24 }
 0x68d   : > { %6684 = vmatprep.subr.bf16.mxu1 %v7119_v18 }
 0x690   : > { %6685 = vmatpush3.bf16.msra.mxu1 %v7057_v35 }
 0x691   : > { %6686 = vmatprep.subr.bf16.mxu1 %v7119_v18 }
 0x694   : > { %6687 = vmatpush3.bf16.msra.mxu1 %v7058_v28 }
 0x695   : > { %6688 = vmatprep.subr.bf16.mxu1 %v7119_v18 }
 0x698   : > { %6689 = vmatpush3.bf16.msra.mxu1 %v7059_v36 }
 0x699   : > { %6690 = vmatprep.subr.bf16.mxu1 %v7119_v18 }
 0x69c   : > { %6691 = vmatpush3.bf16.msra.mxu1 %v7060_v47 }
 0x69d   : > { %6692 = vmatprep.subr.bf16.mxu1 %v7119_v18 }
 0x6a0   : > { %6693 = vmatpush3.bf16.msra.mxu1 %v7061_v55 }
 0x6a1   : > { %6694 = vmatprep.subr.bf16.mxu1 %v7119_v18  ;;  %v5755_v18 = vld [vmem:[%s9066_s4 + $0x7] ss:$0 sm:$0xff] }
 0x6a4   : > { %6695 = vmatpush3.bf16.msra.mxu1 %v7062_v58 }
 0x75a   : > { %v5238_v23 = vpop.f32.mrb[224].mxu1 }
 0x75b   : > { %v5239_v51 = vadd.f32 %v5746_v12, %v5238_v23  ;;  %v6678_v13 = vpop.f32.mrb[225].mxu1 }
 0x75c   : > { %v5241_v56 = vpop.f32.mrb[226].mxu1 }
 0x75d   : > { %7079 = vtanh.f32 %v5239_v51  ;;  %v6679_v7 = vpop.f32.mrb[227].mxu1 }
 0x767   : > { %v7080_v54 = vpop.eup %7079 }
 0x768   : > { %v5245_v40 = vpack.c.bf16 %v7080_v54, %v7080_v54 }
 0x76a   : > { %6697 = vmatmul.mubr.bf16.vlgmr.msra.gmra.mrb[228].mxu1 %v5245_v40 }
 0x83d   : > { %v5349_v33 = vpop.f32.mrb[228].mxu1 }
 0x83e   : > { %v5350_v19 = vadd.f32 %v5755_v18, %v5349_v33  ;;  %v6698_v4 = vpop.f32.mrb[229].mxu1 }
 0x83f   : > { %v5352_v57 = vpop.f32.mrb[230].mxu1 }
 0x840   : > { %v6699_v17 = vpop.f32.mrb[231].mxu1  ;;  %v5356_v37 = vsel %vm5355_vm0, %v5350_v19, -1e+30 }
 0x841   : > { %v5358_v50 = vsel %vm5357_vm6, %v5356_v37, -inf }
 0x842   : > { %5359 = vmax.xlane.f32.xlu0 %v5358_v50 }
 0x8cf   : > { %v5360_v43 = vpop.xlane.xlu0 %5359 }
 0x8d0   : > { %v5361_v49 = vsub.f32 %v5350_v19, %v5360_v43 }
 0x8d2   : > { %v5362_v44 = vmul.f32 1.442695, %v5361_v49 }
 0x8d4   : > { %7081 = vpow2.f32 %v5362_v44 }
 0x8de   : > { %v7082_v61 = vpop.eup %7081 }
 0x8df   : > { %v5364_v3 = vsel %vm5355_vm0, %v7082_v61, 0.0 }
 0x8e0   : > { %v5365_v10 = vsel %vm5357_vm6, %v5364_v3, 0.0 }
 0x8e1   : > { %5366 = vadd.xlane.f32.xlu1 %v5365_v10 }
 0x96e   : > { %v5367_v34 = vpop.xlane.xlu1 %5366 }
 0x96f   : > { %7083 = vlog2.f32 %v5367_v34 }
 0x979   : > { %v7084_v26 = vpop.eup %7083 }
 0x97a   : > { %v5369_v52 = vmul.f32 0.6931472, %v7084_v26 }
 0x97c   : > { %v5370_v16 = vadd.f32 %v5369_v52, %v5360_v43 }
 0x97e   : > { %v5371_v31 = vsub.f32 %v5350_v19, %v5370_v16 }
 0x980   : > { %v5372_v30 = vsel %vm5355_vm0, %v5371_v31, %v5350_v19 }
 0x981   : > { %5373 = vst [vmem:[%s7167_s28] sm:$0x3] %v5372_v30 }
 0x982 PF: > { %s17_s21 = sadd.s32 1, %s7113_s21  }
 0x983   : > { %p14_p5 = scmp.ge.s32.totalorder %s17_s21, 10  }
 0x985   :  { %16 = sbr.rel (!%p14_p5) target bundleno = 1 (0x1), region = 86 }

</bundles_post_ra>
